<compile_context>
chip_gen: v7x
topology: tpu7x:2x2x1
jax: 0.10.0
libtpu: 0.0.40
codegen_flags: <defaults>
</compile_context>

<pallas_src>
import functools

import numpy as np

import jax
import jax.numpy as jnp
from jax.experimental import pallas as pl
from jax.experimental.pallas import tpu as pltpu


# ----------------------------------------------------------------------------
# Fused GEMM kernel: y = act(x @ w + b), bf16 operands, f32 accumulate, K-tiled
# ----------------------------------------------------------------------------
def _matmul_kernel(x_ref, w_ref, b_ref, o_ref, acc_ref, *, relu):
    @pl.when(pl.program_id(1) == 0)
    def _():
        acc_ref[...] = jnp.zeros_like(acc_ref)

    acc_ref[...] += jnp.dot(x_ref[...], w_ref[...],
                            preferred_element_type=jnp.float32)

    @pl.when(pl.program_id(1) == pl.num_programs(1) - 1)
    def _():
        acc = acc_ref[...] + b_ref[...]
        if relu:
            acc = jnp.maximum(acc, 0.0)
        o_ref[...] = acc.astype(o_ref.dtype)


def _pick_tk(K):
    """K tile: single block for small K, else the largest 128-multiple divisor."""
    if K <= 1024:
        return K
    for tk in (1024, 512, 256, 128):
        if K % tk == 0:
            return tk
    return K  # irregular large K: keep as one resident block


def fused_matmul(x, w, b, relu, out_dtype=jnp.bfloat16):
    """y = act(x @ w + b). x:(M,K), w:(K,N), b:(N,). Lane-dense, K-tiled, bf16 MXU."""
    M, K = x.shape
    N = w.shape[1]
    Np = ((N + 127) // 128) * 128            # lane-dense output stores
    if Np != N:
        w = jnp.pad(w, ((0, 0), (0, Np - N)))
        b = jnp.pad(b, ((0, Np - N),))
    xb = x.astype(jnp.bfloat16)
    wb = w.astype(jnp.bfloat16)
    b2 = b.astype(jnp.float32).reshape(1, Np)

    tm = min(M, 512)
    tk = _pick_tk(K)
    grid = (pl.cdiv(M, tm), pl.cdiv(K, tk))

    out = pl.pallas_call(
        functools.partial(_matmul_kernel, relu=relu),
        out_shape=jax.ShapeDtypeStruct((M, Np), out_dtype),
        grid=grid,
        in_specs=[
            pl.BlockSpec((tm, tk), lambda i, k: (i, k)),
            pl.BlockSpec((tk, Np), lambda i, k: (k, 0)),
            pl.BlockSpec((1, Np), lambda i, k: (0, 0)),
        ],
        out_specs=pl.BlockSpec((tm, Np), lambda i, k: (i, 0)),
        scratch_shapes=[pltpu.VMEM((tm, Np), jnp.float32)],
        compiler_params=pltpu.CompilerParams(
            dimension_semantics=("parallel", "arbitrary")),
    )(xb, wb, b2)
    if Np != N:
        out = out[:, :N]
    return out


# ----------------------------------------------------------------------------
# ASPP image-pooling branch fused into a per-image projection bias
# ----------------------------------------------------------------------------
def _gap_bias_kernel(x_ref, wb4_ref, bb4_ref, wp4_ref, bp_ref, o_ref):
    # GAP over H*W, b4 1x1 ConvBNReLU, then its contribution to the 1x1 projection
    # (rows [1024:1280] of the projection weight) -> a per-image (1, 256) bias.
    xm = jnp.mean(x_ref[0].astype(jnp.float32), axis=0, keepdims=True)   # (1, C)
    pb = jnp.dot(xm.astype(jnp.bfloat16), wb4_ref[...],
                 preferred_element_type=jnp.float32) + bb4_ref[...]
    pb = jnp.maximum(pb, 0.0)                                            # (1, 256)
    o_ref[0] = jnp.dot(pb.astype(jnp.bfloat16), wp4_ref[...],
                       preferred_element_type=jnp.float32) + bp_ref[...]


def gap_pool_bias(x, wb4, bb4, wp_pool, bproj):
    """Fused AdaptiveAvgPool2d(1) + b4 ConvBNReLU + pooled-branch projection slice."""
    N, H, W, C = x.shape
    x3 = x.reshape(N, H * W, C)
    return pl.pallas_call(
        _gap_bias_kernel,
        out_shape=jax.ShapeDtypeStruct((N, 1, 256), jnp.float32),
        grid=(N,),
        in_specs=[
            pl.BlockSpec((1, H * W, C), lambda n: (n, 0, 0)),
            pl.BlockSpec((C, 256), lambda n: (0, 0)),
            pl.BlockSpec((1, 256), lambda n: (0, 0)),
            pl.BlockSpec((256, 256), lambda n: (0, 0)),
            pl.BlockSpec((1, 256), lambda n: (0, 0)),
        ],
        out_specs=pl.BlockSpec((1, 1, 256), lambda n: (n, 0, 0)),
        compiler_params=pltpu.CompilerParams(dimension_semantics=("parallel",)),
    )(x3, wb4.astype(jnp.bfloat16), bb4.reshape(1, 256).astype(jnp.float32),
      wp_pool.astype(jnp.bfloat16), bproj.reshape(1, 256).astype(jnp.float32))


# ----------------------------------------------------------------------------
# ASPP projection: 4 branch GEMMs accumulated in one kernel, no 1280-ch concat
# ----------------------------------------------------------------------------
def _aspp_project_kernel(f0_ref, f1_ref, f2_ref, f3_ref, wp_ref, b_ref, o_ref):
    acc = jnp.dot(f0_ref[0], wp_ref[0], preferred_element_type=jnp.float32)
    acc += jnp.dot(f1_ref[0], wp_ref[1], preferred_element_type=jnp.float32)
    acc += jnp.dot(f2_ref[0], wp_ref[2], preferred_element_type=jnp.float32)
    acc += jnp.dot(f3_ref[0], wp_ref[3], preferred_element_type=jnp.float32)
    acc += b_ref[0]                  # per-image bias: bp + pooled_branch @ Wp_pool
    o_ref[0] = jnp.maximum(acc, 0.0).astype(o_ref.dtype)


def aspp_project(feats, wp_spatial, bias_img, out_dtype=jnp.bfloat16):
    N, H, W, Cb = feats[0].shape
    HW = H * W
    fs = [f.reshape(N, HW, Cb) for f in feats]
    ts = HW if HW <= 256 else 256
    f_spec = pl.BlockSpec((1, ts, Cb), lambda n, s: (n, s, 0))
    out = pl.pallas_call(
        _aspp_project_kernel,
        out_shape=jax.ShapeDtypeStruct((N, HW, 256), out_dtype),
        grid=(N, pl.cdiv(HW, ts)),
        in_specs=[f_spec, f_spec, f_spec, f_spec,
                  pl.BlockSpec((4, Cb, 256), lambda n, s: (0, 0, 0)),
                  pl.BlockSpec((1, 1, 256), lambda n, s: (n, 0, 0))],
        out_specs=pl.BlockSpec((1, ts, 256), lambda n, s: (n, s, 0)),
        compiler_params=pltpu.CompilerParams(
            dimension_semantics=("parallel", "parallel")),
    )(fs[0], fs[1], fs[2], fs[3], wp_spatial.astype(jnp.bfloat16), bias_img)
    return out.reshape(N, H, W, 256)


# ----------------------------------------------------------------------------
# Bilinear upsample (align_corners=True): scalar-prefetch row gather + static matrix
# ----------------------------------------------------------------------------
def _upsample_kernel(lo_ref, hi_ref, xlo_ref, xhi_ref, alo_ref, ahi_ref, o_ref):
    xlo = xlo_ref[0, 0].astype(jnp.float32)      # (Win, C)
    xhi = xhi_ref[0, 0].astype(jnp.float32)
    o = jnp.dot(alo_ref[0], xlo, preferred_element_type=jnp.float32)
    o += jnp.dot(ahi_ref[0], xhi, preferred_element_type=jnp.float32)
    o_ref[0, 0] = o.astype(o_ref.dtype)


def _interp_coeffs(out_size, in_size):
    """align_corners=True source indices / hi-weight (static numpy)."""
    if out_size == 1 or in_size == 1:
        z = np.zeros((out_size,), np.int32)
        return z, z, np.zeros((out_size,), np.float32)
    src = np.arange(out_size, dtype=np.float64) * (in_size - 1) / (out_size - 1)
    lo = np.clip(np.floor(src), 0, in_size - 1).astype(np.int32)
    hi = np.minimum(lo + 1, in_size - 1).astype(np.int32)
    return lo, hi, (src - lo).astype(np.float32)


def _interp_matrix(out_size, in_size):
    lo, hi, w = _interp_coeffs(out_size, in_size)
    A = np.zeros((out_size, in_size), np.float32)
    A[np.arange(out_size), lo] += 1.0 - w
    A[np.arange(out_size), hi] += w
    return A


def bilinear_resize(x, out_h, out_w):
    """F.interpolate(mode='bilinear', align_corners=True) on NHWC, one Pallas kernel."""
    N, H, W, C = x.shape
    if out_h == H and out_w == W:
        return x
    lo_h, hi_h, wh = _interp_coeffs(out_h, H)
    Aw = _interp_matrix(out_w, W)                                     # (out_w, W)
    alo = ((1.0 - wh)[:, None, None] * Aw[None]).astype(np.float32)   # (out_h, out_w, W)
    ahi = (wh[:, None, None] * Aw[None]).astype(np.float32)

    x_spec_lo = pl.BlockSpec((1, 1, W, C), lambda n, ho, lo, hi: (n, lo[ho], 0, 0))
    x_spec_hi = pl.BlockSpec((1, 1, W, C), lambda n, ho, lo, hi: (n, hi[ho], 0, 0))
    a_spec = pl.BlockSpec((1, out_w, W), lambda n, ho, lo, hi: (ho, 0, 0))
    return pl.pallas_call(
        _upsample_kernel,
        out_shape=jax.ShapeDtypeStruct((N, out_h, out_w, C), x.dtype),
        grid_spec=pltpu.PrefetchScalarGridSpec(
            num_scalar_prefetch=2,
            grid=(N, out_h),
            in_specs=[x_spec_lo, x_spec_hi, a_spec, a_spec],
            out_specs=pl.BlockSpec((1, 1, out_w, C),
                                   lambda n, ho, lo, hi: (n, ho, 0, 0)),
        ),
        compiler_params=pltpu.CompilerParams(
            dimension_semantics=("parallel", "arbitrary")),
    )(jnp.asarray(lo_h), jnp.asarray(hi_h), x, x,
      jnp.asarray(alo), jnp.asarray(ahi))


# ----------------------------------------------------------------------------
# JAX glue: im2col patch extraction (weights are folded to matching row layout)
# ----------------------------------------------------------------------------
def im2col(x, ksize, stride, padding, dilation):
    N, H, W, C = x.shape
    xp = jnp.pad(x, ((0, 0), (padding, padding), (padding, padding), (0, 0)))
    Hout = (H + 2 * padding - dilation * (ksize - 1) - 1) // stride + 1
    Wout = (W + 2 * padding - dilation * (ksize - 1) - 1) // stride + 1
    patches = []
    for i in range(ksize):
        for j in range(ksize):
            h0 = i * dilation
            w0 = j * dilation
            sl = xp[:, h0:h0 + stride * (Hout - 1) + 1:stride,
                       w0:w0 + stride * (Wout - 1) + 1:stride, :]
            patches.append(sl)
    cols = jnp.concatenate(patches, axis=-1)
    return cols.reshape(N * Hout * Wout, ksize * ksize * C), (N, Hout, Wout)


def _dilated_patches(xp, pmax, rate, H, W):
    """3x3 dilated (stride 1, pad=rate) patches from one shared max-padded copy."""
    N, _, _, C = xp.shape
    base = pmax - rate
    patches = []
    for i in range(3):
        for j in range(3):
            h0 = base + i * rate
            w0 = base + j * rate
            patches.append(xp[:, h0:h0 + H, w0:w0 + W, :])
    cols = jnp.concatenate(patches, axis=-1)
    return cols.reshape(N * H * W, 9 * C)


def conv_bn_relu(x, wf, bf, ksize=1, stride=1, padding=0, dilation=1,
                 relu=True, out_dtype=jnp.bfloat16):
    """Conv(+folded BN)(+ReLU) on NHWC via im2col + fused Pallas GEMM."""
    N, H, W, C = x.shape
    if ksize == 1 and stride == 1:
        cols, shape = x.reshape(N * H * W, C), (N, H, W)
    else:
        cols, shape = im2col(x, ksize, stride, padding, dilation)
    out = fused_matmul(cols, wf, bf, relu=relu, out_dtype=out_dtype)
    return out.reshape(shape + (wf.shape[1],))


# ----------------------------------------------------------------------------
# ASPP + head forward
# ----------------------------------------------------------------------------
def aspp_forward(x, p):
    """ASPP(in_channels, rates=(6,12,18)); pooled branch folded into the projection."""
    N, H, W, C = x.shape
    rates = (6, 12, 18)

    feats = [conv_bn_relu(x, *p["b0"])]                                # 1x1 -> 256
    # TODO(synk): replace im2col glue with a halo-tiled dilated-conv Pallas kernel
    #             (9 shifted MXU accumulations over a VMEM-resident input tile).
    pmax = max(rates)
    xp = jnp.pad(x, ((0, 0), (pmax, pmax), (pmax, pmax), (0, 0)))      # shared pad
    for rate, name in zip(rates, ("b1", "b2", "b3")):
        cols = _dilated_patches(xp, pmax, rate, H, W)
        y = fused_matmul(cols, p[name][0], p[name][1], relu=True)
        feats.append(y.reshape(N, H, W, 256))

    wp, bp = p["project"]                         # folded 1x1 projection (1280,256)
    wp_spatial = wp[:4 * 256].reshape(4, 256, 256)
    wp_pool = wp[4 * 256:]
    bias_img = gap_pool_bias(x, p["b4"][0], p["b4"][1], wp_pool, bp)   # (N,1,256) f32
    out = aspp_project(feats, wp_spatial, bias_img)
    # Dropout(0.5) in the ASPP projection is identity in eval mode.
    return out


def head_forward(c1_nchw, c4_nchw, params):
    c1 = jnp.transpose(c1_nchw, (0, 2, 3, 1)).astype(jnp.bfloat16)
    c4 = jnp.transpose(c4_nchw, (0, 2, 3, 1)).astype(jnp.bfloat16)
    c4 = aspp_forward(c4, params["aspp"])                              # (N,H4,W4,256)
    c4 = bilinear_resize(c4, c1.shape[1], c1.shape[2])                 # to c1 size
    c1 = conv_bn_relu(c1, *params["aux"])                              # 1x1 -> 48
    out = jnp.concatenate([c1, c4], axis=-1)                           # 48 + 256 = 304
    # self.project = _ConvBNReLU(304, 256, 3, 3): kernel=3, stride=3, padding=1
    out = conv_bn_relu(out, *params["project"], ksize=3, stride=3, padding=1)
    # self.reduce_conv = nn.Conv2d(256, nclass, 1, 1): bias, no BN, no ReLU
    out = conv_bn_relu(out, params["reduce_w"], params["reduce_b"],
                       relu=False, out_dtype=jnp.float32)
    return jnp.transpose(out, (0, 3, 1, 2))                            # back to NCHW


# ----------------------------------------------------------------------------
# Deterministic parameter initialization (BN folded into conv weight / bias)
# ----------------------------------------------------------------------------
def conv_bn_params(key, cin, cout, ksize):
    kw, kg, kb, km, kv = jax.random.split(key, 5)
    w = jax.random.normal(kw, (ksize, ksize, cin, cout), jnp.float32) * 0.05
    gamma = jax.random.uniform(kg, (cout,), jnp.float32, 0.5, 1.5)
    beta = jax.random.normal(kb, (cout,), jnp.float32) * 0.1
    mean = jax.random.normal(km, (cout,), jnp.float32) * 0.1
    var = jax.random.uniform(kv, (cout,), jnp.float32, 0.5, 1.5)
    scale = gamma / jnp.sqrt(var + 1e-5)
    wf = (w * scale).reshape(ksize * ksize * cin, cout)
    bf = beta - mean * scale
    return wf, bf


def init_params(key, nclass, in_channels, inter_channels):
    keys = jax.random.split(key, 10)
    aspp = {
        "b0": conv_bn_params(keys[0], in_channels, 256, 1),
        "b1": conv_bn_params(keys[1], in_channels, 256, 3),
        "b2": conv_bn_params(keys[2], in_channels, 256, 3),
        "b3": conv_bn_params(keys[3], in_channels, 256, 3),
        "b4": conv_bn_params(keys[4], in_channels, 256, 1),
        "project": conv_bn_params(keys[5], 5 * 256, 256, 1),
    }
    return {
        "aspp": aspp,
        "aux": conv_bn_params(keys[6], inter_channels, 48, 1),
        "project": conv_bn_params(keys[7], 304, 256, 3),
        "reduce_w": jax.random.normal(keys[8], (256, nclass), jnp.float32) * 0.05,
        "reduce_b": jax.random.normal(keys[9], (nclass,), jnp.float32) * 0.05,
    }


# ----------------------------------------------------------------------------
if __name__ == "__main__":
    nclass, in_channels, inter_channels = 5, 8, 4

    key = jax.random.PRNGKey(0)
    kp, k1, k4 = jax.random.split(key, 3)
    params = init_params(kp, nclass, in_channels, inter_channels)

    # c1: low-level feature (NCHW), c4: high-level feature (NCHW)
    c1 = jax.random.normal(k1, (2, inter_channels, 16, 16), jnp.float32)
    c4 = jax.random.normal(k4, (2, in_channels, 8, 8), jnp.float32)

    out = jax.jit(head_forward)(c1, c4, params)
    jax.block_until_ready(out)

    assert out.shape[0] == 2 and out.shape[1] == nclass, out.shape
    print("KERNEL_OK")
</pallas_src>

<mosaic_0001>
module attributes {stable_mosaic.version = 11 : i64} {
  func.func @_matmul_kernel(%arg0: i32, %arg1: i32, %arg2: memref<128x72xbf16, #tpu.memory_space<vmem>>, %arg3: memref<72x256xbf16, #tpu.memory_space<vmem>>, %arg4: memref<1x256xf32, #tpu.memory_space<vmem>>, %arg5: memref<128x256xbf16, #tpu.memory_space<vmem>>, %arg6: memref<128x256xf32, #tpu.memory_space<vmem>>) attributes {dimension_semantics = [#tpu.dimension_semantics<parallel>, #tpu.dimension_semantics<arbitrary>], iteration_bounds = array<i64: 1, 1>, scalar_prefetch = 0 : i64, scratch_operands = 1 : i64, tpu.core_type = #tpu.core_type<tc>, window_params = [{transform_indices = @transform_0, window_bounds = array<i64: 128, 72>}, {transform_indices = @transform_1, window_bounds = array<i64: 72, 256>}, {pipeline_mode = #tpu.pipeline_mode<synchronous>, transform_indices = @transform_2, window_bounds = array<i64: 1, 256>}, {transform_indices = @transform_3, window_bounds = array<i64: 128, 256>}]} {
    %c0_i32 = arith.constant 0 : i32
    %0 = arith.cmpi eq, %arg1, %c0_i32 : i32
    %1 = arith.extui %0 : i1 to i32
    %c0_i32_0 = arith.constant 0 : i32
    %2 = arith.cmpi ne, %1, %c0_i32_0 : i32
    scf.if %2 {
      %cst_10 = arith.constant 0.000000e+00 : f32
      %12 = vector.broadcast %cst_10 : f32 to vector<128x256xf32>
      %c0_11 = arith.constant 0 : index
      %c0_12 = arith.constant 0 : index
      %13 = vector.load %arg6[%c0_11, %c0_12] : memref<128x256xf32, #tpu.memory_space<vmem>>, vector<128x256xf32>
      tpu.vector_store %arg6[%c0_11, %c0_12], %12 {strides = array<i32>} : memref<128x256xf32, #tpu.memory_space<vmem>>, vector<128x256xf32>,
    } else {
    }
    %c0 = arith.constant 0 : index
    %c0_1 = arith.constant 0 : index
    %3 = vector.load %arg6[%c0, %c0_1] : memref<128x256xf32, #tpu.memory_space<vmem>>, vector<128x256xf32>
    %c0_2 = arith.constant 0 : index
    %c0_3 = arith.constant 0 : index
    %4 = vector.load %arg2[%c0_2, %c0_3] : memref<128x72xbf16, #tpu.memory_space<vmem>>, vector<128x72xbf16>
    %c0_4 = arith.constant 0 : index
    %c0_5 = arith.constant 0 : index
    %5 = vector.load %arg3[%c0_4, %c0_5] : memref<72x256xbf16, #tpu.memory_space<vmem>>, vector<72x256xbf16>
    %cst = arith.constant dense<0.000000e+00> : vector<128x256xf32>
    %6 = tpu.matmul %4, %5, %cst {dimension_numbers = #tpu.dot_dimension_numbers<[1], [0], [0], [1], [0, 0, 1, 1], [], []>} : vector<128x72xbf16>, vector<72x256xbf16>, vector<128x256xf32> -> vector<128x256xf32>
    %7 = arith.addf %3, %6 : vector<128x256xf32>
    %c0_6 = arith.constant 0 : index
    %c0_7 = arith.constant 0 : index
    %8 = vector.load %arg6[%c0_6, %c0_7] : memref<128x256xf32, #tpu.memory_space<vmem>>, vector<128x256xf32>
    tpu.vector_store %arg6[%c0_6, %c0_7], %7 {strides = array<i32>} : memref<128x256xf32, #tpu.memory_space<vmem>>, vector<128x256xf32>,
    %c0_i32_8 = arith.constant 0 : i32
    %9 = arith.cmpi eq, %arg1, %c0_i32_8 : i32
    %10 = arith.extui %9 : i1 to i32
    %c0_i32_9 = arith.constant 0 : i32
    %11 = arith.cmpi ne, %10, %c0_i32_9 : i32
    scf.if %11 {
      %c0_10 = arith.constant 0 : index
      %c0_11 = arith.constant 0 : index
      %12 = vector.load %arg6[%c0_10, %c0_11] : memref<128x256xf32, #tpu.memory_space<vmem>>, vector<128x256xf32>
      %c0_12 = arith.constant 0 : index
      %c0_13 = arith.constant 0 : index
      %13 = vector.load %arg4[%c0_12, %c0_13] : memref<1x256xf32, #tpu.memory_space<vmem>>, vector<1x256xf32>
      %14 = vector.broadcast %13 : vector<1x256xf32> to vector<128x256xf32>
      %15 = arith.addf %12, %14 : vector<128x256xf32>
      %cst_14 = arith.constant 0.000000e+00 : f32
      %16 = vector.broadcast %cst_14 : f32 to vector<128x256xf32>
      %17 = arith.maximumf %15, %16 : vector<128x256xf32>
      %18 = arith.truncf %17 : vector<128x256xf32> to vector<128x256xbf16>
      %c0_15 = arith.constant 0 : index
      %c0_16 = arith.constant 0 : index
      %19 = vector.load %arg5[%c0_15, %c0_16] : memref<128x256xbf16, #tpu.memory_space<vmem>>, vector<128x256xbf16>
      tpu.vector_store %arg5[%c0_15, %c0_16], %18 {strides = array<i32>} : memref<128x256xbf16, #tpu.memory_space<vmem>>, vector<128x256xbf16>,
    } else {
    }
    return
  }
  func.func @transform_0(%arg0: i32, %arg1: i32) -> (i32, i32) {
    %c0_i32 = arith.constant 0 : i32
    return %arg0, %arg1 : i32, i32
  }
  func.func @transform_1(%arg0: i32, %arg1: i32) -> (i32, i32) {
    %c0_i32 = arith.constant 0 : i32
    %c0_i32_0 = arith.constant 0 : i32
    return %arg1, %c0_i32 : i32, i32
  }
  func.func @transform_2(%arg0: i32, %arg1: i32) -> (i32, i32) {
    %c0_i32 = arith.constant 0 : i32
    %c0_i32_0 = arith.constant 0 : i32
    %c0_i32_1 = arith.constant 0 : i32
    return %c0_i32, %c0_i32_0 : i32, i32
  }
  func.func @transform_3(%arg0: i32, %arg1: i32) -> (i32, i32) {
    %c0_i32 = arith.constant 0 : i32
    %c0_i32_0 = arith.constant 0 : i32
    return %arg0, %c0_i32 : i32, i32
  }
}

module attributes {stable_mosaic.version = 11 : i64} {
  func.func @_matmul_kernel(%arg0: i32, %arg1: i32, %arg2: memref<128x72xbf16, #tpu.memory_space<vmem>>, %arg3: memref<72x256xbf16, #tpu.memory_space<vmem>>, %arg4: memref<1x256xf32, #tpu.memory_space<vmem>>, %arg5: memref<128x256xbf16, #tpu.memory_space<vmem>>, %arg6: memref<128x256xf32, #tpu.memory_space<vmem>>) attributes {dimension_semantics = [#tpu.dimension_semantics<parallel>, #tpu.dimension_semantics<arbitrary>], iteration_bounds = array<i64: 1, 1>, scalar_prefetch = 0 : i64, scratch_operands = 1 : i64, tpu.core_type = #tpu.core_type<tc>, window_params = [{transform_indices = @transform_0, window_bounds = array<i64: 128, 72>}, {transform_indices = @transform_1, window_bounds = array<i64: 72, 256>}, {pipeline_mode = #tpu.pipeline_mode<synchronous>, transform_indices = @transform_2, window_bounds = array<i64: 1, 256>}, {transform_indices = @transform_3, window_bounds = array<i64: 128, 256>}]} {
    %c0_i32 = arith.constant 0 : i32
    %0 = arith.cmpi eq, %arg1, %c0_i32 : i32
    %1 = arith.extui %0 : i1 to i32
    %c0_i32_0 = arith.constant 0 : i32
    %2 = arith.cmpi ne, %1, %c0_i32_0 : i32
    scf.if %2 {
      %cst_10 = arith.constant 0.000000e+00 : f32
      %12 = vector.broadcast %cst_10 : f32 to vector<128x256xf32>
      %c0_11 = arith.constant 0 : index
      %c0_12 = arith.constant 0 : index
      %13 = vector.load %arg6[%c0_11, %c0_12] : memref<128x256xf32, #tpu.memory_space<vmem>>, vector<128x256xf32>
      tpu.vector_store %arg6[%c0_11, %c0_12], %12 {strides = array<i32>} : memref<128x256xf32, #tpu.memory_space<vmem>>, vector<128x256xf32>,
    } else {
    }
    %c0 = arith.constant 0 : index
    %c0_1 = arith.constant 0 : index
    %3 = vector.load %arg6[%c0, %c0_1] : memref<128x256xf32, #tpu.memory_space<vmem>>, vector<128x256xf32>
    %c0_2 = arith.constant 0 : index
    %c0_3 = arith.constant 0 : index
    %4 = vector.load %arg2[%c0_2, %c0_3] : memref<128x72xbf16, #tpu.memory_space<vmem>>, vector<128x72xbf16>
    %c0_4 = arith.constant 0 : index
    %c0_5 = arith.constant 0 : index
    %5 = vector.load %arg3[%c0_4, %c0_5] : memref<72x256xbf16, #tpu.memory_space<vmem>>, vector<72x256xbf16>
    %cst = arith.constant dense<0.000000e+00> : vector<128x256xf32>
    %6 = tpu.matmul %4, %5, %cst {dimension_numbers = #tpu.dot_dimension_numbers<[1], [0], [0], [1], [0, 0, 1, 1], [], []>} : vector<128x72xbf16>, vector<72x256xbf16>, vector<128x256xf32> -> vector<128x256xf32>
    %7 = arith.addf %3, %6 : vector<128x256xf32>
    %c0_6 = arith.constant 0 : index
    %c0_7 = arith.constant 0 : index
    %8 = vector.load %arg6[%c0_6, %c0_7] : memref<128x256xf32, #tpu.memory_space<vmem>>, vector<128x256xf32>
    tpu.vector_store %arg6[%c0_6, %c0_7], %7 {strides = array<i32>} : memref<128x256xf32, #tpu.memory_space<vmem>>, vector<128x256xf32>,
    %c0_i32_8 = arith.constant 0 : i32
    %9 = arith.cmpi eq, %arg1, %c0_i32_8 : i32
    %10 = arith.extui %9 : i1 to i32
    %c0_i32_9 = arith.constant 0 : i32
    %11 = arith.cmpi ne, %10, %c0_i32_9 : i32
    scf.if %11 {
      %c0_10 = arith.constant 0 : index
      %c0_11 = arith.constant 0 : index
      %12 = vector.load %arg6[%c0_10, %c0_11] : memref<128x256xf32, #tpu.memory_space<vmem>>, vector<128x256xf32>
      %c0_12 = arith.constant 0 : index
      %c0_13 = arith.constant 0 : index
      %13 = vector.load %arg4[%c0_12, %c0_13] : memref<1x256xf32, #tpu.memory_space<vmem>>, vector<1x256xf32>
      %14 = vector.broadcast %13 : vector<1x256xf32> to vector<128x256xf32>
      %15 = arith.addf %12, %14 : vector<128x256xf32>
      %cst_14 = arith.constant 0.000000e+00 : f32
      %16 = vector.broadcast %cst_14 : f32 to vector<128x256xf32>
      %17 = arith.maximumf %15, %16 : vector<128x256xf32>
      %18 = arith.truncf %17 : vector<128x256xf32> to vector<128x256xbf16>
      %c0_15 = arith.constant 0 : index
      %c0_16 = arith.constant 0 : index
      %19 = vector.load %arg5[%c0_15, %c0_16] : memref<128x256xbf16, #tpu.memory_space<vmem>>, vector<128x256xbf16>
      tpu.vector_store %arg5[%c0_15, %c0_16], %18 {strides = array<i32>} : memref<128x256xbf16, #tpu.memory_space<vmem>>, vector<128x256xbf16>,
    } else {
    }
    return
  }
  func.func @transform_0(%arg0: i32, %arg1: i32) -> (i32, i32) {
    %c0_i32 = arith.constant 0 : i32
    return %arg0, %arg1 : i32, i32
  }
  func.func @transform_1(%arg0: i32, %arg1: i32) -> (i32, i32) {
    %c0_i32 = arith.constant 0 : i32
    %c0_i32_0 = arith.constant 0 : i32
    return %arg1, %c0_i32 : i32, i32
  }
  func.func @transform_2(%arg0: i32, %arg1: i32) -> (i32, i32) {
    %c0_i32 = arith.constant 0 : i32
    %c0_i32_0 = arith.constant 0 : i32
    %c0_i32_1 = arith.constant 0 : i32
    return %c0_i32, %c0_i32_0 : i32, i32
  }
  func.func @transform_3(%arg0: i32, %arg1: i32) -> (i32, i32) {
    %c0_i32 = arith.constant 0 : i32
    %c0_i32_0 = arith.constant 0 : i32
    return %arg0, %c0_i32 : i32, i32
  }
}

module attributes {stable_mosaic.version = 11 : i64} {
  func.func @_matmul_kernel(%arg0: i32, %arg1: i32, %arg2: memref<128x8xbf16, #tpu.memory_space<vmem>>, %arg3: memref<8x256xbf16, #tpu.memory_space<vmem>>, %arg4: memref<1x256xf32, #tpu.memory_space<vmem>>, %arg5: memref<128x256xbf16, #tpu.memory_space<vmem>>, %arg6: memref<128x256xf32, #tpu.memory_space<vmem>>) attributes {dimension_semantics = [#tpu.dimension_semantics<parallel>, #tpu.dimension_semantics<arbitrary>], iteration_bounds = array<i64: 1, 1>, scalar_prefetch = 0 : i64, scratch_operands = 1 : i64, tpu.core_type = #tpu.core_type<tc>, window_params = [{transform_indices = @transform_0, window_bounds = array<i64: 128, 8>}, {transform_indices = @transform_1, window_bounds = array<i64: 8, 256>}, {pipeline_mode = #tpu.pipeline_mode<synchronous>, transform_indices = @transform_2, window_bounds = array<i64: 1, 256>}, {transform_indices = @transform_3, window_bounds = array<i64: 128, 256>}]} {
    %c0_i32 = arith.constant 0 : i32
    %0 = arith.cmpi eq, %arg1, %c0_i32 : i32
    %1 = arith.extui %0 : i1 to i32
    %c0_i32_0 = arith.constant 0 : i32
    %2 = arith.cmpi ne, %1, %c0_i32_0 : i32
    scf.if %2 {
      %cst_10 = arith.constant 0.000000e+00 : f32
      %12 = vector.broadcast %cst_10 : f32 to vector<128x256xf32>
      %c0_11 = arith.constant 0 : index
      %c0_12 = arith.constant 0 : index
      %13 = vector.load %arg6[%c0_11, %c0_12] : memref<128x256xf32, #tpu.memory_space<vmem>>, vector<128x256xf32>
      tpu.vector_store %arg6[%c0_11, %c0_12], %12 {strides = array<i32>} : memref<128x256xf32, #tpu.memory_space<vmem>>, vector<128x256xf32>,
    } else {
    }
    %c0 = arith.constant 0 : index
    %c0_1 = arith.constant 0 : index
    %3 = vector.load %arg6[%c0, %c0_1] : memref<128x256xf32, #tpu.memory_space<vmem>>, vector<128x256xf32>
    %c0_2 = arith.constant 0 : index
    %c0_3 = arith.constant 0 : index
    %4 = vector.load %arg2[%c0_2, %c0_3] : memref<128x8xbf16, #tpu.memory_space<vmem>>, vector<128x8xbf16>
    %c0_4 = arith.constant 0 : index
    %c0_5 = arith.constant 0 : index
    %5 = vector.load %arg3[%c0_4, %c0_5] : memref<8x256xbf16, #tpu.memory_space<vmem>>, vector<8x256xbf16>
    %cst = arith.constant dense<0.000000e+00> : vector<128x256xf32>
    %6 = tpu.matmul %4, %5, %cst {dimension_numbers = #tpu.dot_dimension_numbers<[1], [0], [0], [1], [0, 0, 1, 1], [], []>} : vector<128x8xbf16>, vector<8x256xbf16>, vector<128x256xf32> -> vector<128x256xf32>
    %7 = arith.addf %3, %6 : vector<128x256xf32>
    %c0_6 = arith.constant 0 : index
    %c0_7 = arith.constant 0 : index
    %8 = vector.load %arg6[%c0_6, %c0_7] : memref<128x256xf32, #tpu.memory_space<vmem>>, vector<128x256xf32>
    tpu.vector_store %arg6[%c0_6, %c0_7], %7 {strides = array<i32>} : memref<128x256xf32, #tpu.memory_space<vmem>>, vector<128x256xf32>,
    %c0_i32_8 = arith.constant 0 : i32
    %9 = arith.cmpi eq, %arg1, %c0_i32_8 : i32
    %10 = arith.extui %9 : i1 to i32
    %c0_i32_9 = arith.constant 0 : i32
    %11 = arith.cmpi ne, %10, %c0_i32_9 : i32
    scf.if %11 {
      %c0_10 = arith.constant 0 : index
      %c0_11 = arith.constant 0 : index
      %12 = vector.load %arg6[%c0_10, %c0_11] : memref<128x256xf32, #tpu.memory_space<vmem>>, vector<128x256xf32>
      %c0_12 = arith.constant 0 : index
      %c0_13 = arith.constant 0 : index
      %13 = vector.load %arg4[%c0_12, %c0_13] : memref<1x256xf32, #tpu.memory_space<vmem>>, vector<1x256xf32>
      %14 = vector.broadcast %13 : vector<1x256xf32> to vector<128x256xf32>
      %15 = arith.addf %12, %14 : vector<128x256xf32>
      %cst_14 = arith.constant 0.000000e+00 : f32
      %16 = vector.broadcast %cst_14 : f32 to vector<128x256xf32>
      %17 = arith.maximumf %15, %16 : vector<128x256xf32>
      %18 = arith.truncf %17 : vector<128x256xf32> to vector<128x256xbf16>
      %c0_15 = arith.constant 0 : index
      %c0_16 = arith.constant 0 : index
      %19 = vector.load %arg5[%c0_15, %c0_16] : memref<128x256xbf16, #tpu.memory_space<vmem>>, vector<128x256xbf16>
      tpu.vector_store %arg5[%c0_15, %c0_16], %18 {strides = array<i32>} : memref<128x256xbf16, #tpu.memory_space<vmem>>, vector<128x256xbf16>,
    } else {
    }
    return
  }
  func.func @transform_0(%arg0: i32, %arg1: i32) -> (i32, i32) {
    %c0_i32 = arith.constant 0 : i32
    return %arg0, %arg1 : i32, i32
  }
  func.func @transform_1(%arg0: i32, %arg1: i32) -> (i32, i32) {
    %c0_i32 = arith.constant 0 : i32
    %c0_i32_0 = arith.constant 0 : i32
    return %arg1, %c0_i32 : i32, i32
  }
  func.func @transform_2(%arg0: i32, %arg1: i32) -> (i32, i32) {
    %c0_i32 = arith.constant 0 : i32
    %c0_i32_0 = arith.constant 0 : i32
    %c0_i32_1 = arith.constant 0 : i32
    return %c0_i32, %c0_i32_0 : i32, i32
  }
  func.func @transform_3(%arg0: i32, %arg1: i32) -> (i32, i32) {
    %c0_i32 = arith.constant 0 : i32
    %c0_i32_0 = arith.constant 0 : i32
    return %arg0, %c0_i32 : i32, i32
  }
}

module attributes {stable_mosaic.version = 11 : i64} {
  func.func @_gap_bias_kernel(%arg0: i32, %arg1: memref<1x64x8xbf16, #tpu.memory_space<vmem>>, %arg2: memref<8x256xbf16, #tpu.memory_space<vmem>>, %arg3: memref<1x256xf32, #tpu.memory_space<vmem>>, %arg4: memref<256x256xbf16, #tpu.memory_space<vmem>>, %arg5: memref<1x256xf32, #tpu.memory_space<vmem>>, %arg6: memref<1x1x256xf32, #tpu.memory_space<vmem>>) attributes {dimension_semantics = [#tpu.dimension_semantics<parallel>], iteration_bounds = array<i64: 2>, scalar_prefetch = 0 : i64, scratch_operands = 0 : i64, tpu.core_type = #tpu.core_type<tc>, window_params = [{transform_indices = @transform_0, window_bounds = array<i64: 1, 64, 8>}, {pipeline_mode = #tpu.pipeline_mode<synchronous>, transform_indices = @transform_1, window_bounds = array<i64: 8, 256>}, {pipeline_mode = #tpu.pipeline_mode<synchronous>, transform_indices = @transform_2, window_bounds = array<i64: 1, 256>}, {pipeline_mode = #tpu.pipeline_mode<synchronous>, transform_indices = @transform_3, window_bounds = array<i64: 256, 256>}, {pipeline_mode = #tpu.pipeline_mode<synchronous>, transform_indices = @transform_4, window_bounds = array<i64: 1, 256>}, {transform_indices = @transform_5, window_bounds = array<i64: 1, 1, 256>}]} {
    %c0 = arith.constant 0 : index
    %c0_0 = arith.constant 0 : index
    %c0_1 = arith.constant 0 : index
    %0 = vector.load %arg1[%c0, %c0_0, %c0_1] : memref<1x64x8xbf16, #tpu.memory_space<vmem>>, vector<1x64x8xbf16>
    %1 = vector.shape_cast %0 : vector<1x64x8xbf16> to vector<64x8xbf16>
    %2 = arith.extf %1 : vector<64x8xbf16> to vector<64x8xf32>
    %cst = arith.constant dense<0.000000e+00> : vector<8xf32>
    %3 = vector.multi_reduction <add>, %2, %cst [0] : vector<64x8xf32> to vector<8xf32>
    %4 = vector.shape_cast %3 : vector<8xf32> to vector<1x8xf32>
    %cst_2 = arith.constant 6.400000e+01 : f32
    %5 = vector.broadcast %cst_2 : f32 to vector<1x8xf32>
    %6 = arith.divf %4, %5 : vector<1x8xf32>
    %7 = arith.truncf %6 : vector<1x8xf32> to vector<1x8xbf16>
    %c0_3 = arith.constant 0 : index
    %c0_4 = arith.constant 0 : index
    %8 = vector.load %arg2[%c0_3, %c0_4] : memref<8x256xbf16, #tpu.memory_space<vmem>>, vector<8x256xbf16>
    %cst_5 = arith.constant dense<0.000000e+00> : vector<1x256xf32>
    %9 = tpu.matmul %7, %8, %cst_5 {dimension_numbers = #tpu.dot_dimension_numbers<[1], [0], [0], [1], [0, 0, 1, 1], [], []>} : vector<1x8xbf16>, vector<8x256xbf16>, vector<1x256xf32> -> vector<1x256xf32>
    %c0_6 = arith.constant 0 : index
    %c0_7 = arith.constant 0 : index
    %10 = vector.load %arg3[%c0_6, %c0_7] : memref<1x256xf32, #tpu.memory_space<vmem>>, vector<1x256xf32>
    %11 = arith.addf %9, %10 : vector<1x256xf32>
    %cst_8 = arith.constant 0.000000e+00 : f32
    %12 = vector.broadcast %cst_8 : f32 to vector<1x256xf32>
    %13 = arith.maximumf %11, %12 : vector<1x256xf32>
    %14 = arith.truncf %13 : vector<1x256xf32> to vector<1x256xbf16>
    %c0_9 = arith.constant 0 : index
    %c0_10 = arith.constant 0 : index
    %15 = vector.load %arg4[%c0_9, %c0_10] : memref<256x256xbf16, #tpu.memory_space<vmem>>, vector<256x256xbf16>
    %cst_11 = arith.constant dense<0.000000e+00> : vector<1x256xf32>
    %16 = tpu.matmul %14, %15, %cst_11 {dimension_numbers = #tpu.dot_dimension_numbers<[1], [0], [0], [1], [0, 0, 1, 1], [], []>} : vector<1x256xbf16>, vector<256x256xbf16>, vector<1x256xf32> -> vector<1x256xf32>
    %c0_12 = arith.constant 0 : index
    %c0_13 = arith.constant 0 : index
    %17 = vector.load %arg5[%c0_12, %c0_13] : memref<1x256xf32, #tpu.memory_space<vmem>>, vector<1x256xf32>
    %18 = arith.addf %16, %17 : vector<1x256xf32>
    %c0_14 = arith.constant 0 : index
    %c0_15 = arith.constant 0 : index
    %c0_16 = arith.constant 0 : index
    %19 = vector.load %arg6[%c0_14, %c0_15, %c0_16] : memref<1x1x256xf32, #tpu.memory_space<vmem>>, vector<1x1x256xf32>
    %20 = vector.shape_cast %19 : vector<1x1x256xf32> to vector<1x256xf32>
    %21 = vector.shape_cast %18 : vector<1x256xf32> to vector<1x1x256xf32>
    tpu.vector_store %arg6[%c0_14, %c0_15, %c0_16], %21 {strides = array<i32>} : memref<1x1x256xf32, #tpu.memory_space<vmem>>, vector<1x1x256xf32>,
    return
  }
  func.func @transform_0(%arg0: i32) -> (i32, i32, i32) {
    %c0_i32 = arith.constant 0 : i32
    %c0_i32_0 = arith.constant 0 : i32
    %c0_i32_1 = arith.constant 0 : i32
    return %arg0, %c0_i32, %c0_i32_0 : i32, i32, i32
  }
  func.func @transform_1(%arg0: i32) -> (i32, i32) {
    %c0_i32 = arith.constant 0 : i32
    %c0_i32_0 = arith.constant 0 : i32
    %c0_i32_1 = arith.constant 0 : i32
    return %c0_i32, %c0_i32_0 : i32, i32
  }
  func.func @transform_2(%arg0: i32) -> (i32, i32) {
    %c0_i32 = arith.constant 0 : i32
    %c0_i32_0 = arith.constant 0 : i32
    %c0_i32_1 = arith.constant 0 : i32
    return %c0_i32, %c0_i32_0 : i32, i32
  }
  func.func @transform_3(%arg0: i32) -> (i32, i32) {
    %c0_i32 = arith.constant 0 : i32
    %c0_i32_0 = arith.constant 0 : i32
    %c0_i32_1 = arith.constant 0 : i32
    return %c0_i32, %c0_i32_0 : i32, i32
  }
  func.func @transform_4(%arg0: i32) -> (i32, i32) {
    %c0_i32 = arith.constant 0 : i32
    %c0_i32_0 = arith.constant 0 : i32
    %c0_i32_1 = arith.constant 0 : i32
    return %c0_i32, %c0_i32_0 : i32, i32
  }
  func.func @transform_5(%arg0: i32) -> (i32, i32, i32) {
    %c0_i32 = arith.constant 0 : i32
    %c0_i32_0 = arith.constant 0 : i32
    %c0_i32_1 = arith.constant 0 : i32
    return %arg0, %c0_i32, %c0_i32_0 : i32, i32, i32
  }
}

module attributes {stable_mosaic.version = 11 : i64} {
  func.func @_aspp_project_kernel(%arg0: i32, %arg1: i32, %arg2: memref<1x64x256xbf16, #tpu.memory_space<vmem>>, %arg3: memref<1x64x256xbf16, #tpu.memory_space<vmem>>, %arg4: memref<1x64x256xbf16, #tpu.memory_space<vmem>>, %arg5: memref<1x64x256xbf16, #tpu.memory_space<vmem>>, %arg6: memref<4x256x256xbf16, #tpu.memory_space<vmem>>, %arg7: memref<1x1x256xf32, #tpu.memory_space<vmem>>, %arg8: memref<1x64x256xbf16, #tpu.memory_space<vmem>>) attributes {dimension_semantics = [#tpu.dimension_semantics<parallel>, #tpu.dimension_semantics<parallel>], iteration_bounds = array<i64: 2, 1>, scalar_prefetch = 0 : i64, scratch_operands = 0 : i64, tpu.core_type = #tpu.core_type<tc>, window_params = [{transform_indices = @transform_0, window_bounds = array<i64: 1, 64, 256>}, {transform_indices = @transform_1, window_bounds = array<i64: 1, 64, 256>}, {transform_indices = @transform_2, window_bounds = array<i64: 1, 64, 256>}, {transform_indices = @transform_3, window_bounds = array<i64: 1, 64, 256>}, {pipeline_mode = #tpu.pipeline_mode<synchronous>, transform_indices = @transform_4, window_bounds = array<i64: 4, 256, 256>}, {transform_indices = @transform_5, window_bounds = array<i64: 1, 1, 256>}, {transform_indices = @transform_6, window_bounds = array<i64: 1, 64, 256>}]} {
    %c0 = arith.constant 0 : index
    %c0_0 = arith.constant 0 : index
    %c0_1 = arith.constant 0 : index
    %0 = vector.load %arg2[%c0, %c0_0, %c0_1] : memref<1x64x256xbf16, #tpu.memory_space<vmem>>, vector<1x64x256xbf16>
    %1 = vector.shape_cast %0 : vector<1x64x256xbf16> to vector<64x256xbf16>
    %c0_2 = arith.constant 0 : index
    %c0_3 = arith.constant 0 : index
    %c0_4 = arith.constant 0 : index
    %2 = vector.load %arg6[%c0_2, %c0_3, %c0_4] : memref<4x256x256xbf16, #tpu.memory_space<vmem>>, vector<1x256x256xbf16>
    %3 = vector.shape_cast %2 : vector<1x256x256xbf16> to vector<256x256xbf16>
    %cst = arith.constant dense<0.000000e+00> : vector<64x256xf32>
    %4 = tpu.matmul %1, %3, %cst {dimension_numbers = #tpu.dot_dimension_numbers<[1], [0], [0], [1], [0, 0, 1, 1], [], []>} : vector<64x256xbf16>, vector<256x256xbf16>, vector<64x256xf32> -> vector<64x256xf32>
    %c0_5 = arith.constant 0 : index
    %c0_6 = arith.constant 0 : index
    %c0_7 = arith.constant 0 : index
    %5 = vector.load %arg3[%c0_5, %c0_6, %c0_7] : memref<1x64x256xbf16, #tpu.memory_space<vmem>>, vector<1x64x256xbf16>
    %6 = vector.shape_cast %5 : vector<1x64x256xbf16> to vector<64x256xbf16>
    %c1 = arith.constant 1 : index
    %c0_8 = arith.constant 0 : index
    %c0_9 = arith.constant 0 : index
    %7 = vector.load %arg6[%c1, %c0_8, %c0_9] : memref<4x256x256xbf16, #tpu.memory_space<vmem>>, vector<1x256x256xbf16>
    %8 = vector.shape_cast %7 : vector<1x256x256xbf16> to vector<256x256xbf16>
    %cst_10 = arith.constant dense<0.000000e+00> : vector<64x256xf32>
    %9 = tpu.matmul %6, %8, %cst_10 {dimension_numbers = #tpu.dot_dimension_numbers<[1], [0], [0], [1], [0, 0, 1, 1], [], []>} : vector<64x256xbf16>, vector<256x256xbf16>, vector<64x256xf32> -> vector<64x256xf32>
    %10 = arith.addf %4, %9 : vector<64x256xf32>
    %c0_11 = arith.constant 0 : index
    %c0_12 = arith.constant 0 : index
    %c0_13 = arith.constant 0 : index
    %11 = vector.load %arg4[%c0_11, %c0_12, %c0_13] : memref<1x64x256xbf16, #tpu.memory_space<vmem>>, vector<1x64x256xbf16>
    %12 = vector.shape_cast %11 : vector<1x64x256xbf16> to vector<64x256xbf16>
    %c2 = arith.constant 2 : index
    %c0_14 = arith.constant 0 : index
    %c0_15 = arith.constant 0 : index
    %13 = vector.load %arg6[%c2, %c0_14, %c0_15] : memref<4x256x256xbf16, #tpu.memory_space<vmem>>, vector<1x256x256xbf16>
    %14 = vector.shape_cast %13 : vector<1x256x256xbf16> to vector<256x256xbf16>
    %cst_16 = arith.constant dense<0.000000e+00> : vector<64x256xf32>
    %15 = tpu.matmul %12, %14, %cst_16 {dimension_numbers = #tpu.dot_dimension_numbers<[1], [0], [0], [1], [0, 0, 1, 1], [], []>} : vector<64x256xbf16>, vector<256x256xbf16>, vector<64x256xf32> -> vector<64x256xf32>
    %16 = arith.addf %10, %15 : vector<64x256xf32>
    %c0_17 = arith.constant 0 : index
    %c0_18 = arith.constant 0 : index
    %c0_19 = arith.constant 0 : index
    %17 = vector.load %arg5[%c0_17, %c0_18, %c0_19] : memref<1x64x256xbf16, #tpu.memory_space<vmem>>, vector<1x64x256xbf16>
    %18 = vector.shape_cast %17 : vector<1x64x256xbf16> to vector<64x256xbf16>
    %c3 = arith.constant 3 : index
    %c0_20 = arith.constant 0 : index
    %c0_21 = arith.constant 0 : index
    %19 = vector.load %arg6[%c3, %c0_20, %c0_21] : memref<4x256x256xbf16, #tpu.memory_space<vmem>>, vector<1x256x256xbf16>
    %20 = vector.shape_cast %19 : vector<1x256x256xbf16> to vector<256x256xbf16>
    %cst_22 = arith.constant dense<0.000000e+00> : vector<64x256xf32>
    %21 = tpu.matmul %18, %20, %cst_22 {dimension_numbers = #tpu.dot_dimension_numbers<[1], [0], [0], [1], [0, 0, 1, 1], [], []>} : vector<64x256xbf16>, vector<256x256xbf16>, vector<64x256xf32> -> vector<64x256xf32>
    %22 = arith.addf %16, %21 : vector<64x256xf32>
    %c0_23 = arith.constant 0 : index
    %c0_24 = arith.constant 0 : index
    %c0_25 = arith.constant 0 : index
    %23 = vector.load %arg7[%c0_23, %c0_24, %c0_25] : memref<1x1x256xf32, #tpu.memory_space<vmem>>, vector<1x1x256xf32>
    %24 = vector.shape_cast %23 : vector<1x1x256xf32> to vector<1x256xf32>
    %25 = vector.broadcast %24 : vector<1x256xf32> to vector<64x256xf32>
    %26 = arith.addf %22, %25 : vector<64x256xf32>
    %cst_26 = arith.constant 0.000000e+00 : f32
    %27 = vector.broadcast %cst_26 : f32 to vector<64x256xf32>
    %28 = arith.maximumf %26, %27 : vector<64x256xf32>
    %29 = arith.truncf %28 : vector<64x256xf32> to vector<64x256xbf16>
    %c0_27 = arith.constant 0 : index
    %c0_28 = arith.constant 0 : index
    %c0_29 = arith.constant 0 : index
    %30 = vector.load %arg8[%c0_27, %c0_28, %c0_29] : memref<1x64x256xbf16, #tpu.memory_space<vmem>>, vector<1x64x256xbf16>
    %31 = vector.shape_cast %30 : vector<1x64x256xbf16> to vector<64x256xbf16>
    %32 = vector.shape_cast %29 : vector<64x256xbf16> to vector<1x64x256xbf16>
    tpu.vector_store %arg8[%c0_27, %c0_28, %c0_29], %32 {strides = array<i32>} : memref<1x64x256xbf16, #tpu.memory_space<vmem>>, vector<1x64x256xbf16>,
    return
  }
  func.func @transform_0(%arg0: i32, %arg1: i32) -> (i32, i32, i32) {
    %c0_i32 = arith.constant 0 : i32
    %c0_i32_0 = arith.constant 0 : i32
    return %arg0, %arg1, %c0_i32 : i32, i32, i32
  }
  func.func @transform_1(%arg0: i32, %arg1: i32) -> (i32, i32, i32) {
    %c0_i32 = arith.constant 0 : i32
    %c0_i32_0 = arith.constant 0 : i32
    return %arg0, %arg1, %c0_i32 : i32, i32, i32
  }
  func.func @transform_2(%arg0: i32, %arg1: i32) -> (i32, i32, i32) {
    %c0_i32 = arith.constant 0 : i32
    %c0_i32_0 = arith.constant 0 : i32
    return %arg0, %arg1, %c0_i32 : i32, i32, i32
  }
  func.func @transform_3(%arg0: i32, %arg1: i32) -> (i32, i32, i32) {
    %c0_i32 = arith.constant 0 : i32
    %c0_i32_0 = arith.constant 0 : i32
    return %arg0, %arg1, %c0_i32 : i32, i32, i32
  }
  func.func @transform_4(%arg0: i32, %arg1: i32) -> (i32, i32, i32) {
    %c0_i32 = arith.constant 0 : i32
    %c0_i32_0 = arith.constant 0 : i32
    %c0_i32_1 = arith.constant 0 : i32
    %c0_i32_2 = arith.constant 0 : i32
    return %c0_i32, %c0_i32_0, %c0_i32_1 : i32, i32, i32
  }
  func.func @transform_5(%arg0: i32, %arg1: i32) -> (i32, i32, i32) {
    %c0_i32 = arith.constant 0 : i32
    %c0_i32_0 = arith.constant 0 : i32
    %c0_i32_1 = arith.constant 0 : i32
    return %arg0, %c0_i32, %c0_i32_0 : i32, i32, i32
  }
  func.func @transform_6(%arg0: i32, %arg1: i32) -> (i32, i32, i32) {
    %c0_i32 = arith.constant 0 : i32
    %c0_i32_0 = arith.constant 0 : i32
    return %arg0, %arg1, %c0_i32 : i32, i32, i32
  }
}

module attributes {stable_mosaic.version = 11 : i64} {
  func.func @_upsample_kernel(%arg0: i32, %arg1: i32, %arg2: memref<16xi32, #tpu.memory_space<smem>>, %arg3: memref<16xi32, #tpu.memory_space<smem>>, %arg4: memref<1x1x8x256xbf16, #tpu.memory_space<vmem>>, %arg5: memref<1x1x8x256xbf16, #tpu.memory_space<vmem>>, %arg6: memref<1x16x8xf32, #tpu.memory_space<vmem>>, %arg7: memref<1x16x8xf32, #tpu.memory_space<vmem>>, %arg8: memref<1x1x16x256xbf16, #tpu.memory_space<vmem>>) attributes {dimension_semantics = [#tpu.dimension_semantics<parallel>, #tpu.dimension_semantics<arbitrary>], iteration_bounds = array<i64: 2, 16>, scalar_prefetch = 2 : i64, scratch_operands = 0 : i64, tpu.core_type = #tpu.core_type<tc>, window_params = [{transform_indices = @transform_0, window_bounds = array<i64: 1, 1, 8, 256>}, {transform_indices = @transform_1, window_bounds = array<i64: 1, 1, 8, 256>}, {transform_indices = @transform_2, window_bounds = array<i64: 1, 16, 8>}, {transform_indices = @transform_3, window_bounds = array<i64: 1, 16, 8>}, {transform_indices = @transform_4, window_bounds = array<i64: 1, 1, 16, 256>}]} {
    %c0 = arith.constant 0 : index
    %c0_0 = arith.constant 0 : index
    %c0_1 = arith.constant 0 : index
    %c0_2 = arith.constant 0 : index
    %0 = vector.load %arg4[%c0, %c0_0, %c0_1, %c0_2] : memref<1x1x8x256xbf16, #tpu.memory_space<vmem>>, vector<1x1x8x256xbf16>
    %1 = vector.shape_cast %0 : vector<1x1x8x256xbf16> to vector<8x256xbf16>
    %2 = arith.extf %1 : vector<8x256xbf16> to vector<8x256xf32>
    %c0_3 = arith.constant 0 : index
    %c0_4 = arith.constant 0 : index
    %c0_5 = arith.constant 0 : index
    %c0_6 = arith.constant 0 : index
    %3 = vector.load %arg5[%c0_3, %c0_4, %c0_5, %c0_6] : memref<1x1x8x256xbf16, #tpu.memory_space<vmem>>, vector<1x1x8x256xbf16>
    %4 = vector.shape_cast %3 : vector<1x1x8x256xbf16> to vector<8x256xbf16>
    %5 = arith.extf %4 : vector<8x256xbf16> to vector<8x256xf32>
    %c0_7 = arith.constant 0 : index
    %c0_8 = arith.constant 0 : index
    %c0_9 = arith.constant 0 : index
    %6 = vector.load %arg6[%c0_7, %c0_8, %c0_9] : memref<1x16x8xf32, #tpu.memory_space<vmem>>, vector<1x16x8xf32>
    %7 = vector.shape_cast %6 : vector<1x16x8xf32> to vector<16x8xf32>
    %cst = arith.constant dense<0.000000e+00> : vector<16x256xf32>
    %8 = tpu.matmul %7, %2, %cst {dimension_numbers = #tpu.dot_dimension_numbers<[1], [0], [0], [1], [0, 0, 1, 1], [], []>} : vector<16x8xf32>, vector<8x256xf32>, vector<16x256xf32> -> vector<16x256xf32>
    %c0_10 = arith.constant 0 : index
    %c0_11 = arith.constant 0 : index
    %c0_12 = arith.constant 0 : index
    %9 = vector.load %arg7[%c0_10, %c0_11, %c0_12] : memref<1x16x8xf32, #tpu.memory_space<vmem>>, vector<1x16x8xf32>
    %10 = vector.shape_cast %9 : vector<1x16x8xf32> to vector<16x8xf32>
    %cst_13 = arith.constant dense<0.000000e+00> : vector<16x256xf32>
    %11 = tpu.matmul %10, %5, %cst_13 {dimension_numbers = #tpu.dot_dimension_numbers<[1], [0], [0], [1], [0, 0, 1, 1], [], []>} : vector<16x8xf32>, vector<8x256xf32>, vector<16x256xf32> -> vector<16x256xf32>
    %12 = arith.addf %8, %11 : vector<16x256xf32>
    %13 = arith.truncf %12 : vector<16x256xf32> to vector<16x256xbf16>
    %c0_14 = arith.constant 0 : index
    %c0_15 = arith.constant 0 : index
    %c0_16 = arith.constant 0 : index
    %c0_17 = arith.constant 0 : index
    %14 = vector.load %arg8[%c0_14, %c0_15, %c0_16, %c0_17] : memref<1x1x16x256xbf16, #tpu.memory_space<vmem>>, vector<1x1x16x256xbf16>
    %15 = vector.shape_cast %14 : vector<1x1x16x256xbf16> to vector<16x256xbf16>
    %16 = vector.shape_cast %13 : vector<16x256xbf16> to vector<1x1x16x256xbf16>
    tpu.vector_store %arg8[%c0_14, %c0_15, %c0_16, %c0_17], %16 {strides = array<i32>} : memref<1x1x16x256xbf16, #tpu.memory_space<vmem>>, vector<1x1x16x256xbf16>,
    return
  }
  func.func @transform_0(%arg0: i32, %arg1: i32, %arg2: memref<16xi32, #tpu.memory_space<smem>>, %arg3: memref<16xi32, #tpu.memory_space<smem>>) -> (i32, i32, i32, i32) {
    %0 = arith.index_cast %arg1 : i32 to index
    %1 = memref.load %arg2[%0] : memref<16xi32, #tpu.memory_space<smem>>
    %c0_i32 = arith.constant 0 : i32
    %c0_i32_0 = arith.constant 0 : i32
    %c0_i32_1 = arith.constant 0 : i32
    return %arg0, %1, %c0_i32, %c0_i32_0 : i32, i32, i32, i32
  }
  func.func @transform_1(%arg0: i32, %arg1: i32, %arg2: memref<16xi32, #tpu.memory_space<smem>>, %arg3: memref<16xi32, #tpu.memory_space<smem>>) -> (i32, i32, i32, i32) {
    %0 = arith.index_cast %arg1 : i32 to index
    %1 = memref.load %arg3[%0] : memref<16xi32, #tpu.memory_space<smem>>
    %c0_i32 = arith.constant 0 : i32
    %c0_i32_0 = arith.constant 0 : i32
    %c0_i32_1 = arith.constant 0 : i32
    return %arg0, %1, %c0_i32, %c0_i32_0 : i32, i32, i32, i32
  }
  func.func @transform_2(%arg0: i32, %arg1: i32, %arg2: memref<16xi32, #tpu.memory_space<smem>>, %arg3: memref<16xi32, #tpu.memory_space<smem>>) -> (i32, i32, i32) {
    %c0_i32 = arith.constant 0 : i32
    %c0_i32_0 = arith.constant 0 : i32
    %c0_i32_1 = arith.constant 0 : i32
    return %arg1, %c0_i32, %c0_i32_0 : i32, i32, i32
  }
  func.func @transform_3(%arg0: i32, %arg1: i32, %arg2: memref<16xi32, #tpu.memory_space<smem>>, %arg3: memref<16xi32, #tpu.memory_space<smem>>) -> (i32, i32, i32) {
    %c0_i32 = arith.constant 0 : i32
    %c0_i32_0 = arith.constant 0 : i32
    %c0_i32_1 = arith.constant 0 : i32
    return %arg1, %c0_i32, %c0_i32_0 : i32, i32, i32
  }
  func.func @transform_4(%arg0: i32, %arg1: i32, %arg2: memref<16xi32, #tpu.memory_space<smem>>, %arg3: memref<16xi32, #tpu.memory_space<smem>>) -> (i32, i32, i32, i32) {
    %c0_i32 = arith.constant 0 : i32
    %c0_i32_0 = arith.constant 0 : i32
    %c0_i32_1 = arith.constant 0 : i32
    return %arg0, %arg1, %c0_i32, %c0_i32_0 : i32, i32, i32, i32
  }
}

module attributes {stable_mosaic.version = 11 : i64} {
  func.func @_matmul_kernel(%arg0: i32, %arg1: i32, %arg2: memref<512x4xbf16, #tpu.memory_space<vmem>>, %arg3: memref<4x128xbf16, #tpu.memory_space<vmem>>, %arg4: memref<1x128xf32, #tpu.memory_space<vmem>>, %arg5: memref<512x128xbf16, #tpu.memory_space<vmem>>, %arg6: memref<512x128xf32, #tpu.memory_space<vmem>>) attributes {dimension_semantics = [#tpu.dimension_semantics<parallel>, #tpu.dimension_semantics<arbitrary>], iteration_bounds = array<i64: 1, 1>, scalar_prefetch = 0 : i64, scratch_operands = 1 : i64, tpu.core_type = #tpu.core_type<tc>, window_params = [{transform_indices = @transform_0, window_bounds = array<i64: 512, 4>}, {transform_indices = @transform_1, window_bounds = array<i64: 4, 128>}, {pipeline_mode = #tpu.pipeline_mode<synchronous>, transform_indices = @transform_2, window_bounds = array<i64: 1, 128>}, {transform_indices = @transform_3, window_bounds = array<i64: 512, 128>}]} {
    %c0_i32 = arith.constant 0 : i32
    %0 = arith.cmpi eq, %arg1, %c0_i32 : i32
    %1 = arith.extui %0 : i1 to i32
    %c0_i32_0 = arith.constant 0 : i32
    %2 = arith.cmpi ne, %1, %c0_i32_0 : i32
    scf.if %2 {
      %cst_10 = arith.constant 0.000000e+00 : f32
      %12 = vector.broadcast %cst_10 : f32 to vector<512x128xf32>
      %c0_11 = arith.constant 0 : index
      %c0_12 = arith.constant 0 : index
      %13 = vector.load %arg6[%c0_11, %c0_12] : memref<512x128xf32, #tpu.memory_space<vmem>>, vector<512x128xf32>
      tpu.vector_store %arg6[%c0_11, %c0_12], %12 {strides = array<i32>} : memref<512x128xf32, #tpu.memory_space<vmem>>, vector<512x128xf32>,
    } else {
    }
    %c0 = arith.constant 0 : index
    %c0_1 = arith.constant 0 : index
    %3 = vector.load %arg6[%c0, %c0_1] : memref<512x128xf32, #tpu.memory_space<vmem>>, vector<512x128xf32>
    %c0_2 = arith.constant 0 : index
    %c0_3 = arith.constant 0 : index
    %4 = vector.load %arg2[%c0_2, %c0_3] : memref<512x4xbf16, #tpu.memory_space<vmem>>, vector<512x4xbf16>
    %c0_4 = arith.constant 0 : index
    %c0_5 = arith.constant 0 : index
    %5 = vector.load %arg3[%c0_4, %c0_5] : memref<4x128xbf16, #tpu.memory_space<vmem>>, vector<4x128xbf16>
    %cst = arith.constant dense<0.000000e+00> : vector<512x128xf32>
    %6 = tpu.matmul %4, %5, %cst {dimension_numbers = #tpu.dot_dimension_numbers<[1], [0], [0], [1], [0, 0, 1, 1], [], []>} : vector<512x4xbf16>, vector<4x128xbf16>, vector<512x128xf32> -> vector<512x128xf32>
    %7 = arith.addf %3, %6 : vector<512x128xf32>
    %c0_6 = arith.constant 0 : index
    %c0_7 = arith.constant 0 : index
    %8 = vector.load %arg6[%c0_6, %c0_7] : memref<512x128xf32, #tpu.memory_space<vmem>>, vector<512x128xf32>
    tpu.vector_store %arg6[%c0_6, %c0_7], %7 {strides = array<i32>} : memref<512x128xf32, #tpu.memory_space<vmem>>, vector<512x128xf32>,
    %c0_i32_8 = arith.constant 0 : i32
    %9 = arith.cmpi eq, %arg1, %c0_i32_8 : i32
    %10 = arith.extui %9 : i1 to i32
    %c0_i32_9 = arith.constant 0 : i32
    %11 = arith.cmpi ne, %10, %c0_i32_9 : i32
    scf.if %11 {
      %c0_10 = arith.constant 0 : index
      %c0_11 = arith.constant 0 : index
      %12 = vector.load %arg6[%c0_10, %c0_11] : memref<512x128xf32, #tpu.memory_space<vmem>>, vector<512x128xf32>
      %c0_12 = arith.constant 0 : index
      %c0_13 = arith.constant 0 : index
      %13 = vector.load %arg4[%c0_12, %c0_13] : memref<1x128xf32, #tpu.memory_space<vmem>>, vector<1x128xf32>
      %14 = vector.broadcast %13 : vector<1x128xf32> to vector<512x128xf32>
      %15 = arith.addf %12, %14 : vector<512x128xf32>
      %cst_14 = arith.constant 0.000000e+00 : f32
      %16 = vector.broadcast %cst_14 : f32 to vector<512x128xf32>
      %17 = arith.maximumf %15, %16 : vector<512x128xf32>
      %18 = arith.truncf %17 : vector<512x128xf32> to vector<512x128xbf16>
      %c0_15 = arith.constant 0 : index
      %c0_16 = arith.constant 0 : index
      %19 = vector.load %arg5[%c0_15, %c0_16] : memref<512x128xbf16, #tpu.memory_space<vmem>>, vector<512x128xbf16>
      tpu.vector_store %arg5[%c0_15, %c0_16], %18 {strides = array<i32>} : memref<512x128xbf16, #tpu.memory_space<vmem>>, vector<512x128xbf16>,
    } else {
    }
    return
  }
  func.func @transform_0(%arg0: i32, %arg1: i32) -> (i32, i32) {
    %c0_i32 = arith.constant 0 : i32
    return %arg0, %arg1 : i32, i32
  }
  func.func @transform_1(%arg0: i32, %arg1: i32) -> (i32, i32) {
    %c0_i32 = arith.constant 0 : i32
    %c0_i32_0 = arith.constant 0 : i32
    return %arg1, %c0_i32 : i32, i32
  }
  func.func @transform_2(%arg0: i32, %arg1: i32) -> (i32, i32) {
    %c0_i32 = arith.constant 0 : i32
    %c0_i32_0 = arith.constant 0 : i32
    %c0_i32_1 = arith.constant 0 : i32
    return %c0_i32, %c0_i32_0 : i32, i32
  }
  func.func @transform_3(%arg0: i32, %arg1: i32) -> (i32, i32) {
    %c0_i32 = arith.constant 0 : i32
    %c0_i32_0 = arith.constant 0 : i32
    return %arg0, %c0_i32 : i32, i32
  }
}

module attributes {stable_mosaic.version = 11 : i64} {
  func.func @_matmul_kernel(%arg0: i32, %arg1: i32, %arg2: memref<72x2736xbf16, #tpu.memory_space<vmem>>, %arg3: memref<2736x256xbf16, #tpu.memory_space<vmem>>, %arg4: memref<1x256xf32, #tpu.memory_space<vmem>>, %arg5: memref<72x256xbf16, #tpu.memory_space<vmem>>, %arg6: memref<72x256xf32, #tpu.memory_space<vmem>>) attributes {dimension_semantics = [#tpu.dimension_semantics<parallel>, #tpu.dimension_semantics<arbitrary>], iteration_bounds = array<i64: 1, 1>, scalar_prefetch = 0 : i64, scratch_operands = 1 : i64, tpu.core_type = #tpu.core_type<tc>, window_params = [{transform_indices = @transform_0, window_bounds = array<i64: 72, 2736>}, {transform_indices = @transform_1, window_bounds = array<i64: 2736, 256>}, {pipeline_mode = #tpu.pipeline_mode<synchronous>, transform_indices = @transform_2, window_bounds = array<i64: 1, 256>}, {transform_indices = @transform_3, window_bounds = array<i64: 72, 256>}]} {
    %c0_i32 = arith.constant 0 : i32
    %0 = arith.cmpi eq, %arg1, %c0_i32 : i32
    %1 = arith.extui %0 : i1 to i32
    %c0_i32_0 = arith.constant 0 : i32
    %2 = arith.cmpi ne, %1, %c0_i32_0 : i32
    scf.if %2 {
      %cst_10 = arith.constant 0.000000e+00 : f32
      %12 = vector.broadcast %cst_10 : f32 to vector<72x256xf32>
      %c0_11 = arith.constant 0 : index
      %c0_12 = arith.constant 0 : index
      %13 = vector.load %arg6[%c0_11, %c0_12] : memref<72x256xf32, #tpu.memory_space<vmem>>, vector<72x256xf32>
      tpu.vector_store %arg6[%c0_11, %c0_12], %12 {strides = array<i32>} : memref<72x256xf32, #tpu.memory_space<vmem>>, vector<72x256xf32>,
    } else {
    }
    %c0 = arith.constant 0 : index
    %c0_1 = arith.constant 0 : index
    %3 = vector.load %arg6[%c0, %c0_1] : memref<72x256xf32, #tpu.memory_space<vmem>>, vector<72x256xf32>
    %c0_2 = arith.constant 0 : index
    %c0_3 = arith.constant 0 : index
    %4 = vector.load %arg2[%c0_2, %c0_3] : memref<72x2736xbf16, #tpu.memory_space<vmem>>, vector<72x2736xbf16>
    %c0_4 = arith.constant 0 : index
    %c0_5 = arith.constant 0 : index
    %5 = vector.load %arg3[%c0_4, %c0_5] : memref<2736x256xbf16, #tpu.memory_space<vmem>>, vector<2736x256xbf16>
    %cst = arith.constant dense<0.000000e+00> : vector<72x256xf32>
    %6 = tpu.matmul %4, %5, %cst {dimension_numbers = #tpu.dot_dimension_numbers<[1], [0], [0], [1], [0, 0, 1, 1], [], []>} : vector<72x2736xbf16>, vector<2736x256xbf16>, vector<72x256xf32> -> vector<72x256xf32>
    %7 = arith.addf %3, %6 : vector<72x256xf32>
    %c0_6 = arith.constant 0 : index
    %c0_7 = arith.constant 0 : index
    %8 = vector.load %arg6[%c0_6, %c0_7] : memref<72x256xf32, #tpu.memory_space<vmem>>, vector<72x256xf32>
    tpu.vector_store %arg6[%c0_6, %c0_7], %7 {strides = array<i32>} : memref<72x256xf32, #tpu.memory_space<vmem>>, vector<72x256xf32>,
    %c0_i32_8 = arith.constant 0 : i32
    %9 = arith.cmpi eq, %arg1, %c0_i32_8 : i32
    %10 = arith.extui %9 : i1 to i32
    %c0_i32_9 = arith.constant 0 : i32
    %11 = arith.cmpi ne, %10, %c0_i32_9 : i32
    scf.if %11 {
      %c0_10 = arith.constant 0 : index
      %c0_11 = arith.constant 0 : index
      %12 = vector.load %arg6[%c0_10, %c0_11] : memref<72x256xf32, #tpu.memory_space<vmem>>, vector<72x256xf32>
      %c0_12 = arith.constant 0 : index
      %c0_13 = arith.constant 0 : index
      %13 = vector.load %arg4[%c0_12, %c0_13] : memref<1x256xf32, #tpu.memory_space<vmem>>, vector<1x256xf32>
      %14 = vector.broadcast %13 : vector<1x256xf32> to vector<72x256xf32>
      %15 = arith.addf %12, %14 : vector<72x256xf32>
      %cst_14 = arith.constant 0.000000e+00 : f32
      %16 = vector.broadcast %cst_14 : f32 to vector<72x256xf32>
      %17 = arith.maximumf %15, %16 : vector<72x256xf32>
      %18 = arith.truncf %17 : vector<72x256xf32> to vector<72x256xbf16>
      %c0_15 = arith.constant 0 : index
      %c0_16 = arith.constant 0 : index
      %19 = vector.load %arg5[%c0_15, %c0_16] : memref<72x256xbf16, #tpu.memory_space<vmem>>, vector<72x256xbf16>
      tpu.vector_store %arg5[%c0_15, %c0_16], %18 {strides = array<i32>} : memref<72x256xbf16, #tpu.memory_space<vmem>>, vector<72x256xbf16>,
    } else {
    }
    return
  }
  func.func @transform_0(%arg0: i32, %arg1: i32) -> (i32, i32) {
    %c0_i32 = arith.constant 0 : i32
    return %arg0, %arg1 : i32, i32
  }
  func.func @transform_1(%arg0: i32, %arg1: i32) -> (i32, i32) {
    %c0_i32 = arith.constant 0 : i32
    %c0_i32_0 = arith.constant 0 : i32
    return %arg1, %c0_i32 : i32, i32
  }
  func.func @transform_2(%arg0: i32, %arg1: i32) -> (i32, i32) {
    %c0_i32 = arith.constant 0 : i32
    %c0_i32_0 = arith.constant 0 : i32
    %c0_i32_1 = arith.constant 0 : i32
    return %c0_i32, %c0_i32_0 : i32, i32
  }
  func.func @transform_3(%arg0: i32, %arg1: i32) -> (i32, i32) {
    %c0_i32 = arith.constant 0 : i32
    %c0_i32_0 = arith.constant 0 : i32
    return %arg0, %c0_i32 : i32, i32
  }
}

module attributes {stable_mosaic.version = 11 : i64} {
  func.func @_matmul_kernel(%arg0: i32, %arg1: i32, %arg2: memref<72x256xbf16, #tpu.memory_space<vmem>>, %arg3: memref<256x128xbf16, #tpu.memory_space<vmem>>, %arg4: memref<1x128xf32, #tpu.memory_space<vmem>>, %arg5: memref<72x128xf32, #tpu.memory_space<vmem>>, %arg6: memref<72x128xf32, #tpu.memory_space<vmem>>) attributes {dimension_semantics = [#tpu.dimension_semantics<parallel>, #tpu.dimension_semantics<arbitrary>], iteration_bounds = array<i64: 1, 1>, scalar_prefetch = 0 : i64, scratch_operands = 1 : i64, tpu.core_type = #tpu.core_type<tc>, window_params = [{transform_indices = @transform_0, window_bounds = array<i64: 72, 256>}, {transform_indices = @transform_1, window_bounds = array<i64: 256, 128>}, {pipeline_mode = #tpu.pipeline_mode<synchronous>, transform_indices = @transform_2, window_bounds = array<i64: 1, 128>}, {transform_indices = @transform_3, window_bounds = array<i64: 72, 128>}]} {
    %c0_i32 = arith.constant 0 : i32
    %0 = arith.cmpi eq, %arg1, %c0_i32 : i32
    %1 = arith.extui %0 : i1 to i32
    %c0_i32_0 = arith.constant 0 : i32
    %2 = arith.cmpi ne, %1, %c0_i32_0 : i32
    scf.if %2 {
      %cst_10 = arith.constant 0.000000e+00 : f32
      %12 = vector.broadcast %cst_10 : f32 to vector<72x128xf32>
      %c0_11 = arith.constant 0 : index
      %c0_12 = arith.constant 0 : index
      %13 = vector.load %arg6[%c0_11, %c0_12] : memref<72x128xf32, #tpu.memory_space<vmem>>, vector<72x128xf32>
      tpu.vector_store %arg6[%c0_11, %c0_12], %12 {strides = array<i32>} : memref<72x128xf32, #tpu.memory_space<vmem>>, vector<72x128xf32>,
    } else {
    }
    %c0 = arith.constant 0 : index
    %c0_1 = arith.constant 0 : index
    %3 = vector.load %arg6[%c0, %c0_1] : memref<72x128xf32, #tpu.memory_space<vmem>>, vector<72x128xf32>
    %c0_2 = arith.constant 0 : index
    %c0_3 = arith.constant 0 : index
    %4 = vector.load %arg2[%c0_2, %c0_3] : memref<72x256xbf16, #tpu.memory_space<vmem>>, vector<72x256xbf16>
    %c0_4 = arith.constant 0 : index
    %c0_5 = arith.constant 0 : index
    %5 = vector.load %arg3[%c0_4, %c0_5] : memref<256x128xbf16, #tpu.memory_space<vmem>>, vector<256x128xbf16>
    %cst = arith.constant dense<0.000000e+00> : vector<72x128xf32>
    %6 = tpu.matmul %4, %5, %cst {dimension_numbers = #tpu.dot_dimension_numbers<[1], [0], [0], [1], [0, 0, 1, 1], [], []>} : vector<72x256xbf16>, vector<256x128xbf16>, vector<72x128xf32> -> vector<72x128xf32>
    %7 = arith.addf %3, %6 : vector<72x128xf32>
    %c0_6 = arith.constant 0 : index
    %c0_7 = arith.constant 0 : index
    %8 = vector.load %arg6[%c0_6, %c0_7] : memref<72x128xf32, #tpu.memory_space<vmem>>, vector<72x128xf32>
    tpu.vector_store %arg6[%c0_6, %c0_7], %7 {strides = array<i32>} : memref<72x128xf32, #tpu.memory_space<vmem>>, vector<72x128xf32>,
    %c0_i32_8 = arith.constant 0 : i32
    %9 = arith.cmpi eq, %arg1, %c0_i32_8 : i32
    %10 = arith.extui %9 : i1 to i32
    %c0_i32_9 = arith.constant 0 : i32
    %11 = arith.cmpi ne, %10, %c0_i32_9 : i32
    scf.if %11 {
      %c0_10 = arith.constant 0 : index
      %c0_11 = arith.constant 0 : index
      %12 = vector.load %arg6[%c0_10, %c0_11] : memref<72x128xf32, #tpu.memory_space<vmem>>, vector<72x128xf32>
      %c0_12 = arith.constant 0 : index
      %c0_13 = arith.constant 0 : index
      %13 = vector.load %arg4[%c0_12, %c0_13] : memref<1x128xf32, #tpu.memory_space<vmem>>, vector<1x128xf32>
      %14 = vector.broadcast %13 : vector<1x128xf32> to vector<72x128xf32>
      %15 = arith.addf %12, %14 : vector<72x128xf32>
      %c0_14 = arith.constant 0 : index
      %c0_15 = arith.constant 0 : index
      %16 = vector.load %arg5[%c0_14, %c0_15] : memref<72x128xf32, #tpu.memory_space<vmem>>, vector<72x128xf32>
      tpu.vector_store %arg5[%c0_14, %c0_15], %15 {strides = array<i32>} : memref<72x128xf32, #tpu.memory_space<vmem>>, vector<72x128xf32>,
    } else {
    }
    return
  }
  func.func @transform_0(%arg0: i32, %arg1: i32) -> (i32, i32) {
    %c0_i32 = arith.constant 0 : i32
    return %arg0, %arg1 : i32, i32
  }
  func.func @transform_1(%arg0: i32, %arg1: i32) -> (i32, i32) {
    %c0_i32 = arith.constant 0 : i32
    %c0_i32_0 = arith.constant 0 : i32
    return %arg1, %c0_i32 : i32, i32
  }
  func.func @transform_2(%arg0: i32, %arg1: i32) -> (i32, i32) {
    %c0_i32 = arith.constant 0 : i32
    %c0_i32_0 = arith.constant 0 : i32
    %c0_i32_1 = arith.constant 0 : i32
    return %c0_i32, %c0_i32_0 : i32, i32
  }
  func.func @transform_3(%arg0: i32, %arg1: i32) -> (i32, i32) {
    %c0_i32 = arith.constant 0 : i32
    %c0_i32_0 = arith.constant 0 : i32
    return %arg0, %c0_i32 : i32, i32
  }
}

</mosaic_0001>

<bundles_post_ra>
// kernel: head_forward.12
= control target key start
LH: loop header
LB: loop body
LE: loop exit
PB: predicated region body
PF: predicated region fallthrough
CT: control target
= control target key end

     0   :  { %v721_v1 = vmov 0   ;;  %vm218_vm0 = vcmask 1043456   ;;  %vm193_vm1 = vcmask 588800   ;;  %v439_v21 = vlaneseq  ;;  %s888_s1 = inlined_call_operand.vmem [shape: bf16[72,256], index: 1, kind: input, shape index: {}]   ;;  %s889_s0 = inlined_call_operand.vmem [shape: bf16[128,72], index: 0, kind: input, shape index: {}]   ;;  %s890_s2 = inlined_call_operand.vmem [shape: f32[1,256], index: 2, kind: input, shape index: {}]   ;;  %s891_s3 = inlined_call_operand.vmem [shape: bf16[128,256], index: 3, kind: output, shape index: {}]  }
   0x1   :  { %v699_v0 = vld [vmem:[%s888_s1 + $0x4] ss:$8 sps:$4 sm:$0xff]   ;;  %257 = vmatprep.mubr.bf16.mxu0 %v721_v1  ;;  %297 = vmatprep.mubr.bf16.mxu1 %v721_v1  ;;  %v701_v2 = vld [vmem:[%s888_s1] ss:$8 sps:$4 sm:$0xff]   ;;  %v702_v3 = vld [vmem:[%s888_s1 + $0x14] ss:$8 sps:$4 sm:$0xff]  }
   0x2   :  { %225 = vmatprep.subr.bf16.mxu0 %v699_v0  ;;  %688 = vmatprep.subr.bf16.mxu1 %v699_v0  ;;  %v704_v4 = vld [vmem:[%s888_s1 + $0x10] ss:$8 sps:$4 sm:$0xff]   ;;  %v705_v5 = vld [vmem:[%s888_s1 + $0x24] ss:$8 sps:$4 sm:$0xff]   ;;  %v707_v6 = vld [vmem:[%s888_s1 + $0x20] ss:$8 sps:$4 sm:$0xff]  }
   0x3   :  { %226 = vmatpush1.bf16.msra.mxu0 %v701_v2  ;;  %693 = vmatpush1.bf16.msra.mxu1 %v701_v2  ;;  %v708_v7 = vld [vmem:[%s888_s1 + $0x34] ss:$8 sps:$4 sm:$0xff]   ;;  %v107_v8 = vld [vmem:[%s888_s1 + $0x40] sm:$0xff]  ;;  %v710_v9 = vld [vmem:[%s888_s1 + $0x30] ss:$8 sps:$4 sm:$0xff]   ;;  %v440_v22 = vshrl.u32 %v439_v21, 7 }
   0x4   :  { %227 = vmatprep.subr.bf16.mxu0 %v702_v3  ;;  %689 = vmatprep.subr.bf16.mxu1 %v702_v3  ;;  %v646_v10 = vcombine.high %v107_v8, %v107_v8  ;;  %v645_v11 = vcombine.low %v107_v8, %v107_v8  ;;  %v713_v13 = vld [vmem:[%s889_s0] sm:$0xff]   ;;  %v715_v15 = vld [vmem:[%s889_s0 + $0x8] sm:$0xff]   ;;  %v717_v17 = vld [vmem:[%s889_s0 + $0x10] sm:$0xff]  }
   0x5   :  { %v714_v14 = vld [vmem:[%s889_s0 + $0x20] sm:$0xff]   ;;  %v716_v16 = vld [vmem:[%s889_s0 + $0x28] sm:$0xff]   ;;  %v718_v18 = vld [vmem:[%s889_s0 + $0x30] sm:$0xff]   ;;  %v441_v23 = vsub.s32 0, %v440_v22  ;;  %v445_v25 = vsub.s32 1, %v440_v22 }
   0x6   :  { %v220_v12 = vsel %vm218_vm0, %v645_v11, 0  ;;  %v719_v19 = vld [vmem:[%s889_s0 + $0x18] sm:$0xff]   ;;  %v437_v24 = vld [vmem:[%s890_s2] sm:$0x3] }
   0x7   :  { %228 = vmatpush1.bf16.msra.mxu0 %v704_v4  ;;  %694 = vmatpush1.bf16.msra.mxu1 %v704_v4  ;;  %v720_v20 = vld [vmem:[%s889_s0 + $0x38] sm:$0xff]   ;;  %v804_v26 = vrot.slane %v437_v24, %v441_v23  ;;  %v806_v27 = vrot.slane %v437_v24, %v445_v25 }
   0x8   :  { %229 = vmatprep.subr.bf16.mxu0 %v705_v5  ;;  %690 = vmatprep.subr.bf16.mxu1 %v705_v5 }
   0xb   :  { %230 = vmatpush1.bf16.msra.mxu0 %v707_v6  ;;  %695 = vmatpush1.bf16.msra.mxu1 %v707_v6 }
   0xc   :  { %231 = vmatprep.subr.bf16.mxu0 %v708_v7  ;;  %691 = vmatprep.subr.bf16.mxu1 %v708_v7 }
   0xf   :  { %232 = vmatpush1.bf16.msra.mxu0 %v710_v9  ;;  %696 = vmatpush1.bf16.msra.mxu1 %v710_v9 }
  0x10   :  { %647 = vmatprep.subr.msk.bf16.mxu0 %vm218_vm0, %v646_v10  ;;  %692 = vmatprep.subr.msk.bf16.mxu1 %vm218_vm0, %v646_v10 }
  0x13   :  { %234 = vmatpush1.bf16.msra.mxu0 %v220_v12  ;;  %697 = vmatpush1.bf16.msra.mxu1 %v220_v12 }
  0x16   :  { %648 = vmatmul.mubr.msk.bf16.vlgmr.msra.gmra.mrb[0].mxu0 %vm193_vm1, %v713_v13  ;;  %652 = vmatmul.mubr.msk.bf16.vlgmr.msra.gmra.mrb[0].mxu1 %vm193_vm1, %v714_v14 }
  0x17   :  { %267 = vmatprep.mubr.bf16.mxu0 %v721_v1  ;;  %307 = vmatprep.mubr.bf16.mxu1 %v721_v1 }
  0x1e   :  { %649 = vmatmul.mubr.msk.bf16.gmra.mrb[4].mxu0 %vm193_vm1, %v715_v15  ;;  %653 = vmatmul.mubr.msk.bf16.gmra.mrb[4].mxu1 %vm193_vm1, %v716_v16 }
  0x1f   :  { %277 = vmatprep.mubr.bf16.mxu0 %v721_v1  ;;  %317 = vmatprep.mubr.bf16.mxu1 %v721_v1 }
  0x26   :  { %650 = vmatmul.mubr.msk.bf16.gmra.mrb[8].mxu0 %vm193_vm1, %v717_v17  ;;  %654 = vmatmul.mubr.msk.bf16.gmra.mrb[8].mxu1 %vm193_vm1, %v718_v18 }
  0x27   :  { %287 = vmatprep.mubr.bf16.mxu0 %v721_v1  ;;  %327 = vmatprep.mubr.bf16.mxu1 %v721_v1 }
  0x2e   :  { %651 = vmatmul.mubr.msk.bf16.gmra.mrb[12].mxu0 %vm193_vm1, %v719_v19  ;;  %655 = vmatmul.mubr.msk.bf16.gmra.mrb[12].mxu1 %vm193_vm1, %v720_v20 }
  0xe9   :  { %v259_v28 = vpop.f32.mrb[0].mxu0  ;;  %v299_v29 = vpop.f32.mrb[0].mxu1 }
  0xea   :  { %v449_v30 = vadd.f32 %v804_v26, %v259_v28  ;;  %v465_v31 = vadd.f32 %v804_v26, %v299_v29  ;;  %v261_v32 = vpop.f32.mrb[1].mxu0  ;;  %v301_v33 = vpop.f32.mrb[1].mxu1 }
  0xeb   :  { %v450_v34 = vadd.f32 %v806_v27, %v261_v32  ;;  %v466_v35 = vadd.f32 %v806_v27, %v301_v33  ;;  %v263_v36 = vpop.f32.mrb[2].mxu0  ;;  %v303_v37 = vpop.f32.mrb[2].mxu1 }
  0xec   :  { %v481_v38 = vmax.f32 %v449_v30, 0.0  ;;  %v497_v39 = vmax.f32 %v465_v31, 0.0  ;;  %v451_v40 = vadd.f32 %v804_v26, %v263_v36  ;;  %v467_v41 = vadd.f32 %v804_v26, %v303_v37  ;;  %v265_v42 = vpop.f32.mrb[3].mxu0  ;;  %v305_v43 = vpop.f32.mrb[3].mxu1 }
  0xed   :  { %v482_v44 = vmax.f32 %v450_v34, 0.0  ;;  %v498_v45 = vmax.f32 %v466_v35, 0.0  ;;  %v452_v46 = vadd.f32 %v806_v27, %v265_v42  ;;  %v468_v47 = vadd.f32 %v806_v27, %v305_v43 }
  0xee   :  { %v483_v48 = vmax.f32 %v451_v40, 0.0  ;;  %v499_v49 = vmax.f32 %v467_v41, 0.0 }
  0xef   :  { %v672_v50 = vpack.c.bf16 %v482_v44, %v481_v38  ;;  %v680_v51 = vpack.c.bf16 %v498_v45, %v497_v39  ;;  %v484_v52 = vmax.f32 %v452_v46, 0.0  ;;  %v500_v53 = vmax.f32 %v468_v47, 0.0 }
  0xf1   :  { %609 = vst [vmem:[%s891_s3] sm:$0xff] %v672_v50  ;;  %617 = vst [vmem:[%s891_s3 + $0x40] sm:$0xff] %v680_v51  ;;  %v673_v54 = vpack.c.bf16 %v484_v52, %v483_v48  ;;  %v681_v55 = vpack.c.bf16 %v500_v53, %v499_v49  ;;  %v269_v56 = vpop.f32.mrb[4].mxu0  ;;  %v309_v57 = vpop.f32.mrb[4].mxu1 }
  0xf2   :  { %v453_v58 = vadd.f32 %v804_v26, %v269_v56  ;;  %v469_v59 = vadd.f32 %v804_v26, %v309_v57  ;;  %v271_v60 = vpop.f32.mrb[5].mxu0  ;;  %v311_v61 = vpop.f32.mrb[5].mxu1 }
  0xf3   :  { %610 = vst [vmem:[%s891_s3 + $0x8] sm:$0xff] %v673_v54  ;;  %618 = vst [vmem:[%s891_s3 + $0x48] sm:$0xff] %v681_v55  ;;  %v454_v62 = vadd.f32 %v806_v27, %v271_v60  ;;  %v470_v63 = vadd.f32 %v806_v27, %v311_v61  ;;  %v273_v0 = vpop.f32.mrb[6].mxu0  ;;  %v313_v1 = vpop.f32.mrb[6].mxu1 }
  0xf4   :  { %v485_v2 = vmax.f32 %v453_v58, 0.0  ;;  %v501_v3 = vmax.f32 %v469_v59, 0.0  ;;  %v455_v4 = vadd.f32 %v804_v26, %v273_v0  ;;  %v471_v5 = vadd.f32 %v804_v26, %v313_v1  ;;  %v275_v6 = vpop.f32.mrb[7].mxu0  ;;  %v315_v7 = vpop.f32.mrb[7].mxu1 }
  0xf5   :  { %v486_v8 = vmax.f32 %v454_v62, 0.0  ;;  %v502_v9 = vmax.f32 %v470_v63, 0.0  ;;  %v456_v10 = vadd.f32 %v806_v27, %v275_v6  ;;  %v472_v11 = vadd.f32 %v806_v27, %v315_v7 }
  0xf6   :  { %v487_v12 = vmax.f32 %v455_v4, 0.0  ;;  %v503_v13 = vmax.f32 %v471_v5, 0.0 }
  0xf7   :  { %v674_v14 = vpack.c.bf16 %v486_v8, %v485_v2  ;;  %v682_v15 = vpack.c.bf16 %v502_v9, %v501_v3  ;;  %v488_v16 = vmax.f32 %v456_v10, 0.0  ;;  %v504_v17 = vmax.f32 %v472_v11, 0.0 }
  0xf9   :  { %611 = vst [vmem:[%s891_s3 + $0x10] sm:$0xff] %v674_v14  ;;  %619 = vst [vmem:[%s891_s3 + $0x50] sm:$0xff] %v682_v15  ;;  %v675_v18 = vpack.c.bf16 %v488_v16, %v487_v12  ;;  %v683_v19 = vpack.c.bf16 %v504_v17, %v503_v13  ;;  %v279_v20 = vpop.f32.mrb[8].mxu0  ;;  %v319_v21 = vpop.f32.mrb[8].mxu1 }
  0xfa   :  { %v457_v22 = vadd.f32 %v804_v26, %v279_v20  ;;  %v473_v23 = vadd.f32 %v804_v26, %v319_v21  ;;  %v281_v24 = vpop.f32.mrb[9].mxu0  ;;  %v321_v25 = vpop.f32.mrb[9].mxu1 }
  0xfb   :  { %612 = vst [vmem:[%s891_s3 + $0x18] sm:$0xff] %v675_v18  ;;  %620 = vst [vmem:[%s891_s3 + $0x58] sm:$0xff] %v683_v19  ;;  %v458_v28 = vadd.f32 %v806_v27, %v281_v24  ;;  %v474_v29 = vadd.f32 %v806_v27, %v321_v25  ;;  %v283_v30 = vpop.f32.mrb[10].mxu0  ;;  %v323_v31 = vpop.f32.mrb[10].mxu1 }
  0xfc   :  { %v489_v32 = vmax.f32 %v457_v22, 0.0  ;;  %v505_v33 = vmax.f32 %v473_v23, 0.0  ;;  %v459_v34 = vadd.f32 %v804_v26, %v283_v30  ;;  %v475_v35 = vadd.f32 %v804_v26, %v323_v31  ;;  %v285_v36 = vpop.f32.mrb[11].mxu0  ;;  %v325_v37 = vpop.f32.mrb[11].mxu1 }
  0xfd   :  { %v490_v38 = vmax.f32 %v458_v28, 0.0  ;;  %v506_v39 = vmax.f32 %v474_v29, 0.0  ;;  %v460_v40 = vadd.f32 %v806_v27, %v285_v36  ;;  %v476_v41 = vadd.f32 %v806_v27, %v325_v37 }
  0xfe   :  { %v491_v42 = vmax.f32 %v459_v34, 0.0  ;;  %v507_v43 = vmax.f32 %v475_v35, 0.0 }
  0xff   :  { %v676_v44 = vpack.c.bf16 %v490_v38, %v489_v32  ;;  %v684_v45 = vpack.c.bf16 %v506_v39, %v505_v33  ;;  %v492_v46 = vmax.f32 %v460_v40, 0.0  ;;  %v508_v47 = vmax.f32 %v476_v41, 0.0 }
 0x101   :  { %613 = vst [vmem:[%s891_s3 + $0x20] sm:$0xff] %v676_v44  ;;  %621 = vst [vmem:[%s891_s3 + $0x60] sm:$0xff] %v684_v45  ;;  %v677_v48 = vpack.c.bf16 %v492_v46, %v491_v42  ;;  %v685_v49 = vpack.c.bf16 %v508_v47, %v507_v43  ;;  %v289_v50 = vpop.f32.mrb[12].mxu0  ;;  %v329_v51 = vpop.f32.mrb[12].mxu1 }
 0x102   :  { %v461_v52 = vadd.f32 %v804_v26, %v289_v50  ;;  %v477_v53 = vadd.f32 %v804_v26, %v329_v51  ;;  %v291_v54 = vpop.f32.mrb[13].mxu0  ;;  %v331_v55 = vpop.f32.mrb[13].mxu1 }
 0x103   :  { %614 = vst [vmem:[%s891_s3 + $0x28] sm:$0xff] %v677_v48  ;;  %622 = vst [vmem:[%s891_s3 + $0x68] sm:$0xff] %v685_v49  ;;  %v462_v56 = vadd.f32 %v806_v27, %v291_v54  ;;  %v478_v57 = vadd.f32 %v806_v27, %v331_v55  ;;  %v293_v58 = vpop.f32.mrb[14].mxu0  ;;  %v333_v59 = vpop.f32.mrb[14].mxu1 }
 0x104   :  { %v493_v60 = vmax.f32 %v461_v52, 0.0  ;;  %v509_v61 = vmax.f32 %v477_v53, 0.0  ;;  %v463_v62 = vadd.f32 %v804_v26, %v293_v58  ;;  %v479_v63 = vadd.f32 %v804_v26, %v333_v59  ;;  %v295_v0 = vpop.f32.mrb[15].mxu0  ;;  %v335_v1 = vpop.f32.mrb[15].mxu1 }
 0x105   :  { %v494_v2 = vmax.f32 %v462_v56, 0.0  ;;  %v510_v3 = vmax.f32 %v478_v57, 0.0  ;;  %v464_v4 = vadd.f32 %v806_v27, %v295_v0  ;;  %v480_v5 = vadd.f32 %v806_v27, %v335_v1 }
 0x106   :  { %v495_v6 = vmax.f32 %v463_v62, 0.0  ;;  %v511_v7 = vmax.f32 %v479_v63, 0.0 }
 0x107   :  { %v678_v8 = vpack.c.bf16 %v494_v2, %v493_v60  ;;  %v686_v9 = vpack.c.bf16 %v510_v3, %v509_v61  ;;  %v496_v10 = vmax.f32 %v464_v4, 0.0  ;;  %v512_v11 = vmax.f32 %v480_v5, 0.0 }
 0x109   :  { %615 = vst [vmem:[%s891_s3 + $0x30] sm:$0xff] %v678_v8  ;;  %623 = vst [vmem:[%s891_s3 + $0x70] sm:$0xff] %v686_v9  ;;  %v679_v26 = vpack.c.bf16 %v496_v10, %v495_v6  ;;  %v687_v12 = vpack.c.bf16 %v512_v11, %v511_v7 }
 0x10b   :  { %616 = vst [vmem:[%s891_s3 + $0x38] sm:$0xff] %v679_v26  ;;  %624 = vst [vmem:[%s891_s3 + $0x78] sm:$0xff] %v687_v12 }

// kernel: head_forward.11
= control target key start
LH: loop header
LB: loop body
LE: loop exit
PB: predicated region body
PF: predicated region fallthrough
CT: control target
= control target key end

     0   :  { %8 = vsyncpa [#allocation4], 0  ;;  %s759_s12 = smov [#allocation3]   ;;  %s936_s0 = inlined_call_operand.vmem [shape: bf16[128,72], index: 0, kind: input, shape index: {}]   ;;  %s937_s1 = inlined_call_operand.vmem [shape: bf16[72,256], index: 1, kind: input, shape index: {}]   ;;  %s938_s2 = inlined_call_operand.hbm [shape: f32[1,256], index: 2, kind: input, shape index: {}]   ;;  %s939_s3 = inlined_call_operand.vmem [shape: bf16[128,256], index: 3, kind: output, shape index: {}]  }
   0x1   :  { %s19_s13 = sshll.u32 %s759_s12, 4  ;;  %s735_s16 = scalar_lea.hbm %s938_s2, 32  ;;  %s20_s13 = int_to_ptr.vmem [resolvable:$true] %s19_s13 }
   0x2   :  { %p736_p0 = scmp.ne.s32.totalorder %s938_s2, %s735_s16  ;;  %p739_p1 = scmp.lt.u32.totalorder %s735_s16, %s938_s2 }
   0x4   :  { %p741_p2 = pnand %p739_p1, %p736_p0 }
   0x6   :  { %744 = shalt.err (!%p741_p2)
}
   0x7   :  { %s745_s21 = scalar_lea.vmem %s20_s13, 32  ;;  %p750_p4 = scmp.lt.s32.totalorder %s20_s13, %s20_s13 }
   0x8   :  { %p746_p3 = scmp.ne.s32.totalorder %s20_s13, %s745_s21  ;;  %p751_p5 = scmp.lt.s32.totalorder %s745_s21, %s745_s21 }
   0xa   :  { %p752_p6 = por %p751_p5, %p750_p4 }
   0xc   :  { %p753_p7 = pnand %p752_p6, %p746_p3 }
   0xe   :  { %756 = shalt.err (!%p753_p7)
}
   0xf   :  { %22 = dma.hbm_to_vmem [thread:$0]  %s938_s2, 32, %s20_s13, [#allocation4]  }
  0x10   :  { %757 = dma.done.wait [#allocation4], 32  }
  0x11   :  { %758 = vsyncadd [#allocation4], 4294967264  ;;  %v760_v0 = vmov 0   ;;  %v713_v1 = vld [vmem:[%s937_s1 + $0x4] ss:$8 sps:$4 sm:$0xff]   ;;  %vm230_vm0 = vcmask 1043456   ;;  %v451_v21 = vlaneseq }
  0x12   :  { %269 = vmatprep.mubr.bf16.mxu0 %v760_v0  ;;  %309 = vmatprep.mubr.bf16.mxu1 %v760_v0  ;;  %v715_v2 = vld [vmem:[%s937_s1] ss:$8 sps:$4 sm:$0xff]   ;;  %v716_v3 = vld [vmem:[%s937_s1 + $0x14] ss:$8 sps:$4 sm:$0xff]   ;;  %v718_v4 = vld [vmem:[%s937_s1 + $0x10] ss:$8 sps:$4 sm:$0xff]  }
  0x13   :  { %237 = vmatprep.subr.bf16.mxu0 %v713_v1  ;;  %701 = vmatprep.subr.bf16.mxu1 %v713_v1  ;;  %v719_v5 = vld [vmem:[%s937_s1 + $0x24] ss:$8 sps:$4 sm:$0xff]   ;;  %v721_v6 = vld [vmem:[%s937_s1 + $0x20] ss:$8 sps:$4 sm:$0xff]   ;;  %v722_v7 = vld [vmem:[%s937_s1 + $0x34] ss:$8 sps:$4 sm:$0xff]  }
  0x14   :  { %238 = vmatpush1.bf16.msra.mxu0 %v715_v2  ;;  %706 = vmatpush1.bf16.msra.mxu1 %v715_v2  ;;  %v119_v8 = vld [vmem:[%s937_s1 + $0x40] sm:$0xff]  ;;  %v724_v9 = vld [vmem:[%s937_s1 + $0x30] ss:$8 sps:$4 sm:$0xff]   ;;  %vm205_vm1 = vcmask 588800   ;;  %v729_v15 = vld [vmem:[%s936_s0 + $0x8] sm:$0xff]   ;;  %v452_v22 = vshrl.u32 %v451_v21, 7 }
  0x15   :  { %239 = vmatprep.subr.bf16.mxu0 %v716_v3  ;;  %702 = vmatprep.subr.bf16.mxu1 %v716_v3  ;;  %v659_v10 = vcombine.high %v119_v8, %v119_v8  ;;  %v658_v11 = vcombine.low %v119_v8, %v119_v8  ;;  %v727_v13 = vld [vmem:[%s936_s0] sm:$0xff]   ;;  %v730_v16 = vld [vmem:[%s936_s0 + $0x28] sm:$0xff]   ;;  %v731_v17 = vld [vmem:[%s936_s0 + $0x10] sm:$0xff]  }
  0x16   :  { %v728_v14 = vld [vmem:[%s936_s0 + $0x20] sm:$0xff]   ;;  %v732_v18 = vld [vmem:[%s936_s0 + $0x30] sm:$0xff]   ;;  %v733_v19 = vld [vmem:[%s936_s0 + $0x18] sm:$0xff]   ;;  %v453_v23 = vsub.s32 0, %v452_v22  ;;  %v457_v25 = vsub.s32 1, %v452_v22 }
  0x17   :  { %v232_v12 = vsel %vm230_vm0, %v658_v11, 0  ;;  %v734_v20 = vld [vmem:[%s936_s0 + $0x38] sm:$0xff]   ;;  %v449_v24 = vld [vmem:[#allocation3] sm:$0x3] }
  0x18   :  { %240 = vmatpush1.bf16.msra.mxu0 %v718_v4  ;;  %707 = vmatpush1.bf16.msra.mxu1 %v718_v4  ;;  %v852_v26 = vrot.slane %v449_v24, %v453_v23  ;;  %v854_v27 = vrot.slane %v449_v24, %v457_v25 }
  0x19   :  { %241 = vmatprep.subr.bf16.mxu0 %v719_v5  ;;  %703 = vmatprep.subr.bf16.mxu1 %v719_v5 }
  0x1c   :  { %242 = vmatpush1.bf16.msra.mxu0 %v721_v6  ;;  %708 = vmatpush1.bf16.msra.mxu1 %v721_v6 }
  0x1d   :  { %243 = vmatprep.subr.bf16.mxu0 %v722_v7  ;;  %704 = vmatprep.subr.bf16.mxu1 %v722_v7 }
  0x20   :  { %244 = vmatpush1.bf16.msra.mxu0 %v724_v9  ;;  %709 = vmatpush1.bf16.msra.mxu1 %v724_v9 }
  0x21   :  { %660 = vmatprep.subr.msk.bf16.mxu0 %vm230_vm0, %v659_v10  ;;  %705 = vmatprep.subr.msk.bf16.mxu1 %vm230_vm0, %v659_v10 }
  0x24   :  { %246 = vmatpush1.bf16.msra.mxu0 %v232_v12  ;;  %710 = vmatpush1.bf16.msra.mxu1 %v232_v12 }
  0x27   :  { %661 = vmatmul.mubr.msk.bf16.vlgmr.msra.gmra.mrb[0].mxu0 %vm205_vm1, %v727_v13  ;;  %665 = vmatmul.mubr.msk.bf16.vlgmr.msra.gmra.mrb[0].mxu1 %vm205_vm1, %v728_v14 }
  0x28   :  { %279 = vmatprep.mubr.bf16.mxu0 %v760_v0  ;;  %319 = vmatprep.mubr.bf16.mxu1 %v760_v0 }
  0x2f   :  { %662 = vmatmul.mubr.msk.bf16.gmra.mrb[4].mxu0 %vm205_vm1, %v729_v15  ;;  %666 = vmatmul.mubr.msk.bf16.gmra.mrb[4].mxu1 %vm205_vm1, %v730_v16 }
  0x30   :  { %289 = vmatprep.mubr.bf16.mxu0 %v760_v0  ;;  %329 = vmatprep.mubr.bf16.mxu1 %v760_v0 }
  0x37   :  { %663 = vmatmul.mubr.msk.bf16.gmra.mrb[8].mxu0 %vm205_vm1, %v731_v17  ;;  %667 = vmatmul.mubr.msk.bf16.gmra.mrb[8].mxu1 %vm205_vm1, %v732_v18 }
  0x38   :  { %299 = vmatprep.mubr.bf16.mxu0 %v760_v0  ;;  %339 = vmatprep.mubr.bf16.mxu1 %v760_v0 }
  0x3f   :  { %664 = vmatmul.mubr.msk.bf16.gmra.mrb[12].mxu0 %vm205_vm1, %v733_v19  ;;  %668 = vmatmul.mubr.msk.bf16.gmra.mrb[12].mxu1 %vm205_vm1, %v734_v20 }
  0xfa   :  { %v271_v28 = vpop.f32.mrb[0].mxu0  ;;  %v311_v29 = vpop.f32.mrb[0].mxu1 }
  0xfb   :  { %v461_v30 = vadd.f32 %v852_v26, %v271_v28  ;;  %v477_v31 = vadd.f32 %v852_v26, %v311_v29  ;;  %v273_v32 = vpop.f32.mrb[1].mxu0  ;;  %v313_v33 = vpop.f32.mrb[1].mxu1 }
  0xfc   :  { %v462_v34 = vadd.f32 %v854_v27, %v273_v32  ;;  %v478_v35 = vadd.f32 %v854_v27, %v313_v33  ;;  %v275_v36 = vpop.f32.mrb[2].mxu0  ;;  %v315_v37 = vpop.f32.mrb[2].mxu1 }
  0xfd   :  { %v493_v38 = vmax.f32 %v461_v30, 0.0  ;;  %v509_v39 = vmax.f32 %v477_v31, 0.0  ;;  %v463_v40 = vadd.f32 %v852_v26, %v275_v36  ;;  %v479_v41 = vadd.f32 %v852_v26, %v315_v37  ;;  %v277_v42 = vpop.f32.mrb[3].mxu0  ;;  %v317_v43 = vpop.f32.mrb[3].mxu1 }
  0xfe   :  { %v494_v44 = vmax.f32 %v462_v34, 0.0  ;;  %v510_v45 = vmax.f32 %v478_v35, 0.0  ;;  %v464_v46 = vadd.f32 %v854_v27, %v277_v42  ;;  %v480_v47 = vadd.f32 %v854_v27, %v317_v43 }
  0xff   :  { %v495_v48 = vmax.f32 %v463_v40, 0.0  ;;  %v511_v49 = vmax.f32 %v479_v41, 0.0 }
 0x100   :  { %v685_v50 = vpack.c.bf16 %v494_v44, %v493_v38  ;;  %v693_v51 = vpack.c.bf16 %v510_v45, %v509_v39  ;;  %v496_v52 = vmax.f32 %v464_v46, 0.0  ;;  %v512_v53 = vmax.f32 %v480_v47, 0.0 }
 0x102   :  { %621 = vst [vmem:[%s939_s3] sm:$0xff] %v685_v50  ;;  %629 = vst [vmem:[%s939_s3 + $0x40] sm:$0xff] %v693_v51  ;;  %v686_v54 = vpack.c.bf16 %v496_v52, %v495_v48  ;;  %v694_v55 = vpack.c.bf16 %v512_v53, %v511_v49  ;;  %v281_v56 = vpop.f32.mrb[4].mxu0  ;;  %v321_v57 = vpop.f32.mrb[4].mxu1 }
 0x103   :  { %v465_v58 = vadd.f32 %v852_v26, %v281_v56  ;;  %v481_v59 = vadd.f32 %v852_v26, %v321_v57  ;;  %v283_v60 = vpop.f32.mrb[5].mxu0  ;;  %v323_v61 = vpop.f32.mrb[5].mxu1 }
 0x104   :  { %622 = vst [vmem:[%s939_s3 + $0x8] sm:$0xff] %v686_v54  ;;  %630 = vst [vmem:[%s939_s3 + $0x48] sm:$0xff] %v694_v55  ;;  %v466_v62 = vadd.f32 %v854_v27, %v283_v60  ;;  %v482_v63 = vadd.f32 %v854_v27, %v323_v61  ;;  %v285_v0 = vpop.f32.mrb[6].mxu0  ;;  %v325_v1 = vpop.f32.mrb[6].mxu1 }
 0x105   :  { %v497_v2 = vmax.f32 %v465_v58, 0.0  ;;  %v513_v3 = vmax.f32 %v481_v59, 0.0  ;;  %v467_v4 = vadd.f32 %v852_v26, %v285_v0  ;;  %v483_v5 = vadd.f32 %v852_v26, %v325_v1  ;;  %v287_v6 = vpop.f32.mrb[7].mxu0  ;;  %v327_v7 = vpop.f32.mrb[7].mxu1 }
 0x106   :  { %v498_v8 = vmax.f32 %v466_v62, 0.0  ;;  %v514_v9 = vmax.f32 %v482_v63, 0.0  ;;  %v468_v10 = vadd.f32 %v854_v27, %v287_v6  ;;  %v484_v11 = vadd.f32 %v854_v27, %v327_v7 }
 0x107   :  { %v499_v12 = vmax.f32 %v467_v4, 0.0  ;;  %v515_v13 = vmax.f32 %v483_v5, 0.0 }
 0x108   :  { %v687_v14 = vpack.c.bf16 %v498_v8, %v497_v2  ;;  %v695_v15 = vpack.c.bf16 %v514_v9, %v513_v3  ;;  %v500_v16 = vmax.f32 %v468_v10, 0.0  ;;  %v516_v17 = vmax.f32 %v484_v11, 0.0 }
 0x10a   :  { %623 = vst [vmem:[%s939_s3 + $0x10] sm:$0xff] %v687_v14  ;;  %631 = vst [vmem:[%s939_s3 + $0x50] sm:$0xff] %v695_v15  ;;  %v688_v18 = vpack.c.bf16 %v500_v16, %v499_v12  ;;  %v696_v19 = vpack.c.bf16 %v516_v17, %v515_v13  ;;  %v291_v20 = vpop.f32.mrb[8].mxu0  ;;  %v331_v21 = vpop.f32.mrb[8].mxu1 }
 0x10b   :  { %v469_v22 = vadd.f32 %v852_v26, %v291_v20  ;;  %v485_v23 = vadd.f32 %v852_v26, %v331_v21  ;;  %v293_v24 = vpop.f32.mrb[9].mxu0  ;;  %v333_v25 = vpop.f32.mrb[9].mxu1 }
 0x10c   :  { %624 = vst [vmem:[%s939_s3 + $0x18] sm:$0xff] %v688_v18  ;;  %632 = vst [vmem:[%s939_s3 + $0x58] sm:$0xff] %v696_v19  ;;  %v470_v28 = vadd.f32 %v854_v27, %v293_v24  ;;  %v486_v29 = vadd.f32 %v854_v27, %v333_v25  ;;  %v295_v30 = vpop.f32.mrb[10].mxu0  ;;  %v335_v31 = vpop.f32.mrb[10].mxu1 }
 0x10d   :  { %v501_v32 = vmax.f32 %v469_v22, 0.0  ;;  %v517_v33 = vmax.f32 %v485_v23, 0.0  ;;  %v471_v34 = vadd.f32 %v852_v26, %v295_v30  ;;  %v487_v35 = vadd.f32 %v852_v26, %v335_v31  ;;  %v297_v36 = vpop.f32.mrb[11].mxu0  ;;  %v337_v37 = vpop.f32.mrb[11].mxu1 }
 0x10e   :  { %v502_v38 = vmax.f32 %v470_v28, 0.0  ;;  %v518_v39 = vmax.f32 %v486_v29, 0.0  ;;  %v472_v40 = vadd.f32 %v854_v27, %v297_v36  ;;  %v488_v41 = vadd.f32 %v854_v27, %v337_v37 }
 0x10f   :  { %v503_v42 = vmax.f32 %v471_v34, 0.0  ;;  %v519_v43 = vmax.f32 %v487_v35, 0.0 }
 0x110   :  { %v689_v44 = vpack.c.bf16 %v502_v38, %v501_v32  ;;  %v697_v45 = vpack.c.bf16 %v518_v39, %v517_v33  ;;  %v504_v46 = vmax.f32 %v472_v40, 0.0  ;;  %v520_v47 = vmax.f32 %v488_v41, 0.0 }
 0x112   :  { %625 = vst [vmem:[%s939_s3 + $0x20] sm:$0xff] %v689_v44  ;;  %633 = vst [vmem:[%s939_s3 + $0x60] sm:$0xff] %v697_v45  ;;  %v690_v48 = vpack.c.bf16 %v504_v46, %v503_v42  ;;  %v698_v49 = vpack.c.bf16 %v520_v47, %v519_v43  ;;  %v301_v50 = vpop.f32.mrb[12].mxu0  ;;  %v341_v51 = vpop.f32.mrb[12].mxu1 }
 0x113   :  { %v473_v52 = vadd.f32 %v852_v26, %v301_v50  ;;  %v489_v53 = vadd.f32 %v852_v26, %v341_v51  ;;  %v303_v54 = vpop.f32.mrb[13].mxu0  ;;  %v343_v55 = vpop.f32.mrb[13].mxu1 }
 0x114   :  { %626 = vst [vmem:[%s939_s3 + $0x28] sm:$0xff] %v690_v48  ;;  %634 = vst [vmem:[%s939_s3 + $0x68] sm:$0xff] %v698_v49  ;;  %v474_v56 = vadd.f32 %v854_v27, %v303_v54  ;;  %v490_v57 = vadd.f32 %v854_v27, %v343_v55  ;;  %v305_v58 = vpop.f32.mrb[14].mxu0  ;;  %v345_v59 = vpop.f32.mrb[14].mxu1 }
 0x115   :  { %v505_v60 = vmax.f32 %v473_v52, 0.0  ;;  %v521_v61 = vmax.f32 %v489_v53, 0.0  ;;  %v475_v62 = vadd.f32 %v852_v26, %v305_v58  ;;  %v491_v63 = vadd.f32 %v852_v26, %v345_v59  ;;  %v307_v0 = vpop.f32.mrb[15].mxu0  ;;  %v347_v1 = vpop.f32.mrb[15].mxu1 }
 0x116   :  { %v506_v2 = vmax.f32 %v474_v56, 0.0  ;;  %v522_v3 = vmax.f32 %v490_v57, 0.0  ;;  %v476_v4 = vadd.f32 %v854_v27, %v307_v0  ;;  %v492_v5 = vadd.f32 %v854_v27, %v347_v1 }
 0x117   :  { %v507_v6 = vmax.f32 %v475_v62, 0.0  ;;  %v523_v7 = vmax.f32 %v491_v63, 0.0 }
 0x118   :  { %v691_v8 = vpack.c.bf16 %v506_v2, %v505_v60  ;;  %v699_v9 = vpack.c.bf16 %v522_v3, %v521_v61  ;;  %v508_v10 = vmax.f32 %v476_v4, 0.0  ;;  %v524_v11 = vmax.f32 %v492_v5, 0.0 }
 0x11a   :  { %627 = vst [vmem:[%s939_s3 + $0x30] sm:$0xff] %v691_v8  ;;  %635 = vst [vmem:[%s939_s3 + $0x70] sm:$0xff] %v699_v9  ;;  %v692_v26 = vpack.c.bf16 %v508_v10, %v507_v6  ;;  %v700_v12 = vpack.c.bf16 %v524_v11, %v523_v7 }
 0x11c   :  { %628 = vst [vmem:[%s939_s3 + $0x38] sm:$0xff] %v692_v26  ;;  %636 = vst [vmem:[%s939_s3 + $0x78] sm:$0xff] %v700_v12 }
 0x11d   :  { %641 = vsyncpa [#allocation4], 1 }

// kernel: head_forward.14
= control target key start
LH: loop header
LB: loop body
LE: loop exit
PB: predicated region body
PF: predicated region fallthrough
CT: control target
= control target key end

     0   :  { %s825_s18 = smov 0   ;;  %s960_s0 = inlined_call_operand.vmem [shape: bf16[2,64,8], index: 0, kind: input, shape index: {}]   ;;  %s961_s1 = inlined_call_operand.vmem [shape: bf16[8,256], index: 1, kind: input, shape index: {}]   ;;  %s962_s2 = inlined_call_operand.vmem [shape: f32[1,256], index: 2, kind: input, shape index: {}]   ;;  %s963_s3 = inlined_call_operand.vmem [shape: bf16[256,256], index: 3, kind: input, shape index: {}]   ;;  %s964_s4 = inlined_call_operand.vmem [shape: f32[1,256], index: 4, kind: input, shape index: {}]   ;;  %s965_s5 = inlined_call_operand.vmem [shape: f32[2,1,256], index: 5, kind: output, shape index: {}]  }
   0x1 LB: > { %s659_s19 = sadd.s32 4294967295, %s791_s18   ;;  %p663_p0 = scmp.ge.s32.totalorder %s791_s18, 1  ;;  %s791_s18 = sphi %s825_s18, %s15_s18  }
   0x2   : > { %p187_p1 = scmp.lt.s32.totalorder %s791_s18, 3 }
   0x4   : > { %p188_p2 = pnand %p663_p0, %p187_p1 }
   0x5   : > { %v265_v0 = vld [vmem:[%s961_s1] sm:$0xff] (!%p188_p2)  ;;  %vm286_vm0 = vcmask (!%p188_p2), 1043456   ;;  %p214_p3 = scmp.lt.s32.totalorder (!%p188_p2), %s659_s19, 1  ;;  %v793_v3 = vmov (!%p188_p2), 0   ;;  %v740_v6 = vld [vmem:[%s963_s3 + $0x14] ss:$8 sps:$4 sm:$0xff] (!%p188_p2)  }
   0x6   : > { %191 = sbr.rel (%p188_p2) target bundleno = 492 (0x1ec), region = 40  ;;  %v668_v1 = vcombine.high (!%p188_p2), %v265_v0, %v265_v0  ;;  %v667_v2 = vcombine.low (!%p188_p2), %v265_v0, %v265_v0  ;;  %325 = vmatprep.mubr.bf16.mxu0 (!%p188_p2), %v793_v3  ;;  %v737_v4 = vld [vmem:[%s963_s3 + $0x4] ss:$8 sps:$4 sm:$0xff] (!%p188_p2)   ;;  %v739_v5 = vld [vmem:[%s963_s3] ss:$8 sps:$4 sm:$0xff] (!%p188_p2)   ;;  %vm240_vm1 = vcmask (!%p188_p2), 64512  }
   0x7   : > { %542 = vmatprep.subr.bf16.mxu1 (!%p188_p2), %v737_v4  ;;  %v742_v8 = vld [vmem:[%s963_s3 + $0x10] ss:$8 sps:$4 sm:$0xff] (!%p188_p2)   ;;  %v743_v9 = vld [vmem:[%s963_s3 + $0x24] ss:$8 sps:$4 sm:$0xff] (!%p188_p2)   ;;  %v745_v17 = vld [vmem:[%s963_s3 + $0x20] ss:$8 sps:$4 sm:$0xff] (!%p188_p2)  }
   0x8   : > { %669 = vmatprep.subr.msk.bf16.mxu0 (!%p188_p2), %vm286_vm0, %v668_v1  ;;  %v288_v7 = vsel (!%p188_p2), %vm286_vm0, %v667_v2, 0  ;;  %543 = vmatpush1.bf16.msra.mxu1 (!%p188_p2), %v739_v5  ;;  %v746_v18 = vld [vmem:[%s963_s3 + $0x34] ss:$8 sps:$4 sm:$0xff] (!%p188_p2)   ;;  %v748_v28 = vld [vmem:[%s963_s3 + $0x30] ss:$8 sps:$4 sm:$0xff] (!%p188_p2)  }
   0x9   : > { %294 = vmatpush1.bf16.msra.mxu0 (!%p188_p2), %v288_v7  ;;  %544 = vmatprep.subr.bf16.mxu1 (!%p188_p2), %v740_v6  ;;  %v749_v31 = vld [vmem:[%s963_s3 + $0x44] ss:$8 sps:$4 sm:$0xff] (!%p188_p2)   ;;  %v751_v36 = vld [vmem:[%s963_s3 + $0x40] ss:$8 sps:$4 sm:$0xff] (!%p188_p2)   ;;  %v752_v38 = vld [vmem:[%s963_s3 + $0x54] ss:$8 sps:$4 sm:$0xff] (!%p188_p2)  }
   0xa   : > { %v754_v42 = vld [vmem:[%s963_s3 + $0x50] ss:$8 sps:$4 sm:$0xff] (!%p188_p2)   ;;  %v755_v43 = vld [vmem:[%s963_s3 + $0x64] ss:$8 sps:$4 sm:$0xff] (!%p188_p2)   ;;  %v757_v46 = vld [vmem:[%s963_s3 + $0x60] ss:$8 sps:$4 sm:$0xff] (!%p188_p2)  }
   0xb   : > { %v758_v47 = vld [vmem:[%s963_s3 + $0x74] ss:$8 sps:$4 sm:$0xff] (!%p188_p2)   ;;  %v760_v50 = vld [vmem:[%s963_s3 + $0x70] ss:$8 sps:$4 sm:$0xff] (!%p188_p2)   ;;  %v761_v51 = vld [vmem:[%s963_s3 + $0x84] ss:$8 sps:$4 sm:$0xff] (!%p188_p2)  }
   0xc   : > { %545 = vmatpush1.bf16.msra.mxu1 (!%p188_p2), %v742_v8  ;;  %v763_v54 = vld [vmem:[%s963_s3 + $0x80] ss:$8 sps:$4 sm:$0xff] (!%p188_p2)   ;;  %v764_v55 = vld [vmem:[%s963_s3 + $0x94] ss:$8 sps:$4 sm:$0xff] (!%p188_p2)   ;;  %v766_v58 = vld [vmem:[%s963_s3 + $0x90] ss:$8 sps:$4 sm:$0xff] (!%p188_p2)   ;;  %v273_v8 = vlaneseq (!%p188_p2) }
   0xd   : > { %s967_s19 = smov (!%p214_p3, %s659_s19), 1  ;;  %546 = vmatprep.subr.bf16.mxu1 %v743_v9  ;;  %v767_v59 = vld [vmem:[%s963_s3 + $0xa4] ss:$8 sps:$4 sm:$0xff]   ;;  %v769_v61 = vld [vmem:[%s963_s3 + $0xa0] ss:$8 sps:$4 sm:$0xff]  }
   0xe   : > { %s705_s28 = sshll.u32 %s967_s19, 5  ;;  %v770_v62 = vld [vmem:[%s963_s3 + $0xb4] ss:$8 sps:$4 sm:$0xff]   ;;  %v772_v63 = vld [vmem:[%s963_s3 + $0xb0] ss:$8 sps:$4 sm:$0xff]   ;;  %v274_v9 = vshrl.u32 %v273_v8, 7 }
   0xf   : > { %s218_s8 = scalar_lea.vmem %s960_s0, %s705_s28  ;;  %v773_v0 = vld [vmem:[%s963_s3 + $0xc4] ss:$8 sps:$4 sm:$0xff]   ;;  %v775_v1 = vld [vmem:[%s963_s3 + $0xc0] ss:$8 sps:$4 sm:$0xff]   ;;  %v776_v2 = vld [vmem:[%s963_s3 + $0xd4] ss:$8 sps:$4 sm:$0xff]  }
  0x10   : > { %v707_v10 = vld [vmem:[%s218_s8] sm:$0xff]   ;;  %v722_v11 = vld [vmem:[%s218_s8 + $0x8] sm:$0xff]   ;;  %v723_v12 = vld [vmem:[%s218_s8 + $0x10] sm:$0xff]   ;;  %547 = vmatpush1.bf16.msra.mxu1 %v745_v17  ;;  %s666_s25 = sshll.u32 %s967_s19, 1  ;;  %vm603_vm2 = vcmp.lt.s32.totalorder %v273_v8, 256 }
  0x11   : > { %v708_v13 = vunpack.c.l.bf16 %v707_v10  ;;  %v709_v14 = vunpack.c.h.bf16 %v707_v10  ;;  %v712_v15 = vunpack.c.l.bf16 %v722_v11  ;;  %v713_v16 = vunpack.c.h.bf16 %v722_v11  ;;  %v724_v23 = vld [vmem:[%s218_s8 + $0x18] sm:$0xff]   ;;  %548 = vmatprep.subr.bf16.mxu1 %v746_v18  ;;  %v779_v4 = vld [vmem:[%s963_s3 + $0xe4] ss:$8 sps:$4 sm:$0xff]   ;;  %v781_v5 = vld [vmem:[%s963_s3 + $0xe0] ss:$8 sps:$4 sm:$0xff]   ;;  %s222_s28 = scalar_lea.vmem %s965_s5, %s666_s25 }
  0x12   : > { %v716_v19 = vunpack.c.l.bf16 %v723_v12  ;;  %v717_v25 = vunpack.c.h.bf16 %v723_v12  ;;  %v720_v29 = vunpack.c.l.bf16 %v724_v23  ;;  %v721_v33 = vunpack.c.h.bf16 %v724_v23  ;;  %v778_v3 = vld [vmem:[%s963_s3 + $0xd0] ss:$8 sps:$4 sm:$0xff]   ;;  %v782_v6 = vld [vmem:[%s963_s3 + $0xf4] ss:$8 sps:$4 sm:$0xff]   ;;  %v266_v11 = vld [vmem:[%s962_s2] sm:$0x3] }
  0x13   : > { %v241_v20 = vsel %vm240_vm1, %v708_v13, 0.0  ;;  %v242_v21 = vsel %vm240_vm1, %v709_v14, 0.0  ;;  %v244_v22 = vsel %vm240_vm1, %v712_v15, 0.0  ;;  %v246_v26 = vsel %vm240_vm1, %v713_v16, 0.0  ;;  %v784_v7 = vld [vmem:[%s963_s3 + $0xf0] ss:$8 sps:$4 sm:$0xff]  }
  0x14   : > { %v243_v24 = vadd.f32 %v242_v21, %v241_v20  ;;  %v248_v30 = vsel %vm240_vm1, %v716_v19, 0.0  ;;  %v250_v34 = vsel %vm240_vm1, %v717_v25, 0.0  ;;  %549 = vmatpush1.bf16.msra.mxu1 %v748_v28  ;;  %v252_v37 = vsel %vm240_vm1, %v720_v29, 0.0  ;;  %v370_v25 = vld [vmem:[%s964_s4] sm:$0x3] }
  0x15   : > { %550 = vmatprep.subr.bf16.mxu1 %v749_v31  ;;  %v254_v40 = vsel %vm240_vm1, %v721_v33, 0.0  ;;  %v275_v10 = vsub.s32 0, %v274_v9  ;;  %v279_v12 = vsub.s32 1, %v274_v9 }
  0x16   : > { %v245_v27 = vadd.f32 %v244_v22, %v243_v24 }
  0x17   : > { %v276_v13 = vrot.slane %v266_v11, %v275_v10  ;;  %v280_v14 = vrot.slane %v266_v11, %v279_v12  ;;  %v535_v28 = vrot.slane %v370_v25, %v275_v10  ;;  %v539_v29 = vrot.slane %v370_v25, %v279_v12 }
  0x18   : > { %v247_v32 = vadd.f32 %v246_v26, %v245_v27  ;;  %551 = vmatpush1.bf16.msra.mxu1 %v751_v36  ;;  %v794_v26 = vmov 1966171168  }
  0x19   : > { %552 = vmatprep.subr.bf16.mxu1 %v752_v38  ;;  %v587_v27 = vunpack.c.l.s4 %v794_v26 }
  0x1a   : > { %v249_v35 = vadd.f32 %v248_v30, %v247_v32 }
  0x1b   : > { %v588_v30 = vunpack.c.0.s8 %v587_v27 }
  0x1c   : > { %v251_v39 = vadd.f32 %v250_v34, %v249_v35  ;;  %553 = vmatpush1.bf16.msra.mxu1 %v754_v42 }
  0x1d   : > { %554 = vmatprep.subr.bf16.mxu1 %v755_v43  ;;  %v591_v35 = vsub.s32 %v588_v30, %v274_v9 }
  0x1e   : > { %v253_v41 = vadd.f32 %v252_v37, %v251_v39 }
  0x20   : > { %v255_v44 = vadd.f32 %v254_v40, %v253_v41  ;;  %555 = vmatpush1.bf16.msra.mxu1 %v757_v46 }
  0x21   : > { %556 = vmatprep.subr.bf16.mxu1 %v758_v47 }
  0x22   : > { %v256_v45 = vrot.slane %v255_v44, 4 }
  0x24   : > { %v257_v48 = vadd.f32 %v256_v45, %v255_v44  ;;  %557 = vmatpush1.bf16.msra.mxu1 %v760_v50 }
  0x25   : > { %558 = vmatprep.subr.bf16.mxu1 %v761_v51 }
  0x26   : > { %v258_v49 = vrot.slane %v257_v48, 2 }
  0x28   : > { %v259_v52 = vadd.f32 %v258_v49, %v257_v48  ;;  %559 = vmatpush1.bf16.msra.mxu1 %v763_v54 }
  0x29   : > { %560 = vmatprep.subr.bf16.mxu1 %v764_v55 }
  0x2a   : > { %v260_v53 = vrot.slane %v259_v52, 1 }
  0x2c   : > { %v261_v56 = vadd.f32 %v260_v53, %v259_v52  ;;  %561 = vmatpush1.bf16.msra.mxu1 %v766_v58 }
  0x2d   : > { %562 = vmatprep.subr.bf16.mxu1 %v767_v59 }
  0x2e   : > { %v263_v57 = vmul.f32 0.015625, %v261_v56 }
  0x30   : > { %v264_v60 = vpack.c.bf16 %v263_v57, %v263_v57  ;;  %563 = vmatpush1.bf16.msra.mxu1 %v769_v61 }
  0x31   : > { %564 = vmatprep.subr.bf16.mxu1 %v770_v62 }
  0x32   : > { %670 = vmatmul.mubr.msk.bf16.vlgmr.msra.gmra.mrb[0].mxu0 %vm240_vm1, %v264_v60 }
  0x34   : > { %565 = vmatpush1.bf16.msra.mxu1 %v772_v63 }
  0x35   : > { %566 = vmatprep.subr.bf16.mxu1 %v773_v0 }
  0x38   : > { %567 = vmatpush1.bf16.msra.mxu1 %v775_v1 }
  0x39   : > { %568 = vmatprep.subr.bf16.mxu1 %v776_v2 }
  0x3c   : > { %569 = vmatpush1.bf16.msra.mxu1 %v778_v3 }
  0x3d   : > { %570 = vmatprep.subr.bf16.mxu1 %v779_v4 }
  0x40   : > { %571 = vmatpush1.bf16.msra.mxu1 %v781_v5 }
  0x41   : > { %572 = vmatprep.subr.bf16.mxu1 %v782_v6 }
  0x44   : > { %573 = vmatpush1.bf16.msra.mxu1 %v784_v7 }
 0x105   : > { %v327_v15 = vpop.f32.mrb[0].mxu0 }
 0x106   : > { %v328_v16 = vadd.f32 %v327_v15, %v276_v13  ;;  %v329_v17 = vpop.f32.mrb[1].mxu0 }
 0x107   : > { %v330_v18 = vadd.f32 %v329_v17, %v280_v14  ;;  %v331_v19 = vpop.f32.mrb[2].mxu0 }
 0x108   : > { %v334_v20 = vmax.f32 %v328_v16, 0.0  ;;  %v332_v21 = vpop.f32.mrb[3].mxu0 }
 0x109   : > { %v335_v22 = vmax.f32 %v330_v18, 0.0 }
 0x10a   : > { %v336_v24 = vpack.c.bf16 %v334_v20, %v334_v20 }
 0x10b   : > { %v337_v23 = vpack.c.bf16 %v335_v22, %v335_v22 }
 0x10d   : > { %574 = vmatprep.mubr.bf16.mxu1 %v337_v23 }
 0x10e   : > { %575 = vmatmul.mubr.bf16.vlgmr.msra.gmra.mrb[0].mxu1 %v336_v24 }
 0x1e1   : > { %v576_v31 = vpop.f32.mrb[0].mxu1 }
 0x1e2   : > { %v577_v32 = vadd.f32 %v576_v31, %v535_v28  ;;  %v578_v33 = vpop.f32.mrb[1].mxu1 }
 0x1e3   : > { %v579_v34 = vadd.f32 %v578_v33, %v539_v29  ;;  %v580_v36 = vpop.f32.mrb[2].mxu1 }
 0x1e4   : > { %v581_v37 = vpop.f32.mrb[3].mxu1 }
 0x1e5   : > { %v585_v38 = vcombine.low %v577_v32, %v579_v34 }
 0x1e7   : > { %v592_v39 = vrot.slane %v585_v38, %v591_v35 }
 0x1e9   : > { %v599_v40 = vrot.slane %v592_v39, %v591_v35 }
 0x1eb   : > { %605 = vst.msk [vmem:[%s222_s28] sm:$0x3] %vm603_vm2, %v599_v40 }
 0x1ec PF: > { %s15_s18 = sadd.s32 1, %s791_s18  }
 0x1ed   : > { %p12_p4 = scmp.ge.s32.totalorder %s15_s18, 4  }
 0x1ef   :  { %14 = sbr.rel (!%p12_p4) target bundleno = 1 (0x1), region = 70 }

// kernel: head_forward.10
= control target key start
LH: loop header
LB: loop body
LE: loop exit
PB: predicated region body
PF: predicated region fallthrough
CT: control target
= control target key end

     0   :  { %vm170_vm0 = vcmask 1043456   ;;  %v645_v1 = vmov 0   ;;  %vm145_vm1 = vcmask 64512   ;;  %v391_v13 = vlaneseq  ;;  %s788_s1 = inlined_call_operand.vmem [shape: bf16[8,256], index: 1, kind: input, shape index: {}]   ;;  %s789_s0 = inlined_call_operand.vmem [shape: bf16[128,8], index: 0, kind: input, shape index: {}]   ;;  %s790_s2 = inlined_call_operand.vmem [shape: f32[1,256], index: 2, kind: input, shape index: {}]   ;;  %s791_s3 = inlined_call_operand.vmem [shape: bf16[128,256], index: 3, kind: output, shape index: {}]  }
   0x1   :  { %v99_v0 = vld [vmem:[%s788_s1] sm:$0xff]  ;;  %209 = vmatprep.mubr.bf16.mxu0 %v645_v1  ;;  %249 = vmatprep.mubr.bf16.mxu1 %v645_v1  ;;  %v639_v7 = vld [vmem:[%s789_s0 + $0x8] sm:$0xff]   ;;  %v641_v9 = vld [vmem:[%s789_s0 + $0x10] sm:$0xff]  }
   0x2   :  { %v590_v2 = vcombine.high %v99_v0, %v99_v0  ;;  %v589_v3 = vcombine.low %v99_v0, %v99_v0  ;;  %v637_v4 = vld [vmem:[%s789_s0] sm:$0xff]   ;;  %v640_v8 = vld [vmem:[%s789_s0 + $0x28] sm:$0xff]   ;;  %v642_v10 = vld [vmem:[%s789_s0 + $0x30] sm:$0xff]   ;;  %v392_v14 = vshrl.u32 %v391_v13, 7 }
   0x3   :  { %v638_v6 = vld [vmem:[%s789_s0 + $0x20] sm:$0xff]   ;;  %v643_v11 = vld [vmem:[%s789_s0 + $0x18] sm:$0xff]  }
   0x4   :  { %591 = vmatprep.subr.msk.bf16.mxu0 %vm170_vm0, %v590_v2  ;;  %632 = vmatprep.subr.msk.bf16.mxu1 %vm170_vm0, %v590_v2  ;;  %v172_v5 = vsel %vm170_vm0, %v589_v3, 0  ;;  %v644_v12 = vld [vmem:[%s789_s0 + $0x38] sm:$0xff]   ;;  %v393_v15 = vsub.s32 0, %v392_v14  ;;  %v389_v16 = vld [vmem:[%s790_s2] sm:$0x3]  ;;  %v397_v17 = vsub.s32 1, %v392_v14 }
   0x5   :  { %178 = vmatpush1.bf16.msra.mxu0 %v172_v5  ;;  %633 = vmatpush1.bf16.msra.mxu1 %v172_v5 }
   0x6   :  { %v704_v18 = vrot.slane %v389_v16, %v393_v15  ;;  %v706_v19 = vrot.slane %v389_v16, %v397_v17 }
   0x8   :  { %592 = vmatmul.mubr.msk.bf16.vlgmr.msra.gmra.mrb[0].mxu0 %vm145_vm1, %v637_v4  ;;  %596 = vmatmul.mubr.msk.bf16.vlgmr.msra.gmra.mrb[0].mxu1 %vm145_vm1, %v638_v6 }
   0x9   :  { %219 = vmatprep.mubr.bf16.mxu0 %v645_v1  ;;  %259 = vmatprep.mubr.bf16.mxu1 %v645_v1 }
  0x10   :  { %593 = vmatmul.mubr.msk.bf16.gmra.mrb[4].mxu0 %vm145_vm1, %v639_v7  ;;  %597 = vmatmul.mubr.msk.bf16.gmra.mrb[4].mxu1 %vm145_vm1, %v640_v8 }
  0x11   :  { %229 = vmatprep.mubr.bf16.mxu0 %v645_v1  ;;  %269 = vmatprep.mubr.bf16.mxu1 %v645_v1 }
  0x18   :  { %594 = vmatmul.mubr.msk.bf16.gmra.mrb[8].mxu0 %vm145_vm1, %v641_v9  ;;  %598 = vmatmul.mubr.msk.bf16.gmra.mrb[8].mxu1 %vm145_vm1, %v642_v10 }
  0x19   :  { %239 = vmatprep.mubr.bf16.mxu0 %v645_v1  ;;  %279 = vmatprep.mubr.bf16.mxu1 %v645_v1 }
  0x20   :  { %595 = vmatmul.mubr.msk.bf16.gmra.mrb[12].mxu0 %vm145_vm1, %v643_v11  ;;  %599 = vmatmul.mubr.msk.bf16.gmra.mrb[12].mxu1 %vm145_vm1, %v644_v12 }
  0xdb   :  { %v211_v20 = vpop.f32.mrb[0].mxu0  ;;  %v251_v21 = vpop.f32.mrb[0].mxu1 }
  0xdc   :  { %v401_v22 = vadd.f32 %v704_v18, %v211_v20  ;;  %v417_v23 = vadd.f32 %v704_v18, %v251_v21  ;;  %v213_v24 = vpop.f32.mrb[1].mxu0  ;;  %v253_v25 = vpop.f32.mrb[1].mxu1 }
  0xdd   :  { %v402_v26 = vadd.f32 %v706_v19, %v213_v24  ;;  %v418_v27 = vadd.f32 %v706_v19, %v253_v25  ;;  %v215_v28 = vpop.f32.mrb[2].mxu0  ;;  %v255_v29 = vpop.f32.mrb[2].mxu1 }
  0xde   :  { %v433_v30 = vmax.f32 %v401_v22, 0.0  ;;  %v449_v31 = vmax.f32 %v417_v23, 0.0  ;;  %v403_v32 = vadd.f32 %v704_v18, %v215_v28  ;;  %v419_v33 = vadd.f32 %v704_v18, %v255_v29  ;;  %v217_v34 = vpop.f32.mrb[3].mxu0  ;;  %v257_v35 = vpop.f32.mrb[3].mxu1 }
  0xdf   :  { %v434_v36 = vmax.f32 %v402_v26, 0.0  ;;  %v450_v37 = vmax.f32 %v418_v27, 0.0  ;;  %v404_v38 = vadd.f32 %v706_v19, %v217_v34  ;;  %v420_v39 = vadd.f32 %v706_v19, %v257_v35 }
  0xe0   :  { %v435_v40 = vmax.f32 %v403_v32, 0.0  ;;  %v451_v41 = vmax.f32 %v419_v33, 0.0 }
  0xe1   :  { %v616_v42 = vpack.c.bf16 %v434_v36, %v433_v30  ;;  %v624_v43 = vpack.c.bf16 %v450_v37, %v449_v31  ;;  %v436_v44 = vmax.f32 %v404_v38, 0.0  ;;  %v452_v45 = vmax.f32 %v420_v39, 0.0 }
  0xe3   :  { %561 = vst [vmem:[%s791_s3] sm:$0xff] %v616_v42  ;;  %569 = vst [vmem:[%s791_s3 + $0x40] sm:$0xff] %v624_v43  ;;  %v617_v46 = vpack.c.bf16 %v436_v44, %v435_v40  ;;  %v625_v47 = vpack.c.bf16 %v452_v45, %v451_v41  ;;  %v221_v48 = vpop.f32.mrb[4].mxu0  ;;  %v261_v49 = vpop.f32.mrb[4].mxu1 }
  0xe4   :  { %v405_v50 = vadd.f32 %v704_v18, %v221_v48  ;;  %v421_v51 = vadd.f32 %v704_v18, %v261_v49  ;;  %v223_v52 = vpop.f32.mrb[5].mxu0  ;;  %v263_v53 = vpop.f32.mrb[5].mxu1 }
  0xe5   :  { %562 = vst [vmem:[%s791_s3 + $0x8] sm:$0xff] %v617_v46  ;;  %570 = vst [vmem:[%s791_s3 + $0x48] sm:$0xff] %v625_v47  ;;  %v406_v54 = vadd.f32 %v706_v19, %v223_v52  ;;  %v422_v55 = vadd.f32 %v706_v19, %v263_v53  ;;  %v225_v56 = vpop.f32.mrb[6].mxu0  ;;  %v265_v57 = vpop.f32.mrb[6].mxu1 }
  0xe6   :  { %v437_v58 = vmax.f32 %v405_v50, 0.0  ;;  %v453_v59 = vmax.f32 %v421_v51, 0.0  ;;  %v407_v60 = vadd.f32 %v704_v18, %v225_v56  ;;  %v423_v61 = vadd.f32 %v704_v18, %v265_v57  ;;  %v227_v62 = vpop.f32.mrb[7].mxu0  ;;  %v267_v63 = vpop.f32.mrb[7].mxu1 }
  0xe7   :  { %v438_v0 = vmax.f32 %v406_v54, 0.0  ;;  %v454_v1 = vmax.f32 %v422_v55, 0.0  ;;  %v408_v2 = vadd.f32 %v706_v19, %v227_v62  ;;  %v424_v3 = vadd.f32 %v706_v19, %v267_v63 }
  0xe8   :  { %v439_v4 = vmax.f32 %v407_v60, 0.0  ;;  %v455_v5 = vmax.f32 %v423_v61, 0.0 }
  0xe9   :  { %v618_v6 = vpack.c.bf16 %v438_v0, %v437_v58  ;;  %v626_v7 = vpack.c.bf16 %v454_v1, %v453_v59  ;;  %v440_v8 = vmax.f32 %v408_v2, 0.0  ;;  %v456_v9 = vmax.f32 %v424_v3, 0.0 }
  0xeb   :  { %563 = vst [vmem:[%s791_s3 + $0x10] sm:$0xff] %v618_v6  ;;  %571 = vst [vmem:[%s791_s3 + $0x50] sm:$0xff] %v626_v7  ;;  %v619_v10 = vpack.c.bf16 %v440_v8, %v439_v4  ;;  %v627_v11 = vpack.c.bf16 %v456_v9, %v455_v5  ;;  %v231_v12 = vpop.f32.mrb[8].mxu0  ;;  %v271_v13 = vpop.f32.mrb[8].mxu1 }
  0xec   :  { %v409_v14 = vadd.f32 %v704_v18, %v231_v12  ;;  %v425_v15 = vadd.f32 %v704_v18, %v271_v13  ;;  %v233_v16 = vpop.f32.mrb[9].mxu0  ;;  %v273_v17 = vpop.f32.mrb[9].mxu1 }
  0xed   :  { %564 = vst [vmem:[%s791_s3 + $0x18] sm:$0xff] %v619_v10  ;;  %572 = vst [vmem:[%s791_s3 + $0x58] sm:$0xff] %v627_v11  ;;  %v410_v20 = vadd.f32 %v706_v19, %v233_v16  ;;  %v426_v21 = vadd.f32 %v706_v19, %v273_v17  ;;  %v235_v22 = vpop.f32.mrb[10].mxu0  ;;  %v275_v23 = vpop.f32.mrb[10].mxu1 }
  0xee   :  { %v441_v24 = vmax.f32 %v409_v14, 0.0  ;;  %v457_v25 = vmax.f32 %v425_v15, 0.0  ;;  %v411_v26 = vadd.f32 %v704_v18, %v235_v22  ;;  %v427_v27 = vadd.f32 %v704_v18, %v275_v23  ;;  %v237_v28 = vpop.f32.mrb[11].mxu0  ;;  %v277_v29 = vpop.f32.mrb[11].mxu1 }
  0xef   :  { %v442_v30 = vmax.f32 %v410_v20, 0.0  ;;  %v458_v31 = vmax.f32 %v426_v21, 0.0  ;;  %v412_v32 = vadd.f32 %v706_v19, %v237_v28  ;;  %v428_v33 = vadd.f32 %v706_v19, %v277_v29 }
  0xf0   :  { %v443_v34 = vmax.f32 %v411_v26, 0.0  ;;  %v459_v35 = vmax.f32 %v427_v27, 0.0 }
  0xf1   :  { %v620_v36 = vpack.c.bf16 %v442_v30, %v441_v24  ;;  %v628_v37 = vpack.c.bf16 %v458_v31, %v457_v25  ;;  %v444_v38 = vmax.f32 %v412_v32, 0.0  ;;  %v460_v39 = vmax.f32 %v428_v33, 0.0 }
  0xf3   :  { %565 = vst [vmem:[%s791_s3 + $0x20] sm:$0xff] %v620_v36  ;;  %573 = vst [vmem:[%s791_s3 + $0x60] sm:$0xff] %v628_v37  ;;  %v621_v40 = vpack.c.bf16 %v444_v38, %v443_v34  ;;  %v629_v41 = vpack.c.bf16 %v460_v39, %v459_v35  ;;  %v241_v42 = vpop.f32.mrb[12].mxu0  ;;  %v281_v43 = vpop.f32.mrb[12].mxu1 }
  0xf4   :  { %v413_v44 = vadd.f32 %v704_v18, %v241_v42  ;;  %v429_v45 = vadd.f32 %v704_v18, %v281_v43  ;;  %v243_v46 = vpop.f32.mrb[13].mxu0  ;;  %v283_v47 = vpop.f32.mrb[13].mxu1 }
  0xf5   :  { %566 = vst [vmem:[%s791_s3 + $0x28] sm:$0xff] %v621_v40  ;;  %574 = vst [vmem:[%s791_s3 + $0x68] sm:$0xff] %v629_v41  ;;  %v414_v48 = vadd.f32 %v706_v19, %v243_v46  ;;  %v430_v49 = vadd.f32 %v706_v19, %v283_v47  ;;  %v245_v50 = vpop.f32.mrb[14].mxu0  ;;  %v285_v51 = vpop.f32.mrb[14].mxu1 }
  0xf6   :  { %v445_v52 = vmax.f32 %v413_v44, 0.0  ;;  %v461_v53 = vmax.f32 %v429_v45, 0.0  ;;  %v415_v54 = vadd.f32 %v704_v18, %v245_v50  ;;  %v431_v55 = vadd.f32 %v704_v18, %v285_v51  ;;  %v247_v56 = vpop.f32.mrb[15].mxu0  ;;  %v287_v57 = vpop.f32.mrb[15].mxu1 }
  0xf7   :  { %v446_v58 = vmax.f32 %v414_v48, 0.0  ;;  %v462_v59 = vmax.f32 %v430_v49, 0.0  ;;  %v416_v60 = vadd.f32 %v706_v19, %v247_v56  ;;  %v432_v61 = vadd.f32 %v706_v19, %v287_v57 }
  0xf8   :  { %v447_v62 = vmax.f32 %v415_v54, 0.0  ;;  %v463_v63 = vmax.f32 %v431_v55, 0.0 }
  0xf9   :  { %v622_v0 = vpack.c.bf16 %v446_v58, %v445_v52  ;;  %v630_v1 = vpack.c.bf16 %v462_v59, %v461_v53  ;;  %v448_v2 = vmax.f32 %v416_v60, 0.0  ;;  %v464_v3 = vmax.f32 %v432_v61, 0.0 }
  0xfb   :  { %567 = vst [vmem:[%s791_s3 + $0x30] sm:$0xff] %v622_v0  ;;  %575 = vst [vmem:[%s791_s3 + $0x70] sm:$0xff] %v630_v1  ;;  %v623_v18 = vpack.c.bf16 %v448_v2, %v447_v62  ;;  %v631_v4 = vpack.c.bf16 %v464_v3, %v463_v63 }
  0xfd   :  { %568 = vst [vmem:[%s791_s3 + $0x38] sm:$0xff] %v623_v18  ;;  %576 = vst [vmem:[%s791_s3 + $0x78] sm:$0xff] %v631_v4 }

// kernel: head_forward.16
= control target key start
LH: loop header
LB: loop body
LE: loop exit
PB: predicated region body
PF: predicated region fallthrough
CT: control target
= control target key end

     0   :  { %s920_s0 = inlined_call_operand.vmem [shape: s32[16], index: 0, kind: input, shape index: {}]   ;;  %s921_s2 = inlined_call_operand.vmem [shape: bf16[2,8,8,256], index: 2, kind: input, shape index: {}, may-alias: {2,3}]   ;;  %s922_s3 = inlined_call_operand.vmem [shape: bf16[2,8,8,256], index: 3, kind: input, shape index: {}, may-alias: {2,3}]   ;;  %s923_s4 = inlined_call_operand.vmem [shape: f32[16,16,8], index: 4, kind: input, shape index: {}]   ;;  %s924_s5 = inlined_call_operand.vmem [shape: f32[16,16,8], index: 5, kind: input, shape index: {}]   ;;  %s925_s6 = inlined_call_operand.vmem [shape: bf16[2,16,16,256], index: 6, kind: output, shape index: {}]   ;;  %s926_s1 = inlined_call_operand.vmem [shape: s32[16], index: 1, kind: input, shape index: {}]  }
   0x1   :  { %s11_s23 = sshll.u32 %s920_s0, 4  ;;  %s15_s26 = sshll.u32 %s926_s1, 4  ;;  %s12_s23 = int_to_ptr.vmem [resolvable:$true] %s11_s23  ;;  %s16_s26 = int_to_ptr.vmem [resolvable:$true] %s15_s26 }
   0x2   :  { %s742_s27 = scalar_lea.vmem %s12_s23, 16  ;;  %p747_p1 = scmp.lt.s32.totalorder %s12_s23, %s12_s23 }
   0x3   :  { %p743_p0 = scmp.ne.s32.totalorder %s12_s23, %s742_s27  ;;  %p748_p2 = scmp.lt.s32.totalorder %s742_s27, %s742_s27 }
   0x5   :  { %p749_p3 = por %p748_p2, %p747_p1 }
   0x7   :  { %p750_p4 = pnand %p749_p3, %p743_p0 }
   0x9   :  { %753 = shalt.err (!%p750_p4)  }
   0xa   :  { %s808_s28 = smov [#allocation3]   ;;  %s754_s29 = scalar_lea.vmem %s16_s26, 16 }
   0xb   :  { %14 = dma.vmem_to_smem %s12_s23, 16, %s808_s28, [#allocation2] }
   0xc   :  { %p755_p5 = scmp.ne.s32.totalorder %s16_s26, %s754_s29  ;;  %p759_p6 = scmp.lt.s32.totalorder %s16_s26, %s16_s26 }
   0xd   :  { %p760_p7 = scmp.lt.s32.totalorder %s754_s29, %s754_s29 }
   0xf   :  { %p761_p8 = por %p760_p7, %p759_p6 }
  0x11   :  { %p762_p9 = pnand %p761_p8, %p755_p5 }
  0x13   :  { %765 = shalt.err (!%p762_p9)  }
  0x14   :  { %s809_s0 = smov [#allocation4]  }
  0x15   :  { %18 = dma.vmem_to_smem %s16_s26, 16, %s809_s0, [#allocation2] }
  0x16   :  { %786 = dma.done.wait [#allocation2], 32 }
  0x17   :  { %787 = vsyncadd [#allocation2], 4294967264 }
  0x18   :  { %20 = sfence }
  0x19   :  { %s852_s1 = smov 0   ;;  %s854_s30 = smov 0  }
  0x1a   :  { %s856_s7 = smov 0   ;;  %s858_s8 = smov 0  }
  0x1b   :  { %s860_s9 = smov 0  }
  0x1c LB: > { %s35_s10 = sadd.s32 1, %s798_s7  ;;  %s38_s11 = sadd.s32 1, %s802_s8  ;;  %s806_s9 = sphi %s860_s9, %s26_s9   ;;  %s802_s8 = sphi %s858_s8, %s934_s8   ;;  %s798_s7 = sphi %s856_s7, %s933_s7   ;;  %s794_s30 = sphi %s854_s30, %s932_s30   ;;  %s790_s1 = sphi %s852_s1, %s931_s1  }
  0x1d   : > { %p36_p10 = scmp.ge.s32.totalorder %s35_s10, 16  ;;  %p669_p11 = scmp.ge.s32.totalorder %s806_s9, 1 }
  0x1e   : > { %p238_p12 = scmp.lt.s32.totalorder %s806_s9, 33 }
  0x1f   : > { %s936_s10 = smov (%p36_p10, %s35_s10), 0  ;;  %s938_s11 = smov (!%p36_p10, %s38_s11), %s802_s8 }
  0x20   : > { %927 = sst [smem:[#allocation6_spill]] %s936_s10  ;;  %p239_p13 = pnand %p669_p11, %p238_p12 }
  0x21   : > { %p40_p0 = scmp.ge.s32.totalorder %s938_s11, 2  ;;  %p294_p1 = scmp.lt.s32.totalorder (!%p239_p13), %s794_s30, 1  ;;  %v810_v0 = vmov (!%p239_p13), 0.0   ;;  %vm344_vm0 = vcmask (!%p239_p13), 64512  }
  0x22   : > { %242 = sbr.rel (%p239_p13) target bundleno = 277 (0x115), region = 36  ;;  %s304_s12 = sld [smem:[#allocation4 + %s790_s1]] (!%p239_p13)  ;;  %415 = vmatprep.mubr.f32.mxu1 (!%p239_p13), %v810_v0  ;;  %498 = vmatprep.mubr.f32.mxu0 (!%p239_p13), %v810_v0 }
  0x23   : > { %s940_s11 = smov (%p40_p0, %s938_s11), 0  ;;  %s293_s13 = sld [smem:[#allocation3 + %s790_s1]] (!%p239_p13) }
  0x24   : > { %928 = sst [smem:[#allocation7_spill]] %s940_s11  ;;  %p315_p2 = scmp.lt.s32.totalorder (!%p239_p13), %s790_s1, 15 }
  0x28   : > { %p307_p3 = scmp.lt.s32.totalorder (!%p239_p13), %s304_s12, 7 }
  0x29   : > { %s942_s30 = smov (!%p294_p1, %s794_s30), 1  ;;  %s944_s1 = smov (!%p315_p2, %s790_s1), 15 }
  0x2a   : > { %s671_s14 = sshll.u32 %s942_s30, 4  ;;  %p296_p4 = scmp.lt.s32.totalorder %s293_s13, 7 }
  0x2b   : > { %s691_s15 = sshll.u32 %s944_s1, 4  ;;  %s946_s12 = smov (!%p307_p3, %s304_s12), 7 }
  0x2c   : > { %s948_s13 = smov (!%p296_p4, %s293_s13), 7  ;;  %s673_s16 = sshll.u32 %s946_s12, 1 }
  0x2d   : > { %s324_s19 = scalar_lea.vmem %s924_s5, %s691_s15  ;;  %s311_s20 = sadd.s32 %s673_s16, %s671_s14 }
  0x2e   : > { %s670_s21 = sshll.u32 %s948_s13, 1  ;;  %s675_s22 = sshll.u32 %s311_s20, 2  ;;  %v342_v7 = vld [vmem:[%s324_s19] sm:$0xff]  ;;  %v343_v9 = vld [vmem:[%s324_s19 + $0x8] sm:$0xff] }
  0x2f   : > { %s300_s23 = sadd.s32 %s671_s14, %s670_s21  ;;  %s313_s26 = scalar_lea.vmem %s922_s3, %s675_s22 }
  0x30   : > { %s672_s27 = sshll.u32 %s300_s23, 2  ;;  %v337_v1 = vld [vmem:[%s313_s26] sm:$0xff]  ;;  %s319_s10 = scalar_lea.vmem %s923_s4, %s691_s15 }
  0x31   : > { %s302_s0 = scalar_lea.vmem %s921_s2, %s672_s27  ;;  %v339_v2 = vunpack.c.h.bf16 %v337_v1  ;;  %v338_v4 = vunpack.c.l.bf16 %v337_v1  ;;  %v340_v8 = vld [vmem:[%s319_s10] sm:$0xff]  ;;  %v341_v10 = vld [vmem:[%s319_s10 + $0x8] sm:$0xff]  ;;  %s681_s11 = sshll.u32 %s942_s30, 6 }
  0x32   : > { %v334_v3 = vld [vmem:[%s302_s0] sm:$0xff]  ;;  %s680_s13 = sshll.u32 %s944_s1, 2 }
  0x33   : > { %v336_v5 = vunpack.c.h.bf16 %v334_v3  ;;  %v335_v6 = vunpack.c.l.bf16 %v334_v3  ;;  %351 = vmatprep.subr.mxu1 %v339_v2  ;;  %s331_s14 = sadd.s32 %s681_s11, %s680_s13 }
  0x34   : > { %352 = vmatpush1.msra.mxu1 %v338_v4  ;;  %s682_s15 = sshll.u32 %s331_s14, 2 }
  0x35   : > { %434 = vmatprep.subr.mxu0 %v336_v5  ;;  %683 = vmatmul.mubr.msk.f32.vlgmr.msra.gmra.mrb[0].mxu1 %vm344_vm0, %v342_v7  ;;  %s333_s18 = scalar_lea.vmem %s925_s6, %s682_s15 }
  0x36   : > { %435 = vmatpush1.msra.mxu0 %v335_v6  ;;  %421 = vmatprep.mubr.f32.mxu1 %v810_v0 }
  0x37   : > { %685 = vmatmul.mubr.msk.f32.vlgmr.msra.gmra.mrb[0].mxu0 %vm344_vm0, %v340_v8 }
  0x38   : > { %504 = vmatprep.mubr.f32.mxu0 %v810_v0 }
  0x39   : > { %684 = vmatmul.mubr.msk.f32.gmra.mrb[2].mxu1 %vm344_vm0, %v343_v9 }
  0x3b   : > { %686 = vmatmul.mubr.msk.f32.gmra.mrb[2].mxu0 %vm344_vm0, %v341_v10 }
 0x108   : > { %v417_v11 = vpop.f32.mrb[0].mxu1 }
 0x109   : > { %v419_v13 = vpop.f32.mrb[1].mxu1 }
 0x10a   : > { %v500_v12 = vpop.f32.mrb[0].mxu0 }
 0x10b   : > { %v501_v14 = vadd.f32 %v500_v12, %v417_v11  ;;  %v502_v15 = vpop.f32.mrb[1].mxu0 }
 0x10c   : > { %v503_v16 = vadd.f32 %v502_v15, %v419_v13  ;;  %v423_v17 = vpop.f32.mrb[2].mxu1 }
 0x10d   : > { %v425_v20 = vpop.f32.mrb[3].mxu1 }
 0x10e   : > { %v693_v18 = vpack.c.bf16 %v503_v16, %v501_v14  ;;  %v506_v19 = vpop.f32.mrb[2].mxu0 }
 0x10f   : > { %v507_v21 = vadd.f32 %v506_v19, %v423_v17  ;;  %v508_v22 = vpop.f32.mrb[3].mxu0 }
 0x110   : > { %523 = vst [vmem:[%s333_s18] sm:$0xff] %v693_v18  ;;  %v509_v23 = vadd.f32 %v508_v22, %v425_v20 }
 0x112   : > { %v694_v24 = vpack.c.bf16 %v509_v23, %v507_v21 }
 0x114   : > { %524 = vst [vmem:[%s333_s18 + $0x8] sm:$0xff] %v694_v24 }
 0x115 PF: > { %s26_s9 = sadd.s32 1, %s806_s9   ;;  %s929_s10 = sld [smem:[#allocation6_spill]] }
 0x116   : > { %p23_p5 = scmp.ge.s32.totalorder %s26_s9, 34   ;;  %s930_s19 = sld [smem:[#allocation7_spill]] }
 0x117   : > { %s931_s1 = smov %s798_s7  ;;  %s932_s30 = smov %s802_s8 }
 0x118   :  { %25 = sbr.rel (!%p23_p5) target bundleno = 28 (0x1c), region = 75 }
 0x11b   : > { %s933_s7 = smov %s929_s10 }
 0x11c   : > { %s934_s8 = smov %s930_s19 }

// kernel: head_forward.15
= control target key start
LH: loop header
LB: loop body
LE: loop exit
PB: predicated region body
PF: predicated region fallthrough
CT: control target
= control target key end

     0   :  { %s2654_s21 = smov 0   ;;  %s2656_s22 = smov 0   ;;  %s3168_s0 = inlined_call_operand.vmem [shape: bf16[2,64,256], index: 0, kind: input, shape index: {}]   ;;  %s3169_s1 = inlined_call_operand.vmem [shape: bf16[2,64,256], index: 1, kind: input, shape index: {}]   ;;  %s3170_s2 = inlined_call_operand.vmem [shape: bf16[2,64,256], index: 2, kind: input, shape index: {}]   ;;  %s3171_s3 = inlined_call_operand.vmem [shape: bf16[2,64,256], index: 3, kind: input, shape index: {}]   ;;  %s3172_s4 = inlined_call_operand.vmem [shape: bf16[4,256,256], index: 4, kind: input, shape index: {}]   ;;  %s3173_s5 = inlined_call_operand.vmem [shape: f32[2,1,256], index: 5, kind: input, shape index: {}]   ;;  %s3174_s6 = inlined_call_operand.vmem [shape: bf16[2,64,256], index: 6, kind: output, shape index: {}]  }
   0x1   :  { %s2658_s23 = smov 0  }
   0x2 LB: > { %s28_s24 = sadd.s32 1, %s2613_s22  ;;  %p1992_p0 = scmp.ge.s32.totalorder %s2617_s23, 1  ;;  %s2617_s23 = sphi %s2658_s23, %s16_s23   ;;  %s2613_s22 = sphi %s2656_s22, %s3176_s22   ;;  %s2609_s21 = sphi %s2654_s21, %s3175_s21  }
   0x3   : > { %p30_p1 = scmp.ge.s32.totalorder %s28_s24, 2  ;;  %p297_p2 = scmp.lt.s32.totalorder %s2617_s23, 3 }
   0x5   : > { %s3178_s24 = smov (%p30_p1, %s28_s24), 0  ;;  %p298_p3 = pnand %p1992_p0, %p297_p2 }
   0x6   : > { %v2355_v0 = vld [vmem:[%s3172_s4 + $0x104] ss:$8 sps:$4 sm:$0xff] (!%p298_p3)   ;;  %v2359_v2 = vld [vmem:[%s3172_s4 + $0x100] ss:$8 sps:$4 sm:$0xff] (!%p298_p3)   ;;  %v2361_v4 = vld [vmem:[%s3172_s4 + $0x114] ss:$8 sps:$4 sm:$0xff] (!%p298_p3)  }
   0x7   : > { %301 = sbr.rel (%p298_p3) target bundleno = 384 (0x180), region = 44  ;;  %v2357_v1 = vld [vmem:[%s3172_s4 + $0x204] ss:$8 sps:$4 sm:$0xff] (!%p298_p3)   ;;  %711 = vmatprep.subr.bf16.mxu1 (!%p298_p3), %v2355_v0  ;;  %v2360_v3 = vld [vmem:[%s3172_s4 + $0x200] ss:$8 sps:$4 sm:$0xff] (!%p298_p3)   ;;  %p372_p4 = scmp.lt.s32.totalorder (!%p298_p3), %s2609_s21, 1 }
   0x8   : > { %1298 = vmatprep.subr.bf16.mxu0 (!%p298_p3), %v2357_v1  ;;  %712 = vmatpush1.bf16.msra.mxu1 (!%p298_p3), %v2359_v2  ;;  %v2363_v5 = vld [vmem:[%s3172_s4 + $0x214] ss:$8 sps:$4 sm:$0xff] (!%p298_p3)   ;;  %v2365_v6 = vld [vmem:[%s3172_s4 + $0x110] ss:$8 sps:$4 sm:$0xff] (!%p298_p3)   ;;  %v2367_v8 = vld [vmem:[%s3172_s4 + $0x124] ss:$8 sps:$4 sm:$0xff] (!%p298_p3)  }
   0x9   : > { %1299 = vmatpush1.bf16.msra.mxu0 (!%p298_p3), %v2360_v3  ;;  %713 = vmatprep.subr.bf16.mxu1 (!%p298_p3), %v2361_v4  ;;  %v2366_v7 = vld [vmem:[%s3172_s4 + $0x210] ss:$8 sps:$4 sm:$0xff] (!%p298_p3)   ;;  %v2369_v9 = vld [vmem:[%s3172_s4 + $0x224] ss:$8 sps:$4 sm:$0xff] (!%p298_p3)   ;;  %v2371_v10 = vld [vmem:[%s3172_s4 + $0x120] ss:$8 sps:$4 sm:$0xff] (!%p298_p3)  }
   0xa   : > { %1300 = vmatprep.subr.bf16.mxu0 (!%p298_p3), %v2363_v5  ;;  %v2372_v11 = vld [vmem:[%s3172_s4 + $0x220] ss:$8 sps:$4 sm:$0xff] (!%p298_p3)   ;;  %v2373_v12 = vld [vmem:[%s3172_s4 + $0x134] ss:$8 sps:$4 sm:$0xff] (!%p298_p3)   ;;  %v2377_v14 = vld [vmem:[%s3172_s4 + $0x130] ss:$8 sps:$4 sm:$0xff] (!%p298_p3)  }
   0xb   : > { %v2375_v13 = vld [vmem:[%s3172_s4 + $0x234] ss:$8 sps:$4 sm:$0xff] (!%p298_p3)   ;;  %v2378_v15 = vld [vmem:[%s3172_s4 + $0x230] ss:$8 sps:$4 sm:$0xff] (!%p298_p3)   ;;  %v2379_v16 = vld [vmem:[%s3172_s4 + $0x144] ss:$8 sps:$4 sm:$0xff] (!%p298_p3)  }
   0xc   : > { %714 = vmatpush1.bf16.msra.mxu1 (!%p298_p3), %v2365_v6  ;;  %v2381_v17 = vld [vmem:[%s3172_s4 + $0x244] ss:$8 sps:$4 sm:$0xff] (!%p298_p3)   ;;  %v2383_v18 = vld [vmem:[%s3172_s4 + $0x140] ss:$8 sps:$4 sm:$0xff] (!%p298_p3)   ;;  %v2385_v20 = vld [vmem:[%s3172_s4 + $0x154] ss:$8 sps:$4 sm:$0xff] (!%p298_p3)  }
   0xd   : > { %1301 = vmatpush1.bf16.msra.mxu0 (!%p298_p3), %v2366_v7  ;;  %715 = vmatprep.subr.bf16.mxu1 (!%p298_p3), %v2367_v8  ;;  %v2384_v19 = vld [vmem:[%s3172_s4 + $0x240] ss:$8 sps:$4 sm:$0xff] (!%p298_p3)   ;;  %v2387_v21 = vld [vmem:[%s3172_s4 + $0x254] ss:$8 sps:$4 sm:$0xff] (!%p298_p3)   ;;  %v2389_v22 = vld [vmem:[%s3172_s4 + $0x150] ss:$8 sps:$4 sm:$0xff] (!%p298_p3)  }
   0xe   : > { %1302 = vmatprep.subr.bf16.mxu0 %v2369_v9  ;;  %v2390_v23 = vld [vmem:[%s3172_s4 + $0x250] ss:$8 sps:$4 sm:$0xff]   ;;  %v2391_v24 = vld [vmem:[%s3172_s4 + $0x164] ss:$8 sps:$4 sm:$0xff]   ;;  %v2395_v26 = vld [vmem:[%s3172_s4 + $0x160] ss:$8 sps:$4 sm:$0xff]  }
   0xf   : > { %v2393_v25 = vld [vmem:[%s3172_s4 + $0x264] ss:$8 sps:$4 sm:$0xff]   ;;  %v2396_v27 = vld [vmem:[%s3172_s4 + $0x260] ss:$8 sps:$4 sm:$0xff]   ;;  %v2397_v28 = vld [vmem:[%s3172_s4 + $0x174] ss:$8 sps:$4 sm:$0xff]  }
  0x10   : > { %716 = vmatpush1.bf16.msra.mxu1 %v2371_v10  ;;  %v2399_v29 = vld [vmem:[%s3172_s4 + $0x274] ss:$8 sps:$4 sm:$0xff]   ;;  %v2401_v30 = vld [vmem:[%s3172_s4 + $0x170] ss:$8 sps:$4 sm:$0xff]   ;;  %v2403_v32 = vld [vmem:[%s3172_s4 + $0x184] ss:$8 sps:$4 sm:$0xff]  }
  0x11   : > { %1303 = vmatpush1.bf16.msra.mxu0 %v2372_v11  ;;  %717 = vmatprep.subr.bf16.mxu1 %v2373_v12  ;;  %v2402_v31 = vld [vmem:[%s3172_s4 + $0x270] ss:$8 sps:$4 sm:$0xff]   ;;  %v2405_v33 = vld [vmem:[%s3172_s4 + $0x284] ss:$8 sps:$4 sm:$0xff]   ;;  %v2407_v34 = vld [vmem:[%s3172_s4 + $0x180] ss:$8 sps:$4 sm:$0xff]  }
  0x12   : > { %1304 = vmatprep.subr.bf16.mxu0 %v2375_v13  ;;  %v2408_v35 = vld [vmem:[%s3172_s4 + $0x280] ss:$8 sps:$4 sm:$0xff]   ;;  %v2409_v36 = vld [vmem:[%s3172_s4 + $0x194] ss:$8 sps:$4 sm:$0xff]   ;;  %s3180_s21 = smov (!%p372_p4, %s2609_s21), 1 }
  0x13   : > { %v2411_v37 = vld [vmem:[%s3172_s4 + $0x294] ss:$8 sps:$4 sm:$0xff]   ;;  %v2413_v38 = vld [vmem:[%s3172_s4 + $0x190] ss:$8 sps:$4 sm:$0xff]   ;;  %v2415_v40 = vld [vmem:[%s3172_s4 + $0x1a4] ss:$8 sps:$4 sm:$0xff]  }
  0x14   : > { %718 = vmatpush1.bf16.msra.mxu1 %v2377_v14  ;;  %v2414_v39 = vld [vmem:[%s3172_s4 + $0x290] ss:$8 sps:$4 sm:$0xff]   ;;  %v2417_v41 = vld [vmem:[%s3172_s4 + $0x2a4] ss:$8 sps:$4 sm:$0xff]   ;;  %s2805_s29 = sshll.u32 %s3180_s21, 6  ;;  %s2001_s17 = sshll.u32 %s3180_s21, 1 }
  0x15   : > { %1305 = vmatpush1.bf16.msra.mxu0 %v2378_v15  ;;  %719 = vmatprep.subr.bf16.mxu1 %v2379_v16  ;;  %v2419_v42 = vld [vmem:[%s3172_s4 + $0x1a0] ss:$8 sps:$4 sm:$0xff]   ;;  %v2421_v44 = vld [vmem:[%s3172_s4 + $0x1b4] ss:$8 sps:$4 sm:$0xff]   ;;  %s2820_s14 = scalar_lea.vmem %s3169_s1, %s2805_s29  ;;  %v2425_v46 = vld [vmem:[%s3172_s4 + $0x1b0] ss:$8 sps:$4 sm:$0xff]   ;;  %s2833_s25 = scalar_lea.vmem %s3170_s2, %s2805_s29 }
  0x16   : > { %1306 = vmatprep.subr.bf16.mxu0 %v2381_v17  ;;  %v2420_v43 = vld [vmem:[%s3172_s4 + $0x2a0] ss:$8 sps:$4 sm:$0xff]   ;;  %v2423_v45 = vld [vmem:[%s3172_s4 + $0x2b4] ss:$8 sps:$4 sm:$0xff]   ;;  %v2453_v47 = vld [vmem:[%s2820_s14 + $0x4] ss:$8 sps:$4 sm:$0xff]   ;;  %s3019_s10 = scalar_lea.vmem %s3171_s3, %s2805_s29  ;;  %s418_s19 = scalar_lea.vmem %s3173_s5, %s2001_s17 }
  0x17   : > { %v2426_v48 = vld [vmem:[%s3172_s4 + $0x2b0] ss:$8 sps:$4 sm:$0xff]   ;;  %v2427_v49 = vld [vmem:[%s3172_s4 + $0x1c4] ss:$8 sps:$4 sm:$0xff]   ;;  %743 = vmatprep.mubr.bf16.mxu1 %v2453_v47  ;;  %v2431_v52 = vld [vmem:[%s3172_s4 + $0x1c0] ss:$8 sps:$4 sm:$0xff]  }
  0x18   : > { %720 = vmatpush1.bf16.msra.mxu1 %v2383_v18  ;;  %v2429_v50 = vld [vmem:[%s3172_s4 + $0x2c4] ss:$8 sps:$4 sm:$0xff]   ;;  %v2432_v53 = vld [vmem:[%s3172_s4 + $0x2c0] ss:$8 sps:$4 sm:$0xff]   ;;  %v2433_v54 = vld [vmem:[%s3172_s4 + $0x1d4] ss:$8 sps:$4 sm:$0xff]  }
  0x19   : > { %1307 = vmatpush1.bf16.msra.mxu0 %v2384_v19  ;;  %721 = vmatprep.subr.bf16.mxu1 %v2385_v20  ;;  %v2459_v51 = vld [vmem:[%s2833_s25 + $0x4] ss:$8 sps:$4 sm:$0xff]   ;;  %v2435_v55 = vld [vmem:[%s3172_s4 + $0x2d4] ss:$8 sps:$4 sm:$0xff]   ;;  %v2437_v56 = vld [vmem:[%s3172_s4 + $0x1d0] ss:$8 sps:$4 sm:$0xff]  }
  0x1a   : > { %1308 = vmatprep.subr.bf16.mxu0 %v2387_v21  ;;  %1330 = vmatprep.mubr.bf16.mxu0 %v2459_v51  ;;  %v2438_v57 = vld [vmem:[%s3172_s4 + $0x2d0] ss:$8 sps:$4 sm:$0xff]   ;;  %v2439_v58 = vld [vmem:[%s3172_s4 + $0x1e4] ss:$8 sps:$4 sm:$0xff]   ;;  %v2443_v60 = vld [vmem:[%s3172_s4 + $0x1e0] ss:$8 sps:$4 sm:$0xff]  }
  0x1b   : > { %v2441_v59 = vld [vmem:[%s3172_s4 + $0x2e4] ss:$8 sps:$4 sm:$0xff]   ;;  %v2444_v61 = vld [vmem:[%s3172_s4 + $0x2e0] ss:$8 sps:$4 sm:$0xff]   ;;  %v2445_v62 = vld [vmem:[%s3172_s4 + $0x1f4] ss:$8 sps:$4 sm:$0xff]  }
  0x1c   : > { %722 = vmatpush1.bf16.msra.mxu1 %v2389_v22  ;;  %v2447_v63 = vld [vmem:[%s3172_s4 + $0x2f4] ss:$8 sps:$4 sm:$0xff]   ;;  %v2449_v0 = vld [vmem:[%s3172_s4 + $0x1f0] ss:$8 sps:$4 sm:$0xff]   ;;  %v2456_v2 = vld [vmem:[%s3172_s4 + $0x4] ss:$8 sps:$4 sm:$0xff]  }
  0x1d   : > { %1309 = vmatpush1.bf16.msra.mxu0 %v2390_v23  ;;  %723 = vmatprep.subr.bf16.mxu1 %v2391_v24  ;;  %v2450_v1 = vld [vmem:[%s3172_s4 + $0x2f0] ss:$8 sps:$4 sm:$0xff]   ;;  %v2462_v3 = vld [vmem:[%s3172_s4 + $0x304] ss:$8 sps:$4 sm:$0xff]   ;;  %v2451_v4 = vld [vmem:[%s2820_s14] ss:$8 sps:$4 sm:$0xff]  }
  0x1e   : > { %1310 = vmatprep.subr.bf16.mxu0 %v2393_v25  ;;  %v2454_v5 = vld [vmem:[%s3172_s4] ss:$8 sps:$4 sm:$0xff]   ;;  %v2465_v8 = vld [vmem:[%s3172_s4 + $0x14] ss:$8 sps:$4 sm:$0xff]   ;;  %v2463_v10 = vld [vmem:[%s3172_s4 + $0x10] ss:$8 sps:$4 sm:$0xff]  }
  0x1f   : > { %v2457_v6 = vld [vmem:[%s2833_s25] ss:$8 sps:$4 sm:$0xff]   ;;  %v2468_v9 = vld [vmem:[%s3172_s4 + $0x314] ss:$8 sps:$4 sm:$0xff]   ;;  %v2466_v11 = vld [vmem:[%s3172_s4 + $0x310] ss:$8 sps:$4 sm:$0xff]  }
  0x20   : > { %724 = vmatpush1.bf16.msra.mxu1 %v2395_v26  ;;  %v2460_v7 = vld [vmem:[%s3172_s4 + $0x300] ss:$8 sps:$4 sm:$0xff]   ;;  %v2471_v12 = vld [vmem:[%s3172_s4 + $0x24] ss:$8 sps:$4 sm:$0xff]   ;;  %v2477_v16 = vld [vmem:[%s3172_s4 + $0x34] ss:$8 sps:$4 sm:$0xff]  }
  0x21   : > { %1311 = vmatpush1.bf16.msra.mxu0 %v2396_v27  ;;  %725 = vmatprep.subr.bf16.mxu1 %v2397_v28  ;;  %v2474_v13 = vld [vmem:[%s3172_s4 + $0x324] ss:$8 sps:$4 sm:$0xff]   ;;  %v2469_v14 = vld [vmem:[%s3172_s4 + $0x20] ss:$8 sps:$4 sm:$0xff]   ;;  %v2480_v17 = vld [vmem:[%s3172_s4 + $0x334] ss:$8 sps:$4 sm:$0xff]  }
  0x22   : > { %1312 = vmatprep.subr.bf16.mxu0 %v2399_v29  ;;  %v2472_v15 = vld [vmem:[%s3172_s4 + $0x320] ss:$8 sps:$4 sm:$0xff]   ;;  %v2517_v18 = vld [vmem:[%s2820_s14 + $0x14] ss:$8 sps:$4 sm:$0xff]   ;;  %v2521_v20 = vld [vmem:[%s2820_s14 + $0x10] ss:$8 sps:$4 sm:$0xff]  }
  0x23   : > { %v2519_v19 = vld [vmem:[%s2833_s25 + $0x14] ss:$8 sps:$4 sm:$0xff]   ;;  %v2475_v21 = vld [vmem:[%s3172_s4 + $0x30] ss:$8 sps:$4 sm:$0xff]   ;;  %v2483_v24 = vld [vmem:[%s3172_s4 + $0x44] ss:$8 sps:$4 sm:$0xff]  }
  0x24   : > { %726 = vmatpush1.bf16.msra.mxu1 %v2401_v30  ;;  %v2478_v22 = vld [vmem:[%s3172_s4 + $0x330] ss:$8 sps:$4 sm:$0xff]   ;;  %v2486_v25 = vld [vmem:[%s3172_s4 + $0x344] ss:$8 sps:$4 sm:$0xff]   ;;  %v2481_v26 = vld [vmem:[%s3172_s4 + $0x40] ss:$8 sps:$4 sm:$0xff]  }
  0x25   : > { %1313 = vmatpush1.bf16.msra.mxu0 %v2402_v31  ;;  %727 = vmatprep.subr.bf16.mxu1 %v2403_v32  ;;  %v2525_v23 = vld [vmem:[%s2833_s25 + $0x10] ss:$8 sps:$4 sm:$0xff]   ;;  %v2484_v27 = vld [vmem:[%s3172_s4 + $0x340] ss:$8 sps:$4 sm:$0xff]   ;;  %v2489_v28 = vld [vmem:[%s3172_s4 + $0x54] ss:$8 sps:$4 sm:$0xff]  }
  0x26   : > { %1314 = vmatprep.subr.bf16.mxu0 %v2405_v33  ;;  %v2492_v29 = vld [vmem:[%s3172_s4 + $0x354] ss:$8 sps:$4 sm:$0xff]   ;;  %v2535_v30 = vld [vmem:[%s2820_s14 + $0x24] ss:$8 sps:$4 sm:$0xff]   ;;  %v2539_v32 = vld [vmem:[%s2820_s14 + $0x20] ss:$8 sps:$4 sm:$0xff]  }
  0x27   : > { %v2537_v31 = vld [vmem:[%s2833_s25 + $0x24] ss:$8 sps:$4 sm:$0xff]   ;;  %v2487_v33 = vld [vmem:[%s3172_s4 + $0x50] ss:$8 sps:$4 sm:$0xff]   ;;  %v2508_v51 = vld [vmem:[%s3172_s4 + $0x380] ss:$8 sps:$4 sm:$0xff]  }
  0x28   : > { %728 = vmatpush1.bf16.msra.mxu1 %v2407_v34  ;;  %v2490_v34 = vld [vmem:[%s3172_s4 + $0x350] ss:$8 sps:$4 sm:$0xff]  }
  0x29   : > { %1315 = vmatpush1.bf16.msra.mxu0 %v2408_v35  ;;  %729 = vmatprep.subr.bf16.mxu1 %v2409_v36  ;;  %v2543_v35 = vld [vmem:[%s2833_s25 + $0x20] ss:$8 sps:$4 sm:$0xff]   ;;  %v2495_v36 = vld [vmem:[%s3172_s4 + $0x64] ss:$8 sps:$4 sm:$0xff]   ;;  %v2561_v47 = vld [vmem:[%s2833_s25 + $0x30] ss:$8 sps:$4 sm:$0xff]  }
  0x2a   : > { %1316 = vmatprep.subr.bf16.mxu0 %v2411_v37  ;;  %v2498_v37 = vld [vmem:[%s3172_s4 + $0x364] ss:$8 sps:$4 sm:$0xff]  }
  0x2c   : > { %730 = vmatpush1.bf16.msra.mxu1 %v2413_v38  ;;  %v2493_v38 = vld [vmem:[%s3172_s4 + $0x60] ss:$8 sps:$4 sm:$0xff]  }
  0x2d   : > { %1317 = vmatpush1.bf16.msra.mxu0 %v2414_v39  ;;  %731 = vmatprep.subr.bf16.mxu1 %v2415_v40  ;;  %v2496_v39 = vld [vmem:[%s3172_s4 + $0x360] ss:$8 sps:$4 sm:$0xff]   ;;  %v2501_v40 = vld [vmem:[%s3172_s4 + $0x74] ss:$8 sps:$4 sm:$0xff]  }
  0x2e   : > { %1318 = vmatprep.subr.bf16.mxu0 %v2417_v41  ;;  %v2504_v41 = vld [vmem:[%s3172_s4 + $0x374] ss:$8 sps:$4 sm:$0xff]  }
  0x30   : > { %732 = vmatpush1.bf16.msra.mxu1 %v2419_v42  ;;  %v2553_v42 = vld [vmem:[%s2820_s14 + $0x34] ss:$8 sps:$4 sm:$0xff]  }
  0x31   : > { %1319 = vmatpush1.bf16.msra.mxu0 %v2420_v43  ;;  %733 = vmatprep.subr.bf16.mxu1 %v2421_v44  ;;  %v2555_v43 = vld [vmem:[%s2833_s25 + $0x34] ss:$8 sps:$4 sm:$0xff]   ;;  %v2557_v44 = vld [vmem:[%s2820_s14 + $0x30] ss:$8 sps:$4 sm:$0xff]   ;;  %s3010_s25 = scalar_lea.vmem %s3168_s0, %s2805_s29 }
  0x32   : > { %1320 = vmatprep.subr.bf16.mxu0 %v2423_v45  ;;  %v2499_v45 = vld [vmem:[%s3172_s4 + $0x70] ss:$8 sps:$4 sm:$0xff]  }
  0x34   : > { %734 = vmatpush1.bf16.msra.mxu1 %v2425_v46  ;;  %v2502_v46 = vld [vmem:[%s3172_s4 + $0x370] ss:$8 sps:$4 sm:$0xff]  }
  0x35   : > { %1321 = vmatpush1.bf16.msra.mxu0 %v2426_v48  ;;  %735 = vmatprep.subr.bf16.mxu1 %v2427_v49  ;;  %v2507_v48 = vld [vmem:[%s3172_s4 + $0x84] ss:$8 sps:$4 sm:$0xff]  }
  0x36   : > { %1322 = vmatprep.subr.bf16.mxu0 %v2429_v50  ;;  %v2510_v49 = vld [vmem:[%s3172_s4 + $0x384] ss:$8 sps:$4 sm:$0xff]   ;;  %v2505_v50 = vld [vmem:[%s3172_s4 + $0x80] ss:$8 sps:$4 sm:$0xff]  }
  0x38   : > { %736 = vmatpush1.bf16.msra.mxu1 %v2431_v52  ;;  %v2513_v52 = vld [vmem:[%s3172_s4 + $0x94] ss:$8 sps:$4 sm:$0xff]  }
  0x39   : > { %1323 = vmatpush1.bf16.msra.mxu0 %v2432_v53  ;;  %737 = vmatprep.subr.bf16.mxu1 %v2433_v54  ;;  %v2516_v53 = vld [vmem:[%s3172_s4 + $0x394] ss:$8 sps:$4 sm:$0xff]   ;;  %v2573_v54 = vld [vmem:[%s3010_s25 + $0x4] ss:$8 sps:$4 sm:$0xff]  }
  0x3a   : > { %1324 = vmatprep.subr.bf16.mxu0 %v2435_v55  ;;  %v2576_v55 = vld [vmem:[%s3019_s10 + $0x4] ss:$8 sps:$4 sm:$0xff]  }
  0x3c   : > { %738 = vmatpush1.bf16.msra.mxu1 %v2437_v56  ;;  %v2511_v56 = vld [vmem:[%s3172_s4 + $0x90] ss:$8 sps:$4 sm:$0xff]  }
  0x3d   : > { %1325 = vmatpush1.bf16.msra.mxu0 %v2438_v57  ;;  %739 = vmatprep.subr.bf16.mxu1 %v2439_v58  ;;  %v2514_v57 = vld [vmem:[%s3172_s4 + $0x390] ss:$8 sps:$4 sm:$0xff]   ;;  %v2524_v58 = vld [vmem:[%s3172_s4 + $0xa4] ss:$8 sps:$4 sm:$0xff]  }
  0x3e   : > { %1326 = vmatprep.subr.bf16.mxu0 %v2441_v59  ;;  %v2528_v59 = vld [vmem:[%s3172_s4 + $0x3a4] ss:$8 sps:$4 sm:$0xff]  }
  0x40   : > { %740 = vmatpush1.bf16.msra.mxu1 %v2443_v60  ;;  %v2522_v60 = vld [vmem:[%s3172_s4 + $0xa0] ss:$8 sps:$4 sm:$0xff]  }
  0x41   : > { %1327 = vmatpush1.bf16.msra.mxu0 %v2444_v61  ;;  %741 = vmatprep.subr.bf16.mxu1 %v2445_v62  ;;  %v2526_v61 = vld [vmem:[%s3172_s4 + $0x3a0] ss:$8 sps:$4 sm:$0xff]   ;;  %v2531_v62 = vld [vmem:[%s3172_s4 + $0xb4] ss:$8 sps:$4 sm:$0xff]  }
  0x42   : > { %1328 = vmatprep.subr.bf16.mxu0 %v2447_v63  ;;  %v2534_v63 = vld [vmem:[%s3172_s4 + $0x3b4] ss:$8 sps:$4 sm:$0xff]  }
  0x44   : > { %742 = vmatpush1.bf16.msra.mxu1 %v2449_v0  ;;  %v2529_v0 = vld [vmem:[%s3172_s4 + $0xb0] ss:$8 sps:$4 sm:$0xff]  }
  0x45   : > { %1329 = vmatpush1.bf16.msra.mxu0 %v2450_v1  ;;  %984 = vmatprep.subr.bf16.mxu1 %v2456_v2  ;;  %v2532_v1 = vld [vmem:[%s3172_s4 + $0x3b0] ss:$8 sps:$4 sm:$0xff]   ;;  %v2542_v2 = vld [vmem:[%s3172_s4 + $0xc4] ss:$8 sps:$4 sm:$0xff]  }
  0x46   : > { %1628 = vmatprep.subr.bf16.mxu0 %v2462_v3  ;;  %v2546_v3 = vld [vmem:[%s3172_s4 + $0x3c4] ss:$8 sps:$4 sm:$0xff]  }
  0x47   : > { %744 = vmatmul.mubr.bf16.vlgmr.msra.gmra.mrb[0].mxu1 %v2451_v4  ;;  %v2540_v4 = vld [vmem:[%s3172_s4 + $0xc0] ss:$8 sps:$4 sm:$0xff]  }
  0x48   : > { %1331 = vmatmul.mubr.bf16.vlgmr.msra.gmra.mrb[0].mxu0 %v2457_v6  ;;  %985 = vmatpush1.bf16.msra.mxu1 %v2454_v5  ;;  %v2544_v5 = vld [vmem:[%s3172_s4 + $0x3c0] ss:$8 sps:$4 sm:$0xff]   ;;  %v2549_v6 = vld [vmem:[%s3172_s4 + $0xd4] ss:$8 sps:$4 sm:$0xff]  }
  0x49   : > { %1629 = vmatpush1.bf16.msra.mxu0 %v2460_v7  ;;  %986 = vmatprep.subr.bf16.mxu1 %v2465_v8  ;;  %v2552_v7 = vld [vmem:[%s3172_s4 + $0x3d4] ss:$8 sps:$4 sm:$0xff]   ;;  %v2547_v8 = vld [vmem:[%s3172_s4 + $0xd0] ss:$8 sps:$4 sm:$0xff]  }
  0x4a   : > { %1630 = vmatprep.subr.bf16.mxu0 %v2468_v9  ;;  %753 = vmatprep.mubr.bf16.mxu1 %v2517_v18  ;;  %v2550_v9 = vld [vmem:[%s3172_s4 + $0x3d0] ss:$8 sps:$4 sm:$0xff]   ;;  %v2571_v18 = vld [vmem:[%s3010_s25] ss:$8 sps:$4 sm:$0xff]  }
  0x4b   : > { %1340 = vmatprep.mubr.bf16.mxu0 %v2519_v19  ;;  %v2574_v19 = vld [vmem:[%s3019_s10] ss:$8 sps:$4 sm:$0xff]  }
  0x4c   : > { %987 = vmatpush1.bf16.msra.mxu1 %v2463_v10  ;;  %v2560_v10 = vld [vmem:[%s3172_s4 + $0xe4] ss:$8 sps:$4 sm:$0xff]  }
  0x4d   : > { %1631 = vmatpush1.bf16.msra.mxu0 %v2466_v11  ;;  %988 = vmatprep.subr.bf16.mxu1 %v2471_v12  ;;  %v2564_v11 = vld [vmem:[%s3172_s4 + $0x3e4] ss:$8 sps:$4 sm:$0xff]   ;;  %v2558_v12 = vld [vmem:[%s3172_s4 + $0xe0] ss:$8 sps:$4 sm:$0xff]  }
  0x4e   : > { %1632 = vmatprep.subr.bf16.mxu0 %v2474_v13  ;;  %v2562_v13 = vld [vmem:[%s3172_s4 + $0x3e0] ss:$8 sps:$4 sm:$0xff]  }
  0x4f   : > { %754 = vmatmul.mubr.bf16.gmra.mrb[4].mxu1 %v2521_v20  ;;  %v2577_v20 = vld [vmem:[%s3010_s25 + $0x14] ss:$8 sps:$4 sm:$0xff]  }
  0x50   : > { %989 = vmatpush1.bf16.msra.mxu1 %v2469_v14  ;;  %1341 = vmatmul.mubr.bf16.gmra.mrb[4].mxu0 %v2525_v23  ;;  %v2567_v14 = vld [vmem:[%s3172_s4 + $0xf4] ss:$8 sps:$4 sm:$0xff]   ;;  %v2582_v23 = vld [vmem:[%s3019_s10 + $0x10] ss:$8 sps:$4 sm:$0xff]  }
  0x51   : > { %1633 = vmatpush1.bf16.msra.mxu0 %v2472_v15  ;;  %990 = vmatprep.subr.bf16.mxu1 %v2477_v16  ;;  %v2570_v15 = vld [vmem:[%s3172_s4 + $0x3f4] ss:$8 sps:$4 sm:$0xff]   ;;  %v2565_v16 = vld [vmem:[%s3172_s4 + $0xf0] ss:$8 sps:$4 sm:$0xff]  }
  0x52   : > { %1634 = vmatprep.subr.bf16.mxu0 %v2480_v17  ;;  %763 = vmatprep.mubr.bf16.mxu1 %v2535_v30  ;;  %v2568_v17 = vld [vmem:[%s3172_s4 + $0x3f0] ss:$8 sps:$4 sm:$0xff]  }
  0x53   : > { %1350 = vmatprep.mubr.bf16.mxu0 %v2537_v31  ;;  %v2593_v30 = vld [vmem:[%s3010_s25 + $0x30] ss:$8 sps:$4 sm:$0xff]  }
  0x54   : > { %991 = vmatpush1.bf16.msra.mxu1 %v2475_v21  ;;  %v2579_v21 = vld [vmem:[%s3019_s10 + $0x14] ss:$8 sps:$4 sm:$0xff]   ;;  %v2594_v31 = vld [vmem:[%s3019_s10 + $0x30] ss:$8 sps:$4 sm:$0xff]  }
  0x55   : > { %1635 = vmatpush1.bf16.msra.mxu0 %v2478_v22  ;;  %992 = vmatprep.subr.bf16.mxu1 %v2483_v24  ;;  %v2581_v22 = vld [vmem:[%s3010_s25 + $0x10] ss:$8 sps:$4 sm:$0xff]   ;;  %v2583_v24 = vld [vmem:[%s3010_s25 + $0x24] ss:$8 sps:$4 sm:$0xff]  }
  0x56   : > { %1636 = vmatprep.subr.bf16.mxu0 %v2486_v25  ;;  %v2585_v25 = vld [vmem:[%s3019_s10 + $0x24] ss:$8 sps:$4 sm:$0xff]  }
  0x57   : > { %764 = vmatmul.mubr.bf16.gmra.mrb[8].mxu1 %v2539_v32  ;;  %v1719_v32 = vlaneseq }
  0x58   : > { %993 = vmatpush1.bf16.msra.mxu1 %v2481_v26  ;;  %1351 = vmatmul.mubr.bf16.gmra.mrb[8].mxu0 %v2543_v35  ;;  %v2587_v26 = vld [vmem:[%s3010_s25 + $0x20] ss:$8 sps:$4 sm:$0xff]  }
  0x59   : > { %1637 = vmatpush1.bf16.msra.mxu0 %v2484_v27  ;;  %994 = vmatprep.subr.bf16.mxu1 %v2489_v28  ;;  %v2588_v27 = vld [vmem:[%s3019_s10 + $0x20] ss:$8 sps:$4 sm:$0xff]   ;;  %v2589_v28 = vld [vmem:[%s3010_s25 + $0x34] ss:$8 sps:$4 sm:$0xff]  }
  0x5a   : > { %1638 = vmatprep.subr.bf16.mxu0 %v2492_v29  ;;  %773 = vmatprep.mubr.bf16.mxu1 %v2553_v42  ;;  %v2591_v29 = vld [vmem:[%s3019_s10 + $0x34] ss:$8 sps:$4 sm:$0xff]   ;;  %v1717_v35 = vld [vmem:[%s418_s19] sm:$0x3]  ;;  %s3137_s10 = scalar_lea.vmem %s3174_s6, %s2805_s29 }
  0x5b   : > { %1360 = vmatprep.mubr.bf16.mxu0 %v2555_v43 }
  0x5c   : > { %995 = vmatpush1.bf16.msra.mxu1 %v2487_v33  ;;  %v1720_v33 = vshrl.u32 %v1719_v32, 7 }
  0x5d   : > { %1639 = vmatpush1.bf16.msra.mxu0 %v2490_v34  ;;  %996 = vmatprep.subr.bf16.mxu1 %v2495_v36 }
  0x5e   : > { %1640 = vmatprep.subr.bf16.mxu0 %v2498_v37  ;;  %v1721_v34 = vsub.s32 0, %v1720_v33  ;;  %v1725_v36 = vsub.s32 1, %v1720_v33 }
  0x5f   : > { %774 = vmatmul.mubr.bf16.gmra.mrb[12].mxu1 %v2557_v44 }
  0x60   : > { %997 = vmatpush1.bf16.msra.mxu1 %v2493_v38  ;;  %1361 = vmatmul.mubr.bf16.gmra.mrb[12].mxu0 %v2561_v47  ;;  %v3125_v37 = vrot.slane %v1717_v35, %v1721_v34  ;;  %v3127_v38 = vrot.slane %v1717_v35, %v1725_v36 }
  0x61   : > { %1641 = vmatpush1.bf16.msra.mxu0 %v2496_v39  ;;  %998 = vmatprep.subr.bf16.mxu1 %v2501_v40 }
  0x62   : > { %1642 = vmatprep.subr.bf16.mxu0 %v2504_v41  ;;  %1016 = vmatprep.mubr.bf16.mxu1 %v2573_v54 }
  0x63   : > { %1660 = vmatprep.mubr.bf16.mxu0 %v2576_v55 }
  0x64   : > { %999 = vmatpush1.bf16.msra.mxu1 %v2499_v45 }
  0x65   : > { %1643 = vmatpush1.bf16.msra.mxu0 %v2502_v46  ;;  %1000 = vmatprep.subr.bf16.mxu1 %v2507_v48 }
  0x66   : > { %1644 = vmatprep.subr.bf16.mxu0 %v2510_v49 }
  0x68   : > { %1001 = vmatpush1.bf16.msra.mxu1 %v2505_v50 }
  0x69   : > { %1645 = vmatpush1.bf16.msra.mxu0 %v2508_v51  ;;  %1002 = vmatprep.subr.bf16.mxu1 %v2513_v52 }
  0x6a   : > { %1646 = vmatprep.subr.bf16.mxu0 %v2516_v53 }
  0x6c   : > { %1003 = vmatpush1.bf16.msra.mxu1 %v2511_v56 }
  0x6d   : > { %1647 = vmatpush1.bf16.msra.mxu0 %v2514_v57  ;;  %1004 = vmatprep.subr.bf16.mxu1 %v2524_v58 }
  0x6e   : > { %1648 = vmatprep.subr.bf16.mxu0 %v2528_v59 }
  0x70   : > { %1005 = vmatpush1.bf16.msra.mxu1 %v2522_v60 }
  0x71   : > { %1649 = vmatpush1.bf16.msra.mxu0 %v2526_v61  ;;  %1006 = vmatprep.subr.bf16.mxu1 %v2531_v62 }
  0x72   : > { %1650 = vmatprep.subr.bf16.mxu0 %v2534_v63 }
  0x74   : > { %1007 = vmatpush1.bf16.msra.mxu1 %v2529_v0 }
  0x75   : > { %1651 = vmatpush1.bf16.msra.mxu0 %v2532_v1  ;;  %1008 = vmatprep.subr.bf16.mxu1 %v2542_v2 }
  0x76   : > { %1652 = vmatprep.subr.bf16.mxu0 %v2546_v3 }
  0x78   : > { %1009 = vmatpush1.bf16.msra.mxu1 %v2540_v4 }
  0x79   : > { %1653 = vmatpush1.bf16.msra.mxu0 %v2544_v5  ;;  %1010 = vmatprep.subr.bf16.mxu1 %v2549_v6 }
  0x7a   : > { %1654 = vmatprep.subr.bf16.mxu0 %v2552_v7 }
  0x7c   : > { %1011 = vmatpush1.bf16.msra.mxu1 %v2547_v8 }
  0x7d   : > { %1655 = vmatpush1.bf16.msra.mxu0 %v2550_v9  ;;  %1012 = vmatprep.subr.bf16.mxu1 %v2560_v10 }
  0x7e   : > { %1656 = vmatprep.subr.bf16.mxu0 %v2564_v11 }
  0x80   : > { %1013 = vmatpush1.bf16.msra.mxu1 %v2558_v12 }
  0x81   : > { %1657 = vmatpush1.bf16.msra.mxu0 %v2562_v13  ;;  %1014 = vmatprep.subr.bf16.mxu1 %v2567_v14 }
  0x82   : > { %1658 = vmatprep.subr.bf16.mxu0 %v2570_v15 }
  0x84   : > { %1015 = vmatpush1.bf16.msra.mxu1 %v2565_v16 }
  0x85   : > { %1659 = vmatpush1.bf16.msra.mxu0 %v2568_v17 }
  0x87   : > { %1017 = vmatmul.mubr.bf16.vlgmr.msra.gmra.mrb[0].mxu1 %v2571_v18 }
  0x88   : > { %1661 = vmatmul.mubr.bf16.vlgmr.msra.gmra.mrb[0].mxu0 %v2574_v19  ;;  %1026 = vmatprep.mubr.bf16.mxu1 %v2577_v20 }
  0x89   : > { %1670 = vmatprep.mubr.bf16.mxu0 %v2579_v21 }
  0x8f   : > { %1027 = vmatmul.mubr.bf16.gmra.mrb[4].mxu1 %v2581_v22 }
  0x90   : > { %1671 = vmatmul.mubr.bf16.gmra.mrb[4].mxu0 %v2582_v23  ;;  %1036 = vmatprep.mubr.bf16.mxu1 %v2583_v24 }
  0x91   : > { %1680 = vmatprep.mubr.bf16.mxu0 %v2585_v25 }
  0x97   : > { %1037 = vmatmul.mubr.bf16.gmra.mrb[8].mxu1 %v2587_v26 }
  0x98   : > { %1681 = vmatmul.mubr.bf16.gmra.mrb[8].mxu0 %v2588_v27  ;;  %1046 = vmatprep.mubr.bf16.mxu1 %v2589_v28 }
  0x99   : > { %1690 = vmatprep.mubr.bf16.mxu0 %v2591_v29 }
  0x9f   : > { %1047 = vmatmul.mubr.bf16.gmra.mrb[12].mxu1 %v2593_v30 }
  0xa0   : > { %1691 = vmatmul.mubr.bf16.gmra.mrb[12].mxu0 %v2594_v31 }
 0x15a   : > { %v1018_v39 = vpop.f32.mrb[0].mxu1 }
 0x15b   : > { %v1662_v40 = vpop.f32.mrb[0].mxu0  ;;  %v1020_v42 = vpop.f32.mrb[1].mxu1 }
 0x15c   : > { %v2283_v41 = vadd.f32 %v1662_v40, %v1018_v39  ;;  %v1664_v43 = vpop.f32.mrb[1].mxu0  ;;  %v1022_v45 = vpop.f32.mrb[2].mxu1 }
 0x15d   : > { %v2284_v44 = vadd.f32 %v1664_v43, %v1020_v42  ;;  %v1666_v46 = vpop.f32.mrb[2].mxu0  ;;  %v1024_v49 = vpop.f32.mrb[3].mxu1 }
 0x15e   : > { %v1729_v47 = vadd.f32 %v2283_v41, %v3125_v37  ;;  %v2285_v48 = vadd.f32 %v1666_v46, %v1022_v45  ;;  %v1668_v50 = vpop.f32.mrb[3].mxu0 }
 0x15f   : > { %v1730_v51 = vadd.f32 %v2284_v44, %v3127_v38  ;;  %v2286_v52 = vadd.f32 %v1668_v50, %v1024_v49 }
 0x160   : > { %v1745_v53 = vmax.f32 %v1729_v47, 0.0  ;;  %v1731_v54 = vadd.f32 %v2285_v48, %v3125_v37 }
 0x161   : > { %v1746_v55 = vmax.f32 %v1730_v51, 0.0  ;;  %v1732_v56 = vadd.f32 %v2286_v52, %v3127_v38 }
 0x162   : > { %v1747_v57 = vmax.f32 %v1731_v54, 0.0  ;;  %v1028_v60 = vpop.f32.mrb[4].mxu1 }
 0x163   : > { %v2275_v58 = vpack.c.bf16 %v1746_v55, %v1745_v53  ;;  %v1748_v59 = vmax.f32 %v1732_v56, 0.0  ;;  %v1672_v61 = vpop.f32.mrb[4].mxu0  ;;  %v1030_v63 = vpop.f32.mrb[5].mxu1 }
 0x164   : > { %v2287_v62 = vadd.f32 %v1672_v61, %v1028_v60  ;;  %v1674_v0 = vpop.f32.mrb[5].mxu0  ;;  %v1032_v3 = vpop.f32.mrb[6].mxu1 }
 0x165   : > { %1809 = vst [vmem:[%s3137_s10] sm:$0xff] %v2275_v58  ;;  %v2276_v1 = vpack.c.bf16 %v1748_v59, %v1747_v57  ;;  %v2288_v2 = vadd.f32 %v1674_v0, %v1030_v63  ;;  %v1676_v4 = vpop.f32.mrb[6].mxu0  ;;  %v1034_v7 = vpop.f32.mrb[7].mxu1 }
 0x166   : > { %v1733_v5 = vadd.f32 %v2287_v62, %v3125_v37  ;;  %v2289_v6 = vadd.f32 %v1676_v4, %v1032_v3  ;;  %v1678_v8 = vpop.f32.mrb[7].mxu0 }
 0x167   : > { %1810 = vst [vmem:[%s3137_s10 + $0x8] sm:$0xff] %v2276_v1  ;;  %v1734_v9 = vadd.f32 %v2288_v2, %v3127_v38  ;;  %v2290_v10 = vadd.f32 %v1678_v8, %v1034_v7 }
 0x168   : > { %v1749_v11 = vmax.f32 %v1733_v5, 0.0  ;;  %v1735_v12 = vadd.f32 %v2289_v6, %v3125_v37 }
 0x169   : > { %v1750_v13 = vmax.f32 %v1734_v9, 0.0  ;;  %v1736_v14 = vadd.f32 %v2290_v10, %v3127_v38 }
 0x16a   : > { %v1751_v15 = vmax.f32 %v1735_v12, 0.0  ;;  %v1038_v18 = vpop.f32.mrb[8].mxu1 }
 0x16b   : > { %v2277_v16 = vpack.c.bf16 %v1750_v13, %v1749_v11  ;;  %v1752_v17 = vmax.f32 %v1736_v14, 0.0  ;;  %v1682_v19 = vpop.f32.mrb[8].mxu0  ;;  %v1040_v21 = vpop.f32.mrb[9].mxu1 }
 0x16c   : > { %v2291_v20 = vadd.f32 %v1682_v19, %v1038_v18  ;;  %v1684_v22 = vpop.f32.mrb[9].mxu0  ;;  %v1042_v25 = vpop.f32.mrb[10].mxu1 }
 0x16d   : > { %1811 = vst [vmem:[%s3137_s10 + $0x10] sm:$0xff] %v2277_v16  ;;  %v2278_v23 = vpack.c.bf16 %v1752_v17, %v1751_v15  ;;  %v2292_v24 = vadd.f32 %v1684_v22, %v1040_v21  ;;  %v1686_v26 = vpop.f32.mrb[10].mxu0  ;;  %v1044_v29 = vpop.f32.mrb[11].mxu1 }
 0x16e   : > { %v1737_v27 = vadd.f32 %v2291_v20, %v3125_v37  ;;  %v2293_v28 = vadd.f32 %v1686_v26, %v1042_v25  ;;  %v1688_v30 = vpop.f32.mrb[11].mxu0 }
 0x16f   : > { %1812 = vst [vmem:[%s3137_s10 + $0x18] sm:$0xff] %v2278_v23  ;;  %v1738_v31 = vadd.f32 %v2292_v24, %v3127_v38  ;;  %v2294_v32 = vadd.f32 %v1688_v30, %v1044_v29 }
 0x170   : > { %v1753_v33 = vmax.f32 %v1737_v27, 0.0  ;;  %v1739_v34 = vadd.f32 %v2293_v28, %v3125_v37 }
 0x171   : > { %v1754_v35 = vmax.f32 %v1738_v31, 0.0  ;;  %v1740_v36 = vadd.f32 %v2294_v32, %v3127_v38 }
 0x172   : > { %v1755_v39 = vmax.f32 %v1739_v34, 0.0  ;;  %v1048_v42 = vpop.f32.mrb[12].mxu1 }
 0x173   : > { %v2279_v40 = vpack.c.bf16 %v1754_v35, %v1753_v33  ;;  %v1756_v41 = vmax.f32 %v1740_v36, 0.0  ;;  %v1692_v43 = vpop.f32.mrb[12].mxu0  ;;  %v1050_v45 = vpop.f32.mrb[13].mxu1 }
 0x174   : > { %v2295_v44 = vadd.f32 %v1692_v43, %v1048_v42  ;;  %v1694_v46 = vpop.f32.mrb[13].mxu0  ;;  %v1052_v49 = vpop.f32.mrb[14].mxu1 }
 0x175   : > { %1813 = vst [vmem:[%s3137_s10 + $0x20] sm:$0xff] %v2279_v40  ;;  %v2280_v47 = vpack.c.bf16 %v1756_v41, %v1755_v39  ;;  %v2296_v48 = vadd.f32 %v1694_v46, %v1050_v45  ;;  %v1696_v50 = vpop.f32.mrb[14].mxu0  ;;  %v1054_v53 = vpop.f32.mrb[15].mxu1 }
 0x176   : > { %v1741_v51 = vadd.f32 %v2295_v44, %v3125_v37  ;;  %v2297_v52 = vadd.f32 %v1696_v50, %v1052_v49  ;;  %v1698_v54 = vpop.f32.mrb[15].mxu0 }
 0x177   : > { %1814 = vst [vmem:[%s3137_s10 + $0x28] sm:$0xff] %v2280_v47  ;;  %v1742_v55 = vadd.f32 %v2296_v48, %v3127_v38  ;;  %v2298_v56 = vadd.f32 %v1698_v54, %v1054_v53 }
 0x178   : > { %v1757_v57 = vmax.f32 %v1741_v51, 0.0  ;;  %v1743_v58 = vadd.f32 %v2297_v52, %v3125_v37 }
 0x179   : > { %v1758_v59 = vmax.f32 %v1742_v55, 0.0  ;;  %v1744_v60 = vadd.f32 %v2298_v56, %v3127_v38 }
 0x17a   : > { %v1759_v61 = vmax.f32 %v1743_v58, 0.0 }
 0x17b   : > { %v2281_v62 = vpack.c.bf16 %v1758_v59, %v1757_v57  ;;  %v1760_v63 = vmax.f32 %v1744_v60, 0.0 }
 0x17d   : > { %1815 = vst [vmem:[%s3137_s10 + $0x30] sm:$0xff] %v2281_v62  ;;  %v2282_v0 = vpack.c.bf16 %v1760_v63, %v1759_v61 }
 0x17f   : > { %1816 = vst [vmem:[%s3137_s10 + $0x38] sm:$0xff] %v2282_v0 }
 0x180 PF: > { %s16_s23 = sadd.s32 1, %s2617_s23   ;;  %s3175_s21 = smov %s2613_s22 }
 0x181   : > { %p13_p5 = scmp.ge.s32.totalorder %s16_s23, 4   ;;  %s3176_s22 = smov %s3178_s24 }
 0x183   :  { %15 = sbr.rel (!%p13_p5) target bundleno = 2 (0x2), region = 89 }

// kernel: head_forward.17
= control target key start
LH: loop header
LB: loop body
LE: loop exit
PB: predicated region body
PF: predicated region fallthrough
CT: control target
= control target key end

     0   :  { %vm469_vm0 = vcmask 1041408   ;;  %vm372_vm1 = vcmask 31744   ;;  %s2251_s1 = inlined_call_operand.vmem [shape: bf16[4,128], index: 1, kind: input, shape index: {}]   ;;  %s2252_s0 = inlined_call_operand.vmem [shape: bf16[512,4], index: 0, kind: input, shape index: {}]   ;;  %s2253_s2 = inlined_call_operand.vmem [shape: f32[1,128], index: 2, kind: input, shape index: {}]   ;;  %s2254_s3 = inlined_call_operand.vmem [shape: bf16[512,128], index: 3, kind: output, shape index: {}]  }
   0x1   :  { %v211_v0 = vld [vmem:[%s2251_s1] sm:$0x3]  ;;  %v1905_v4 = vld [vmem:[%s2252_s0 + $0x8] sm:$0xff]   ;;  %v1907_v6 = vld [vmem:[%s2252_s0 + $0x10] sm:$0xff]  }
   0x2   :  { %1901 = vmatprep.subr.msk.bf16.mxu0 %vm469_vm0, %v211_v0  ;;  %1902 = vmatprep.subr.msk.bf16.mxu1 %vm469_vm0, %v211_v0  ;;  %v471_v1 = vsel %vm469_vm0, %v211_v0, 0  ;;  %v1903_v2 = vld [vmem:[%s2252_s0] sm:$0xff]   ;;  %v1906_v5 = vld [vmem:[%s2252_s0 + $0x88] sm:$0xff]   ;;  %v1908_v7 = vld [vmem:[%s2252_s0 + $0x90] sm:$0xff]  }
   0x3   :  { %1834 = vmatpush3.bf16.msra.mxu0 %v471_v1  ;;  %1900 = vmatpush3.bf16.msra.mxu1 %v471_v1  ;;  %v1904_v3 = vld [vmem:[%s2252_s0 + $0x80] sm:$0xff]   ;;  %v1909_v8 = vld [vmem:[%s2252_s0 + $0x18] sm:$0xff]   ;;  %v1913_v12 = vld [vmem:[%s2252_s0 + $0x28] sm:$0xff]  }
   0x4   :  { %1835 = vmatprep.mubr.msk.bf16.mxu0 %vm372_vm1, %v1903_v2  ;;  %1867 = vmatprep.mubr.msk.bf16.mxu1 %vm372_vm1, %v1904_v3  ;;  %v1910_v9 = vld [vmem:[%s2252_s0 + $0x98] sm:$0xff]   ;;  %v1911_v10 = vld [vmem:[%s2252_s0 + $0x20] sm:$0xff]   ;;  %v1914_v13 = vld [vmem:[%s2252_s0 + $0xa8] sm:$0xff]  }
   0x5   :  { %v1912_v11 = vld [vmem:[%s2252_s0 + $0xa0] sm:$0xff]   ;;  %v1915_v14 = vld [vmem:[%s2252_s0 + $0x30] sm:$0xff]   ;;  %v1917_v16 = vld [vmem:[%s2252_s0 + $0x38] sm:$0xff]  }
   0x6   :  { %1836 = vmatmul.mubr.msk.bf16.vlgmr.msra.gmra.mrb[0].mxu0 %vm372_vm1, %v1905_v4  ;;  %1868 = vmatmul.mubr.msk.bf16.vlgmr.msra.gmra.mrb[0].mxu1 %vm372_vm1, %v1906_v5  ;;  %v1916_v15 = vld [vmem:[%s2252_s0 + $0xb0] sm:$0xff]   ;;  %v1918_v17 = vld [vmem:[%s2252_s0 + $0xb8] sm:$0xff]   ;;  %v1919_v18 = vld [vmem:[%s2252_s0 + $0x40] sm:$0xff]  }
   0x7   :  { %1839 = vmatprep.mubr.msk.bf16.mxu0 %vm372_vm1, %v1907_v6  ;;  %1871 = vmatprep.mubr.msk.bf16.mxu1 %vm372_vm1, %v1908_v7  ;;  %v1920_v19 = vld [vmem:[%s2252_s0 + $0xc0] sm:$0xff]   ;;  %v1921_v20 = vld [vmem:[%s2252_s0 + $0x48] sm:$0xff]   ;;  %v1923_v22 = vld [vmem:[%s2252_s0 + $0x50] sm:$0xff]  }
   0x8   :  { %v1922_v21 = vld [vmem:[%s2252_s0 + $0xc8] sm:$0xff]   ;;  %v1924_v23 = vld [vmem:[%s2252_s0 + $0xd0] sm:$0xff]   ;;  %v1925_v24 = vld [vmem:[%s2252_s0 + $0x58] sm:$0xff]  }
   0x9   :  { %v1926_v25 = vld [vmem:[%s2252_s0 + $0xd8] sm:$0xff]   ;;  %v1927_v26 = vld [vmem:[%s2252_s0 + $0x60] sm:$0xff]   ;;  %v1929_v28 = vld [vmem:[%s2252_s0 + $0x68] sm:$0xff]  }
   0xa   :  { %v1928_v27 = vld [vmem:[%s2252_s0 + $0xe0] sm:$0xff]   ;;  %v1930_v29 = vld [vmem:[%s2252_s0 + $0xe8] sm:$0xff]   ;;  %v1931_v30 = vld [vmem:[%s2252_s0 + $0x70] sm:$0xff]  }
   0xb   :  { %v1932_v31 = vld [vmem:[%s2252_s0 + $0xf0] sm:$0xff]   ;;  %v1933_v32 = vld [vmem:[%s2252_s0 + $0x78] sm:$0xff]   ;;  %v2089_v34 = vld [vmem:[%s2253_s2] ss:$0 sm:$0xff] }
   0xc   :  { %v1934_v33 = vld [vmem:[%s2252_s0 + $0xf8] sm:$0xff]  }
   0xe   :  { %1840 = vmatmul.mubr.msk.bf16.gmra.mrb[4].mxu0 %vm372_vm1, %v1909_v8  ;;  %1872 = vmatmul.mubr.msk.bf16.gmra.mrb[4].mxu1 %vm372_vm1, %v1910_v9 }
   0xf   :  { %1843 = vmatprep.mubr.msk.bf16.mxu0 %vm372_vm1, %v1911_v10  ;;  %1875 = vmatprep.mubr.msk.bf16.mxu1 %vm372_vm1, %v1912_v11 }
  0x16   :  { %1844 = vmatmul.mubr.msk.bf16.gmra.mrb[8].mxu0 %vm372_vm1, %v1913_v12  ;;  %1876 = vmatmul.mubr.msk.bf16.gmra.mrb[8].mxu1 %vm372_vm1, %v1914_v13 }
  0x17   :  { %1847 = vmatprep.mubr.msk.bf16.mxu0 %vm372_vm1, %v1915_v14  ;;  %1879 = vmatprep.mubr.msk.bf16.mxu1 %vm372_vm1, %v1916_v15 }
  0x1e   :  { %1848 = vmatmul.mubr.msk.bf16.gmra.mrb[12].mxu0 %vm372_vm1, %v1917_v16  ;;  %1880 = vmatmul.mubr.msk.bf16.gmra.mrb[12].mxu1 %vm372_vm1, %v1918_v17 }
  0x1f   :  { %1851 = vmatprep.mubr.msk.bf16.mxu0 %vm372_vm1, %v1919_v18  ;;  %1883 = vmatprep.mubr.msk.bf16.mxu1 %vm372_vm1, %v1920_v19 }
  0x26   :  { %1852 = vmatmul.mubr.msk.bf16.gmra.mrb[16].mxu0 %vm372_vm1, %v1921_v20  ;;  %1884 = vmatmul.mubr.msk.bf16.gmra.mrb[16].mxu1 %vm372_vm1, %v1922_v21 }
  0x27   :  { %1855 = vmatprep.mubr.msk.bf16.mxu0 %vm372_vm1, %v1923_v22  ;;  %1887 = vmatprep.mubr.msk.bf16.mxu1 %vm372_vm1, %v1924_v23 }
  0x2e   :  { %1856 = vmatmul.mubr.msk.bf16.gmra.mrb[20].mxu0 %vm372_vm1, %v1925_v24  ;;  %1888 = vmatmul.mubr.msk.bf16.gmra.mrb[20].mxu1 %vm372_vm1, %v1926_v25 }
  0x2f   :  { %1859 = vmatprep.mubr.msk.bf16.mxu0 %vm372_vm1, %v1927_v26  ;;  %1891 = vmatprep.mubr.msk.bf16.mxu1 %vm372_vm1, %v1928_v27 }
  0x36   :  { %1860 = vmatmul.mubr.msk.bf16.gmra.mrb[24].mxu0 %vm372_vm1, %v1929_v28  ;;  %1892 = vmatmul.mubr.msk.bf16.gmra.mrb[24].mxu1 %vm372_vm1, %v1930_v29 }
  0x37   :  { %1863 = vmatprep.mubr.msk.bf16.mxu0 %vm372_vm1, %v1931_v30  ;;  %1895 = vmatprep.mubr.msk.bf16.mxu1 %vm372_vm1, %v1932_v31 }
  0x3e   :  { %1864 = vmatmul.mubr.msk.bf16.gmra.mrb[28].mxu0 %vm372_vm1, %v1933_v32  ;;  %1896 = vmatmul.mubr.msk.bf16.gmra.mrb[28].mxu1 %vm372_vm1, %v1934_v33 }
  0xd9   :  { %v1837_v35 = vpop.f32.mrb[0].mxu0  ;;  %v1869_v37 = vpop.f32.mrb[0].mxu1 }
  0xda   :  { %v966_v36 = vadd.f32 %v1837_v35, %v2089_v34  ;;  %v507_v38 = vpop.f32.mrb[1].mxu0  ;;  %v998_v39 = vadd.f32 %v1869_v37, %v2089_v34  ;;  %v635_v41 = vpop.f32.mrb[1].mxu1 }
  0xdb   :  { %v964_v40 = vadd.f32 %v2089_v34, %v507_v38  ;;  %v1838_v42 = vpop.f32.mrb[2].mxu0  ;;  %v996_v43 = vadd.f32 %v2089_v34, %v635_v41  ;;  %v1870_v45 = vpop.f32.mrb[2].mxu1 }
  0xdc   :  { %v967_v44 = vadd.f32 %v1838_v42, %v2089_v34  ;;  %v510_v46 = vpop.f32.mrb[3].mxu0  ;;  %v999_v47 = vadd.f32 %v1870_v45, %v2089_v34  ;;  %v638_v49 = vpop.f32.mrb[3].mxu1  ;;  %v1030_v50 = vmax.f32 %v966_v36, 0.0  ;;  %v1062_v53 = vmax.f32 %v998_v39, 0.0 }
  0xdd   :  { %v965_v48 = vadd.f32 %v2089_v34, %v510_v46  ;;  %v997_v52 = vadd.f32 %v2089_v34, %v638_v49  ;;  %v1028_v54 = vmax.f32 %v964_v40, 0.0  ;;  %v1060_v57 = vmax.f32 %v996_v43, 0.0 }
  0xde   :  { %v1031_v51 = vmax.f32 %v967_v44, 0.0  ;;  %v1063_v55 = vmax.f32 %v999_v47, 0.0 }
  0xdf   :  { %v1029_v56 = vmax.f32 %v965_v48, 0.0  ;;  %v1061_v59 = vmax.f32 %v997_v52, 0.0 }
  0xe0   :  { %v1617_v58 = vpack.c.bf16 %v1031_v51, %v1030_v50  ;;  %v1697_v60 = vpack.c.bf16 %v1063_v55, %v1062_v53 }
  0xe1   :  { %v1612_v61 = vpack.c.bf16 %v1029_v56, %v1028_v54  ;;  %v1841_v62 = vpop.f32.mrb[4].mxu0  ;;  %v1692_v63 = vpack.c.bf16 %v1061_v59, %v1060_v57  ;;  %v1873_v1 = vpop.f32.mrb[4].mxu1 }
  0xe2   :  { %1769 = vst [vmem:[%s2254_s3 + $0x8] sm:$0xff] %v1617_v58   ;;  %v970_v0 = vadd.f32 %v1841_v62, %v2089_v34  ;;  %v523_v2 = vpop.f32.mrb[5].mxu0  ;;  %1785 = vst [vmem:[%s2254_s3 + $0x88] sm:$0xff] %v1697_v60   ;;  %v1002_v3 = vadd.f32 %v1873_v1, %v2089_v34  ;;  %v651_v5 = vpop.f32.mrb[5].mxu1 }
  0xe3   :  { %1613 = vst [vmem:[%s2254_s3] sm:$0xff] %v1612_v61   ;;  %v968_v4 = vadd.f32 %v2089_v34, %v523_v2  ;;  %v1842_v6 = vpop.f32.mrb[6].mxu0  ;;  %1784 = vst [vmem:[%s2254_s3 + $0x80] sm:$0xff] %v1692_v63   ;;  %v1000_v7 = vadd.f32 %v2089_v34, %v651_v5  ;;  %v1874_v9 = vpop.f32.mrb[6].mxu1 }
  0xe4   :  { %v971_v8 = vadd.f32 %v1842_v6, %v2089_v34  ;;  %v526_v10 = vpop.f32.mrb[7].mxu0  ;;  %v1003_v11 = vadd.f32 %v1874_v9, %v2089_v34  ;;  %v654_v13 = vpop.f32.mrb[7].mxu1  ;;  %v1034_v14 = vmax.f32 %v970_v0, 0.0  ;;  %v1066_v17 = vmax.f32 %v1002_v3, 0.0 }
  0xe5   :  { %v969_v12 = vadd.f32 %v2089_v34, %v526_v10  ;;  %v1001_v16 = vadd.f32 %v2089_v34, %v654_v13  ;;  %v1032_v18 = vmax.f32 %v968_v4, 0.0  ;;  %v1064_v21 = vmax.f32 %v1000_v7, 0.0 }
  0xe6   :  { %v1035_v15 = vmax.f32 %v971_v8, 0.0  ;;  %v1067_v19 = vmax.f32 %v1003_v11, 0.0 }
  0xe7   :  { %v1033_v20 = vmax.f32 %v969_v12, 0.0  ;;  %v1065_v23 = vmax.f32 %v1001_v16, 0.0 }
  0xe8   :  { %v1627_v22 = vpack.c.bf16 %v1035_v15, %v1034_v14  ;;  %v1707_v24 = vpack.c.bf16 %v1067_v19, %v1066_v17 }
  0xe9   :  { %v1622_v25 = vpack.c.bf16 %v1033_v20, %v1032_v18  ;;  %v1845_v26 = vpop.f32.mrb[8].mxu0  ;;  %v1702_v27 = vpack.c.bf16 %v1065_v23, %v1064_v21  ;;  %v1877_v29 = vpop.f32.mrb[8].mxu1 }
  0xea   :  { %1771 = vst [vmem:[%s2254_s3 + $0x18] sm:$0xff] %v1627_v22   ;;  %v974_v28 = vadd.f32 %v1845_v26, %v2089_v34  ;;  %v539_v30 = vpop.f32.mrb[9].mxu0  ;;  %1787 = vst [vmem:[%s2254_s3 + $0x98] sm:$0xff] %v1707_v24   ;;  %v1006_v31 = vadd.f32 %v1877_v29, %v2089_v34  ;;  %v667_v33 = vpop.f32.mrb[9].mxu1 }
  0xeb   :  { %1770 = vst [vmem:[%s2254_s3 + $0x10] sm:$0xff] %v1622_v25   ;;  %v972_v32 = vadd.f32 %v2089_v34, %v539_v30  ;;  %v1846_v35 = vpop.f32.mrb[10].mxu0  ;;  %1786 = vst [vmem:[%s2254_s3 + $0x90] sm:$0xff] %v1702_v27   ;;  %v1004_v36 = vadd.f32 %v2089_v34, %v667_v33  ;;  %v1878_v38 = vpop.f32.mrb[10].mxu1 }
  0xec   :  { %v975_v37 = vadd.f32 %v1846_v35, %v2089_v34  ;;  %v542_v39 = vpop.f32.mrb[11].mxu0  ;;  %v1007_v40 = vadd.f32 %v1878_v38, %v2089_v34  ;;  %v670_v42 = vpop.f32.mrb[11].mxu1  ;;  %v1038_v43 = vmax.f32 %v974_v28, 0.0  ;;  %v1070_v46 = vmax.f32 %v1006_v31, 0.0 }
  0xed   :  { %v973_v41 = vadd.f32 %v2089_v34, %v542_v39  ;;  %v1005_v45 = vadd.f32 %v2089_v34, %v670_v42  ;;  %v1036_v47 = vmax.f32 %v972_v32, 0.0  ;;  %v1068_v50 = vmax.f32 %v1004_v36, 0.0 }
  0xee   :  { %v1039_v44 = vmax.f32 %v975_v37, 0.0  ;;  %v1071_v48 = vmax.f32 %v1007_v40, 0.0 }
  0xef   :  { %v1037_v49 = vmax.f32 %v973_v41, 0.0  ;;  %v1069_v52 = vmax.f32 %v1005_v45, 0.0 }
  0xf0   :  { %v1637_v51 = vpack.c.bf16 %v1039_v44, %v1038_v43  ;;  %v1717_v53 = vpack.c.bf16 %v1071_v48, %v1070_v46 }
  0xf1   :  { %v1632_v54 = vpack.c.bf16 %v1037_v49, %v1036_v47  ;;  %v1849_v55 = vpop.f32.mrb[12].mxu0  ;;  %v1712_v56 = vpack.c.bf16 %v1069_v52, %v1068_v50  ;;  %v1881_v58 = vpop.f32.mrb[12].mxu1 }
  0xf2   :  { %1773 = vst [vmem:[%s2254_s3 + $0x28] sm:$0xff] %v1637_v51   ;;  %v978_v57 = vadd.f32 %v1849_v55, %v2089_v34  ;;  %v555_v59 = vpop.f32.mrb[13].mxu0  ;;  %1789 = vst [vmem:[%s2254_s3 + $0xa8] sm:$0xff] %v1717_v53   ;;  %v1010_v60 = vadd.f32 %v1881_v58, %v2089_v34  ;;  %v683_v62 = vpop.f32.mrb[13].mxu1 }
  0xf3   :  { %1772 = vst [vmem:[%s2254_s3 + $0x20] sm:$0xff] %v1632_v54   ;;  %v976_v61 = vadd.f32 %v2089_v34, %v555_v59  ;;  %v1850_v63 = vpop.f32.mrb[14].mxu0  ;;  %1788 = vst [vmem:[%s2254_s3 + $0xa0] sm:$0xff] %v1712_v56   ;;  %v1008_v0 = vadd.f32 %v2089_v34, %v683_v62  ;;  %v1882_v2 = vpop.f32.mrb[14].mxu1 }
  0xf4   :  { %v979_v1 = vadd.f32 %v1850_v63, %v2089_v34  ;;  %v558_v3 = vpop.f32.mrb[15].mxu0  ;;  %v1011_v4 = vadd.f32 %v1882_v2, %v2089_v34  ;;  %v686_v6 = vpop.f32.mrb[15].mxu1  ;;  %v1042_v7 = vmax.f32 %v978_v57, 0.0  ;;  %v1074_v10 = vmax.f32 %v1010_v60, 0.0 }
  0xf5   :  { %v977_v5 = vadd.f32 %v2089_v34, %v558_v3  ;;  %v1009_v9 = vadd.f32 %v2089_v34, %v686_v6  ;;  %v1040_v11 = vmax.f32 %v976_v61, 0.0  ;;  %v1072_v14 = vmax.f32 %v1008_v0, 0.0 }
  0xf6   :  { %v1043_v8 = vmax.f32 %v979_v1, 0.0  ;;  %v1075_v12 = vmax.f32 %v1011_v4, 0.0 }
  0xf7   :  { %v1041_v13 = vmax.f32 %v977_v5, 0.0  ;;  %v1073_v16 = vmax.f32 %v1009_v9, 0.0 }
  0xf8   :  { %v1647_v15 = vpack.c.bf16 %v1043_v8, %v1042_v7  ;;  %v1727_v17 = vpack.c.bf16 %v1075_v12, %v1074_v10 }
  0xf9   :  { %v1642_v18 = vpack.c.bf16 %v1041_v13, %v1040_v11  ;;  %v1853_v19 = vpop.f32.mrb[16].mxu0  ;;  %v1722_v20 = vpack.c.bf16 %v1073_v16, %v1072_v14  ;;  %v1885_v22 = vpop.f32.mrb[16].mxu1 }
  0xfa   :  { %1775 = vst [vmem:[%s2254_s3 + $0x38] sm:$0xff] %v1647_v15   ;;  %v982_v21 = vadd.f32 %v1853_v19, %v2089_v34  ;;  %v571_v23 = vpop.f32.mrb[17].mxu0  ;;  %1791 = vst [vmem:[%s2254_s3 + $0xb8] sm:$0xff] %v1727_v17   ;;  %v1014_v24 = vadd.f32 %v1885_v22, %v2089_v34  ;;  %v699_v26 = vpop.f32.mrb[17].mxu1 }
  0xfb   :  { %1774 = vst [vmem:[%s2254_s3 + $0x30] sm:$0xff] %v1642_v18   ;;  %v980_v25 = vadd.f32 %v2089_v34, %v571_v23  ;;  %v1854_v27 = vpop.f32.mrb[18].mxu0  ;;  %1790 = vst [vmem:[%s2254_s3 + $0xb0] sm:$0xff] %v1722_v20   ;;  %v1012_v28 = vadd.f32 %v2089_v34, %v699_v26  ;;  %v1886_v30 = vpop.f32.mrb[18].mxu1 }
  0xfc   :  { %v983_v29 = vadd.f32 %v1854_v27, %v2089_v34  ;;  %v574_v31 = vpop.f32.mrb[19].mxu0  ;;  %v1015_v32 = vadd.f32 %v1886_v30, %v2089_v34  ;;  %v702_v35 = vpop.f32.mrb[19].mxu1  ;;  %v1046_v36 = vmax.f32 %v982_v21, 0.0  ;;  %v1078_v39 = vmax.f32 %v1014_v24, 0.0 }
  0xfd   :  { %v981_v33 = vadd.f32 %v2089_v34, %v574_v31  ;;  %v1013_v38 = vadd.f32 %v2089_v34, %v702_v35  ;;  %v1044_v40 = vmax.f32 %v980_v25, 0.0  ;;  %v1076_v43 = vmax.f32 %v1012_v28, 0.0 }
  0xfe   :  { %v1047_v37 = vmax.f32 %v983_v29, 0.0  ;;  %v1079_v41 = vmax.f32 %v1015_v32, 0.0 }
  0xff   :  { %v1045_v42 = vmax.f32 %v981_v33, 0.0  ;;  %v1077_v45 = vmax.f32 %v1013_v38, 0.0 }
 0x100   :  { %v1657_v44 = vpack.c.bf16 %v1047_v37, %v1046_v36  ;;  %v1737_v46 = vpack.c.bf16 %v1079_v41, %v1078_v39 }
 0x101   :  { %v1652_v47 = vpack.c.bf16 %v1045_v42, %v1044_v40  ;;  %v1857_v48 = vpop.f32.mrb[20].mxu0  ;;  %v1732_v49 = vpack.c.bf16 %v1077_v45, %v1076_v43  ;;  %v1889_v51 = vpop.f32.mrb[20].mxu1 }
 0x102   :  { %1777 = vst [vmem:[%s2254_s3 + $0x48] sm:$0xff] %v1657_v44   ;;  %v986_v50 = vadd.f32 %v1857_v48, %v2089_v34  ;;  %v587_v52 = vpop.f32.mrb[21].mxu0  ;;  %1793 = vst [vmem:[%s2254_s3 + $0xc8] sm:$0xff] %v1737_v46   ;;  %v1018_v53 = vadd.f32 %v1889_v51, %v2089_v34  ;;  %v715_v55 = vpop.f32.mrb[21].mxu1 }
 0x103   :  { %1776 = vst [vmem:[%s2254_s3 + $0x40] sm:$0xff] %v1652_v47   ;;  %v984_v54 = vadd.f32 %v2089_v34, %v587_v52  ;;  %v1858_v56 = vpop.f32.mrb[22].mxu0  ;;  %1792 = vst [vmem:[%s2254_s3 + $0xc0] sm:$0xff] %v1732_v49   ;;  %v1016_v57 = vadd.f32 %v2089_v34, %v715_v55  ;;  %v1890_v59 = vpop.f32.mrb[22].mxu1 }
 0x104   :  { %v987_v58 = vadd.f32 %v1858_v56, %v2089_v34  ;;  %v590_v60 = vpop.f32.mrb[23].mxu0  ;;  %v1019_v61 = vadd.f32 %v1890_v59, %v2089_v34  ;;  %v718_v63 = vpop.f32.mrb[23].mxu1  ;;  %v1050_v0 = vmax.f32 %v986_v50, 0.0  ;;  %v1082_v3 = vmax.f32 %v1018_v53, 0.0 }
 0x105   :  { %v985_v62 = vadd.f32 %v2089_v34, %v590_v60  ;;  %v1017_v2 = vadd.f32 %v2089_v34, %v718_v63  ;;  %v1048_v4 = vmax.f32 %v984_v54, 0.0  ;;  %v1080_v7 = vmax.f32 %v1016_v57, 0.0 }
 0x106   :  { %v1051_v1 = vmax.f32 %v987_v58, 0.0  ;;  %v1083_v5 = vmax.f32 %v1019_v61, 0.0 }
 0x107   :  { %v1049_v6 = vmax.f32 %v985_v62, 0.0  ;;  %v1081_v9 = vmax.f32 %v1017_v2, 0.0 }
 0x108   :  { %v1667_v8 = vpack.c.bf16 %v1051_v1, %v1050_v0  ;;  %v1747_v10 = vpack.c.bf16 %v1083_v5, %v1082_v3 }
 0x109   :  { %v1662_v11 = vpack.c.bf16 %v1049_v6, %v1048_v4  ;;  %v1861_v12 = vpop.f32.mrb[24].mxu0  ;;  %v1742_v13 = vpack.c.bf16 %v1081_v9, %v1080_v7  ;;  %v1893_v15 = vpop.f32.mrb[24].mxu1 }
 0x10a   :  { %1779 = vst [vmem:[%s2254_s3 + $0x58] sm:$0xff] %v1667_v8   ;;  %v990_v14 = vadd.f32 %v1861_v12, %v2089_v34  ;;  %v603_v16 = vpop.f32.mrb[25].mxu0  ;;  %1795 = vst [vmem:[%s2254_s3 + $0xd8] sm:$0xff] %v1747_v10   ;;  %v1022_v17 = vadd.f32 %v1893_v15, %v2089_v34  ;;  %v731_v19 = vpop.f32.mrb[25].mxu1 }
 0x10b   :  { %1778 = vst [vmem:[%s2254_s3 + $0x50] sm:$0xff] %v1662_v11   ;;  %v988_v18 = vadd.f32 %v2089_v34, %v603_v16  ;;  %v1862_v20 = vpop.f32.mrb[26].mxu0  ;;  %1794 = vst [vmem:[%s2254_s3 + $0xd0] sm:$0xff] %v1742_v13   ;;  %v1020_v21 = vadd.f32 %v2089_v34, %v731_v19  ;;  %v1894_v23 = vpop.f32.mrb[26].mxu1 }
 0x10c   :  { %v991_v22 = vadd.f32 %v1862_v20, %v2089_v34  ;;  %v606_v24 = vpop.f32.mrb[27].mxu0  ;;  %v1023_v25 = vadd.f32 %v1894_v23, %v2089_v34  ;;  %v734_v27 = vpop.f32.mrb[27].mxu1  ;;  %v1054_v28 = vmax.f32 %v990_v14, 0.0  ;;  %v1086_v31 = vmax.f32 %v1022_v17, 0.0 }
 0x10d   :  { %v989_v26 = vadd.f32 %v2089_v34, %v606_v24  ;;  %v1021_v30 = vadd.f32 %v2089_v34, %v734_v27  ;;  %v1052_v32 = vmax.f32 %v988_v18, 0.0  ;;  %v1084_v36 = vmax.f32 %v1020_v21, 0.0 }
 0x10e   :  { %v1055_v29 = vmax.f32 %v991_v22, 0.0  ;;  %v1087_v33 = vmax.f32 %v1023_v25, 0.0 }
 0x10f   :  { %v1053_v35 = vmax.f32 %v989_v26, 0.0  ;;  %v1085_v38 = vmax.f32 %v1021_v30, 0.0 }
 0x110   :  { %v1677_v37 = vpack.c.bf16 %v1055_v29, %v1054_v28  ;;  %v1757_v39 = vpack.c.bf16 %v1087_v33, %v1086_v31 }
 0x111   :  { %v1672_v40 = vpack.c.bf16 %v1053_v35, %v1052_v32  ;;  %v1865_v41 = vpop.f32.mrb[28].mxu0  ;;  %v1752_v42 = vpack.c.bf16 %v1085_v38, %v1084_v36  ;;  %v1897_v44 = vpop.f32.mrb[28].mxu1 }
 0x112   :  { %1781 = vst [vmem:[%s2254_s3 + $0x68] sm:$0xff] %v1677_v37   ;;  %v994_v43 = vadd.f32 %v1865_v41, %v2089_v34  ;;  %v619_v45 = vpop.f32.mrb[29].mxu0  ;;  %1797 = vst [vmem:[%s2254_s3 + $0xe8] sm:$0xff] %v1757_v39   ;;  %v1026_v46 = vadd.f32 %v1897_v44, %v2089_v34  ;;  %v747_v48 = vpop.f32.mrb[29].mxu1 }
 0x113   :  { %1780 = vst [vmem:[%s2254_s3 + $0x60] sm:$0xff] %v1672_v40   ;;  %v992_v47 = vadd.f32 %v2089_v34, %v619_v45  ;;  %v1866_v49 = vpop.f32.mrb[30].mxu0  ;;  %1796 = vst [vmem:[%s2254_s3 + $0xe0] sm:$0xff] %v1752_v42   ;;  %v1024_v50 = vadd.f32 %v2089_v34, %v747_v48  ;;  %v1898_v52 = vpop.f32.mrb[30].mxu1 }
 0x114   :  { %v995_v51 = vadd.f32 %v1866_v49, %v2089_v34  ;;  %v622_v53 = vpop.f32.mrb[31].mxu0  ;;  %v1027_v54 = vadd.f32 %v1898_v52, %v2089_v34  ;;  %v750_v56 = vpop.f32.mrb[31].mxu1  ;;  %v1058_v57 = vmax.f32 %v994_v43, 0.0  ;;  %v1090_v60 = vmax.f32 %v1026_v46, 0.0 }
 0x115   :  { %v993_v55 = vadd.f32 %v2089_v34, %v622_v53  ;;  %v1025_v59 = vadd.f32 %v2089_v34, %v750_v56  ;;  %v1056_v61 = vmax.f32 %v992_v47, 0.0  ;;  %v1088_v0 = vmax.f32 %v1024_v50, 0.0 }
 0x116   :  { %v1059_v58 = vmax.f32 %v995_v51, 0.0  ;;  %v1091_v62 = vmax.f32 %v1027_v54, 0.0 }
 0x117   :  { %v1057_v63 = vmax.f32 %v993_v55, 0.0  ;;  %v1089_v2 = vmax.f32 %v1025_v59, 0.0 }
 0x118   :  { %v1687_v1 = vpack.c.bf16 %v1059_v58, %v1058_v57  ;;  %v1767_v3 = vpack.c.bf16 %v1091_v62, %v1090_v60 }
 0x119   :  { %v1682_v4 = vpack.c.bf16 %v1057_v63, %v1056_v61  ;;  %v1762_v5 = vpack.c.bf16 %v1089_v2, %v1088_v0 }
 0x11a   :  { %1783 = vst [vmem:[%s2254_s3 + $0x78] sm:$0xff] %v1687_v1   ;;  %1799 = vst [vmem:[%s2254_s3 + $0xf8] sm:$0xff] %v1767_v3  }
 0x11b   :  { %1782 = vst [vmem:[%s2254_s3 + $0x70] sm:$0xff] %v1682_v4   ;;  %1798 = vst [vmem:[%s2254_s3 + $0xf0] sm:$0xff] %v1762_v5  }

// kernel: head_forward.19
= control target key start
LH: loop header
LB: loop body
LE: loop exit
PB: predicated region body
PF: predicated region fallthrough
CT: control target
= control target key end

     0   :  { %s596_s1 = inlined_call_operand.vmem [shape: bf16[256,128], index: 1, kind: input, shape index: {}]   ;;  %s597_s0 = inlined_call_operand.vmem [shape: bf16[72,256], index: 0, kind: input, shape index: {}]   ;;  %s598_s2 = inlined_call_operand.vmem [shape: f32[1,128], index: 2, kind: input, shape index: {}]   ;;  %s599_s3 = inlined_call_operand.vmem [shape: f32[72,128], index: 3, kind: output, shape index: {}]  }
   0x1   :  { %v441_v0 = vld [vmem:[%s596_s1 + $0x40] sm:$0xff]   ;;  %v443_v2 = vld [vmem:[%s596_s1 + $0x48] sm:$0xff]   ;;  %v445_v4 = vld [vmem:[%s596_s1 + $0x50] sm:$0xff]  }
   0x2   :  { %v442_v1 = vld [vmem:[%s596_s1] sm:$0xff]   ;;  %379 = vmatprep.subr.bf16.mxu0 %v441_v0  ;;  %425 = vmatprep.subr.bf16.mxu1 %v441_v0  ;;  %v444_v3 = vld [vmem:[%s596_s1 + $0x8] sm:$0xff]   ;;  %v446_v5 = vld [vmem:[%s596_s1 + $0x10] sm:$0xff]  }
   0x3   :  { %380 = vmatpush3.bf16.msra.mxu0 %v442_v1  ;;  %433 = vmatpush3.bf16.msra.mxu1 %v442_v1  ;;  %v447_v6 = vld [vmem:[%s596_s1 + $0x58] sm:$0xff]   ;;  %v449_v8 = vld [vmem:[%s596_s1 + $0x60] sm:$0xff]   ;;  %v451_v10 = vld [vmem:[%s596_s1 + $0x68] sm:$0xff]  }
   0x4   :  { %381 = vmatprep.subr.bf16.mxu0 %v443_v2  ;;  %426 = vmatprep.subr.bf16.mxu1 %v443_v2  ;;  %v448_v7 = vld [vmem:[%s596_s1 + $0x18] sm:$0xff]   ;;  %v450_v9 = vld [vmem:[%s596_s1 + $0x20] sm:$0xff]   ;;  %v452_v13 = vld [vmem:[%s596_s1 + $0x28] sm:$0xff]  }
   0x5   :  { %v459_v11 = vld [vmem:[%s597_s0 + $0x4] ss:$8 sps:$4 sm:$0xff]   ;;  %v462_v12 = vld [vmem:[%s597_s0 + $0x34] ss:$8 sps:$4 sm:$0xff]   ;;  %v457_v19 = vld [vmem:[%s597_s0] ss:$8 sps:$4 sm:$0xff]  }
   0x6   :  { %v453_v14 = vld [vmem:[%s596_s1 + $0x70] sm:$0xff]   ;;  %253 = vmatprep.mubr.bf16.mxu0 %v459_v11  ;;  %277 = vmatprep.mubr.bf16.mxu1 %v462_v12  ;;  %v455_v16 = vld [vmem:[%s596_s1 + $0x78] sm:$0xff]   ;;  %v45_v18 = vld [vmem:[%s597_s0 + $0x40] sm:$0xff] }
   0x7   :  { %382 = vmatpush3.bf16.msra.mxu0 %v444_v3  ;;  %434 = vmatpush3.bf16.msra.mxu1 %v444_v3  ;;  %v454_v15 = vld [vmem:[%s596_s1 + $0x30] sm:$0xff]   ;;  %v456_v17 = vld [vmem:[%s596_s1 + $0x38] sm:$0xff]   ;;  %v361_v22 = vcombine.high %v45_v18, %v45_v18  ;;  %v360_v24 = vcombine.low %v45_v18, %v45_v18  ;;  %v467_v25 = vld [vmem:[%s597_s0 + $0x24] ss:$8 sps:$4 sm:$0xff]  }
   0x8   :  { %383 = vmatprep.subr.bf16.mxu0 %v445_v4  ;;  %427 = vmatprep.subr.bf16.mxu1 %v445_v4  ;;  %v460_v20 = vld [vmem:[%s597_s0 + $0x30] ss:$8 sps:$4 sm:$0xff]   ;;  %v463_v21 = vld [vmem:[%s597_s0 + $0x14] ss:$8 sps:$4 sm:$0xff]   ;;  %v470_v26 = vld [vmem:[%s597_s0 + $0x20] ss:$8 sps:$4 sm:$0xff]  }
   0x9   :  { %v465_v23 = vld [vmem:[%s597_s0 + $0x10] ss:$8 sps:$4 sm:$0xff]   ;;  %v378_v30 = vld [vmem:[%s598_s2] ss:$0 sm:$0xff] }
   0xb   :  { %384 = vmatpush3.bf16.msra.mxu0 %v446_v5  ;;  %435 = vmatpush3.bf16.msra.mxu1 %v446_v5 }
   0xc   :  { %385 = vmatprep.subr.bf16.mxu0 %v447_v6  ;;  %428 = vmatprep.subr.bf16.mxu1 %v447_v6 }
   0xf   :  { %386 = vmatpush3.bf16.msra.mxu0 %v448_v7  ;;  %436 = vmatpush3.bf16.msra.mxu1 %v448_v7 }
  0x10   :  { %387 = vmatprep.subr.bf16.mxu0 %v449_v8  ;;  %429 = vmatprep.subr.bf16.mxu1 %v449_v8 }
  0x13   :  { %388 = vmatpush3.bf16.msra.mxu0 %v450_v9  ;;  %437 = vmatpush3.bf16.msra.mxu1 %v450_v9 }
  0x14   :  { %389 = vmatprep.subr.bf16.mxu0 %v451_v10  ;;  %430 = vmatprep.subr.bf16.mxu1 %v451_v10 }
  0x17   :  { %390 = vmatpush3.bf16.msra.mxu0 %v452_v13  ;;  %438 = vmatpush3.bf16.msra.mxu1 %v452_v13 }
  0x18   :  { %391 = vmatprep.subr.bf16.mxu0 %v453_v14  ;;  %431 = vmatprep.subr.bf16.mxu1 %v453_v14 }
  0x1b   :  { %392 = vmatpush3.bf16.msra.mxu0 %v454_v15  ;;  %439 = vmatpush3.bf16.msra.mxu1 %v454_v15 }
  0x1c   :  { %393 = vmatprep.subr.bf16.mxu0 %v455_v16  ;;  %432 = vmatprep.subr.bf16.mxu1 %v455_v16 }
  0x1f   :  { %394 = vmatpush3.bf16.msra.mxu0 %v456_v17  ;;  %440 = vmatpush3.bf16.msra.mxu1 %v456_v17 }
  0x22   :  { %254 = vmatmul.mubr.bf16.vlgmr.msra.gmra.mrb[0].mxu0 %v457_v19  ;;  %278 = vmatmul.mubr.bf16.vlgmr.msra.gmra.mrb[0].mxu1 %v460_v20 }
  0x23   :  { %261 = vmatprep.mubr.bf16.mxu0 %v463_v21  ;;  %285 = vmatprep.mubr.bf16.mxu1 %v361_v22 }
  0x2a   :  { %262 = vmatmul.mubr.bf16.gmra.mrb[4].mxu0 %v465_v23  ;;  %286 = vmatmul.mubr.bf16.gmra.mrb[4].mxu1 %v360_v24 }
  0x2b   :  { %269 = vmatprep.mubr.bf16.mxu0 %v467_v25 }
  0x32   :  { %270 = vmatmul.mubr.bf16.gmra.mrb[8].mxu0 %v470_v26 }
  0xf5   :  { %v395_v27 = vpop.f32.mrb[0].mxu0  ;;  %v413_v28 = vpop.f32.mrb[0].mxu1 }
  0xf6   :  { %v396_v29 = vpop.f32.mrb[1].mxu0  ;;  %v414_v31 = vpop.f32.mrb[1].mxu1 }
  0xf7   :  { %v397_v32 = vadd.f32 %v396_v29, %v395_v27  ;;  %v398_v33 = vpop.f32.mrb[2].mxu0  ;;  %v415_v34 = vadd.f32 %v414_v31, %v413_v28  ;;  %v416_v35 = vpop.f32.mrb[2].mxu1 }
  0xf8   :  { %v399_v36 = vpop.f32.mrb[3].mxu0  ;;  %v417_v37 = vpop.f32.mrb[3].mxu1 }
  0xf9   :  { %v330_v38 = vadd.f32 %v397_v32, %v378_v30  ;;  %v400_v39 = vadd.f32 %v399_v36, %v398_v33  ;;  %v336_v40 = vadd.f32 %v415_v34, %v378_v30  ;;  %v418_v41 = vadd.f32 %v417_v37, %v416_v35 }
  0xfb   :  { %339 = vst [vmem:[%s599_s3] sm:$0xff] %v330_v38  ;;  %v331_v42 = vadd.f32 %v400_v39, %v378_v30  ;;  %345 = vst [vmem:[%s599_s3 + $0x30] sm:$0xff] %v336_v40  ;;  %v337_v43 = vadd.f32 %v418_v41, %v378_v30 }
  0xfd   :  { %340 = vst [vmem:[%s599_s3 + $0x8] sm:$0xff] %v331_v42  ;;  %v401_v44 = vpop.f32.mrb[4].mxu0  ;;  %346 = vst [vmem:[%s599_s3 + $0x38] sm:$0xff] %v337_v43  ;;  %v419_v45 = vpop.f32.mrb[4].mxu1 }
  0xfe   :  { %v402_v46 = vpop.f32.mrb[5].mxu0  ;;  %v420_v47 = vpop.f32.mrb[5].mxu1 }
  0xff   :  { %v403_v48 = vadd.f32 %v402_v46, %v401_v44  ;;  %v404_v49 = vpop.f32.mrb[6].mxu0  ;;  %v421_v50 = vadd.f32 %v420_v47, %v419_v45  ;;  %v422_v51 = vpop.f32.mrb[6].mxu1 }
 0x100   :  { %v405_v52 = vpop.f32.mrb[7].mxu0  ;;  %v423_v53 = vpop.f32.mrb[7].mxu1 }
 0x101   :  { %v332_v54 = vadd.f32 %v403_v48, %v378_v30  ;;  %v406_v55 = vadd.f32 %v405_v52, %v404_v49  ;;  %v338_v56 = vadd.f32 %v421_v50, %v378_v30 }
 0x103   :  { %341 = vst [vmem:[%s599_s3 + $0x10] sm:$0xff] %v332_v54  ;;  %v333_v57 = vadd.f32 %v406_v55, %v378_v30  ;;  %347 = vst [vmem:[%s599_s3 + $0x40] sm:$0xff] %v338_v56 }
 0x105   :  { %342 = vst [vmem:[%s599_s3 + $0x18] sm:$0xff] %v333_v57  ;;  %v407_v58 = vpop.f32.mrb[8].mxu0 }
 0x106   :  { %v408_v59 = vpop.f32.mrb[9].mxu0 }
 0x107   :  { %v409_v60 = vadd.f32 %v408_v59, %v407_v58  ;;  %v410_v61 = vpop.f32.mrb[10].mxu0 }
 0x108   :  { %v411_v62 = vpop.f32.mrb[11].mxu0 }
 0x109   :  { %v334_v63 = vadd.f32 %v409_v60, %v378_v30  ;;  %v412_v0 = vadd.f32 %v411_v62, %v410_v61 }
 0x10b   :  { %343 = vst [vmem:[%s599_s3 + $0x20] sm:$0xff] %v334_v63  ;;  %v335_v1 = vadd.f32 %v412_v0, %v378_v30 }
 0x10d   :  { %344 = vst [vmem:[%s599_s3 + $0x28] sm:$0xff] %v335_v1 }

// kernel: head_forward.18
= control target key start
LH: loop header
LB: loop body
LE: loop exit
PB: predicated region body
PF: predicated region fallthrough
CT: control target
= control target key end

     0   :  { %vm2718_vm0 = vcmask 392192   ;;  %s6568_s1 = inlined_call_operand.vmem [shape: bf16[2736,256], index: 1, kind: input, shape index: {}]   ;;  %s6569_s0 = inlined_call_operand.vmem [shape: bf16[72,2736], index: 0, kind: input, shape index: {}]   ;;  %s6570_s2 = inlined_call_operand.vmem [shape: f32[1,256], index: 2, kind: input, shape index: {}]   ;;  %s6571_s3 = inlined_call_operand.vmem [shape: bf16[72,256], index: 3, kind: output, shape index: {}]  }
   0x1   :  { %v4456_v0 = vld [vmem:[%s6568_s1 + $0x4] ss:$8 sps:$4 sm:$0xff]   ;;  %v4460_v2 = vld [vmem:[%s6568_s1] ss:$8 sps:$4 sm:$0xff]   ;;  %v4462_v4 = vld [vmem:[%s6568_s1 + $0x14] ss:$8 sps:$4 sm:$0xff]  }
   0x2   :  { %v4458_v1 = vld [vmem:[%s6568_s1 + $0x504] ss:$8 sps:$4 sm:$0xff]   ;;  %2734 = vmatprep.subr.bf16.mxu1 %v4456_v0  ;;  %v4461_v3 = vld [vmem:[%s6568_s1 + $0x500] ss:$8 sps:$4 sm:$0xff]   ;;  %v4464_v5 = vld [vmem:[%s6568_s1 + $0x514] ss:$8 sps:$4 sm:$0xff]  }
   0x3   :  { %3139 = vmatprep.subr.bf16.mxu0 %v4458_v1  ;;  %2735 = vmatpush1.bf16.msra.mxu1 %v4460_v2  ;;  %v4466_v6 = vld [vmem:[%s6568_s1 + $0x10] ss:$8 sps:$4 sm:$0xff]   ;;  %v4468_v8 = vld [vmem:[%s6568_s1 + $0x24] ss:$8 sps:$4 sm:$0xff]   ;;  %v4472_v10 = vld [vmem:[%s6568_s1 + $0x20] ss:$8 sps:$4 sm:$0xff]  }
   0x4   :  { %3140 = vmatpush1.bf16.msra.mxu0 %v4461_v3  ;;  %2736 = vmatprep.subr.bf16.mxu1 %v4462_v4  ;;  %v4467_v7 = vld [vmem:[%s6568_s1 + $0x510] ss:$8 sps:$4 sm:$0xff]   ;;  %v4470_v9 = vld [vmem:[%s6568_s1 + $0x524] ss:$8 sps:$4 sm:$0xff]   ;;  %v4473_v11 = vld [vmem:[%s6568_s1 + $0x520] ss:$8 sps:$4 sm:$0xff]  }
   0x5   :  { %3141 = vmatprep.subr.bf16.mxu0 %v4464_v5  ;;  %v4474_v12 = vld [vmem:[%s6568_s1 + $0x34] ss:$8 sps:$4 sm:$0xff]   ;;  %v4478_v14 = vld [vmem:[%s6568_s1 + $0x30] ss:$8 sps:$4 sm:$0xff]   ;;  %v4480_v16 = vld [vmem:[%s6568_s1 + $0x44] ss:$8 sps:$4 sm:$0xff]  }
   0x6   :  { %v4476_v13 = vld [vmem:[%s6568_s1 + $0x534] ss:$8 sps:$4 sm:$0xff]   ;;  %v4479_v15 = vld [vmem:[%s6568_s1 + $0x530] ss:$8 sps:$4 sm:$0xff]   ;;  %v4482_v17 = vld [vmem:[%s6568_s1 + $0x544] ss:$8 sps:$4 sm:$0xff]  }
   0x7   :  { %2737 = vmatpush1.bf16.msra.mxu1 %v4466_v6  ;;  %v4484_v18 = vld [vmem:[%s6568_s1 + $0x40] ss:$8 sps:$4 sm:$0xff]   ;;  %v4486_v20 = vld [vmem:[%s6568_s1 + $0x54] ss:$8 sps:$4 sm:$0xff]   ;;  %v4490_v22 = vld [vmem:[%s6568_s1 + $0x50] ss:$8 sps:$4 sm:$0xff]  }
   0x8   :  { %3142 = vmatpush1.bf16.msra.mxu0 %v4467_v7  ;;  %2738 = vmatprep.subr.bf16.mxu1 %v4468_v8  ;;  %v4485_v19 = vld [vmem:[%s6568_s1 + $0x540] ss:$8 sps:$4 sm:$0xff]   ;;  %v4488_v21 = vld [vmem:[%s6568_s1 + $0x554] ss:$8 sps:$4 sm:$0xff]   ;;  %v4491_v23 = vld [vmem:[%s6568_s1 + $0x550] ss:$8 sps:$4 sm:$0xff]  }
   0x9   :  { %3143 = vmatprep.subr.bf16.mxu0 %v4470_v9  ;;  %v4492_v24 = vld [vmem:[%s6568_s1 + $0x64] ss:$8 sps:$4 sm:$0xff]   ;;  %v4496_v26 = vld [vmem:[%s6568_s1 + $0x60] ss:$8 sps:$4 sm:$0xff]   ;;  %v4498_v28 = vld [vmem:[%s6568_s1 + $0x74] ss:$8 sps:$4 sm:$0xff]  }
   0xa   :  { %v4494_v25 = vld [vmem:[%s6568_s1 + $0x564] ss:$8 sps:$4 sm:$0xff]   ;;  %v4497_v27 = vld [vmem:[%s6568_s1 + $0x560] ss:$8 sps:$4 sm:$0xff]   ;;  %v4500_v29 = vld [vmem:[%s6568_s1 + $0x574] ss:$8 sps:$4 sm:$0xff]  }
   0xb   :  { %2739 = vmatpush1.bf16.msra.mxu1 %v4472_v10  ;;  %v4502_v30 = vld [vmem:[%s6568_s1 + $0x70] ss:$8 sps:$4 sm:$0xff]   ;;  %v4504_v32 = vld [vmem:[%s6568_s1 + $0x84] ss:$8 sps:$4 sm:$0xff]   ;;  %v4508_v34 = vld [vmem:[%s6568_s1 + $0x80] ss:$8 sps:$4 sm:$0xff]  }
   0xc   :  { %3144 = vmatpush1.bf16.msra.mxu0 %v4473_v11  ;;  %2740 = vmatprep.subr.bf16.mxu1 %v4474_v12  ;;  %v4503_v31 = vld [vmem:[%s6568_s1 + $0x570] ss:$8 sps:$4 sm:$0xff]   ;;  %v4506_v33 = vld [vmem:[%s6568_s1 + $0x584] ss:$8 sps:$4 sm:$0xff]   ;;  %v4509_v35 = vld [vmem:[%s6568_s1 + $0x580] ss:$8 sps:$4 sm:$0xff]  }
   0xd   :  { %3145 = vmatprep.subr.bf16.mxu0 %v4476_v13  ;;  %v4510_v36 = vld [vmem:[%s6568_s1 + $0x94] ss:$8 sps:$4 sm:$0xff]   ;;  %v4514_v38 = vld [vmem:[%s6568_s1 + $0x90] ss:$8 sps:$4 sm:$0xff]   ;;  %v4516_v40 = vld [vmem:[%s6568_s1 + $0xa4] ss:$8 sps:$4 sm:$0xff]  }
   0xe   :  { %v4512_v37 = vld [vmem:[%s6568_s1 + $0x594] ss:$8 sps:$4 sm:$0xff]   ;;  %v4515_v39 = vld [vmem:[%s6568_s1 + $0x590] ss:$8 sps:$4 sm:$0xff]   ;;  %v4518_v41 = vld [vmem:[%s6568_s1 + $0x5a4] ss:$8 sps:$4 sm:$0xff]  }
   0xf   :  { %2741 = vmatpush1.bf16.msra.mxu1 %v4478_v14  ;;  %v4520_v42 = vld [vmem:[%s6568_s1 + $0xa0] ss:$8 sps:$4 sm:$0xff]   ;;  %v4522_v44 = vld [vmem:[%s6568_s1 + $0xb4] ss:$8 sps:$4 sm:$0xff]   ;;  %v4526_v46 = vld [vmem:[%s6568_s1 + $0xb0] ss:$8 sps:$4 sm:$0xff]  }
  0x10   :  { %3146 = vmatpush1.bf16.msra.mxu0 %v4479_v15  ;;  %2742 = vmatprep.subr.bf16.mxu1 %v4480_v16  ;;  %v4521_v43 = vld [vmem:[%s6568_s1 + $0x5a0] ss:$8 sps:$4 sm:$0xff]   ;;  %v4524_v45 = vld [vmem:[%s6568_s1 + $0x5b4] ss:$8 sps:$4 sm:$0xff]   ;;  %v4527_v47 = vld [vmem:[%s6568_s1 + $0x5b0] ss:$8 sps:$4 sm:$0xff]  }
  0x11   :  { %3147 = vmatprep.subr.bf16.mxu0 %v4482_v17  ;;  %v4554_v48 = vld [vmem:[%s6569_s0 + $0x4] ss:$88 sps:$4 sm:$0xff]   ;;  %v4532_v52 = vld [vmem:[%s6568_s1 + $0xc0] ss:$8 sps:$4 sm:$0xff]   ;;  %v4538_v56 = vld [vmem:[%s6568_s1 + $0xd0] ss:$8 sps:$4 sm:$0xff]  }
  0x12   :  { %v4528_v49 = vld [vmem:[%s6568_s1 + $0xc4] ss:$8 sps:$4 sm:$0xff]   ;;  %2766 = vmatprep.mubr.bf16.mxu1 %v4554_v48  ;;  %v4533_v53 = vld [vmem:[%s6568_s1 + $0x5c0] ss:$8 sps:$4 sm:$0xff]   ;;  %v4534_v54 = vld [vmem:[%s6568_s1 + $0xd4] ss:$8 sps:$4 sm:$0xff]  }
  0x13   :  { %2743 = vmatpush1.bf16.msra.mxu1 %v4484_v18  ;;  %v4530_v50 = vld [vmem:[%s6568_s1 + $0x5c4] ss:$8 sps:$4 sm:$0xff]   ;;  %v4536_v55 = vld [vmem:[%s6568_s1 + $0x5d4] ss:$8 sps:$4 sm:$0xff]   ;;  %v4539_v57 = vld [vmem:[%s6568_s1 + $0x5d0] ss:$8 sps:$4 sm:$0xff]  }
  0x14   :  { %3148 = vmatpush1.bf16.msra.mxu0 %v4485_v19  ;;  %2744 = vmatprep.subr.bf16.mxu1 %v4486_v20  ;;  %v4560_v51 = vld [vmem:[%s6569_s0 + $0x2c] ss:$88 sps:$4 sm:$0xff]   ;;  %v4544_v60 = vld [vmem:[%s6568_s1 + $0xe0] ss:$8 sps:$4 sm:$0xff]   ;;  %v4546_v62 = vld [vmem:[%s6568_s1 + $0xf4] ss:$8 sps:$4 sm:$0xff]  }
  0x15   :  { %3149 = vmatprep.subr.bf16.mxu0 %v4488_v21  ;;  %3171 = vmatprep.mubr.bf16.mxu0 %v4560_v51  ;;  %v4540_v58 = vld [vmem:[%s6568_s1 + $0xe4] ss:$8 sps:$4 sm:$0xff]   ;;  %v4545_v61 = vld [vmem:[%s6568_s1 + $0x5e0] ss:$8 sps:$4 sm:$0xff]   ;;  %v4548_v63 = vld [vmem:[%s6568_s1 + $0x5f4] ss:$8 sps:$4 sm:$0xff]  }
  0x16   :  { %v4542_v59 = vld [vmem:[%s6568_s1 + $0x5e4] ss:$8 sps:$4 sm:$0xff]   ;;  %v4550_v0 = vld [vmem:[%s6568_s1 + $0xf0] ss:$8 sps:$4 sm:$0xff]   ;;  %v4555_v5 = vld [vmem:[%s6568_s1 + $0x100] ss:$8 sps:$4 sm:$0xff]  }
  0x17   :  { %2745 = vmatpush1.bf16.msra.mxu1 %v4490_v22  ;;  %v4551_v1 = vld [vmem:[%s6568_s1 + $0x5f0] ss:$8 sps:$4 sm:$0xff]   ;;  %v4557_v2 = vld [vmem:[%s6568_s1 + $0x104] ss:$8 sps:$4 sm:$0xff]   ;;  %v4558_v6 = vld [vmem:[%s6569_s0 + $0x28] ss:$88 sps:$4 sm:$0xff]  }
  0x18   :  { %3150 = vmatpush1.bf16.msra.mxu0 %v4491_v23  ;;  %2746 = vmatprep.subr.bf16.mxu1 %v4492_v24  ;;  %v4563_v3 = vld [vmem:[%s6568_s1 + $0x604] ss:$8 sps:$4 sm:$0xff]   ;;  %v4552_v4 = vld [vmem:[%s6569_s0] ss:$88 sps:$4 sm:$0xff]   ;;  %v4566_v8 = vld [vmem:[%s6568_s1 + $0x114] ss:$8 sps:$4 sm:$0xff]  }
  0x19   :  { %3151 = vmatprep.subr.bf16.mxu0 %v4494_v25  ;;  %v4561_v7 = vld [vmem:[%s6568_s1 + $0x600] ss:$8 sps:$4 sm:$0xff]   ;;  %v4569_v9 = vld [vmem:[%s6568_s1 + $0x614] ss:$8 sps:$4 sm:$0xff]   ;;  %v4564_v10 = vld [vmem:[%s6568_s1 + $0x110] ss:$8 sps:$4 sm:$0xff]  }
  0x1a   :  { %v4567_v11 = vld [vmem:[%s6568_s1 + $0x610] ss:$8 sps:$4 sm:$0xff]   ;;  %v4572_v12 = vld [vmem:[%s6568_s1 + $0x124] ss:$8 sps:$4 sm:$0xff]   ;;  %v4606_v13 = vld [vmem:[%s6569_s0 + $0xdc] ss:$88 sps:$4 sm:$0xff]  }
  0x1b   :  { %2747 = vmatpush1.bf16.msra.mxu1 %v4496_v26  ;;  %v4609_v14 = vld [vmem:[%s6569_s0 + $0xb4] ss:$88 sps:$4 sm:$0xff]   ;;  %v4570_v16 = vld [vmem:[%s6568_s1 + $0x120] ss:$8 sps:$4 sm:$0xff]   ;;  %v4608_v18 = vld [vmem:[%s6569_s0 + $0xd8] ss:$88 sps:$4 sm:$0xff]  }
  0x1c   :  { %3152 = vmatpush1.bf16.msra.mxu0 %v4497_v27  ;;  %2748 = vmatprep.subr.bf16.mxu1 %v4498_v28  ;;  %v4575_v15 = vld [vmem:[%s6568_s1 + $0x624] ss:$8 sps:$4 sm:$0xff]   ;;  %v4573_v17 = vld [vmem:[%s6568_s1 + $0x620] ss:$8 sps:$4 sm:$0xff]   ;;  %v4578_v20 = vld [vmem:[%s6568_s1 + $0x134] ss:$8 sps:$4 sm:$0xff]  }
  0x1d   :  { %3153 = vmatprep.subr.bf16.mxu0 %v4500_v29  ;;  %v4611_v19 = vld [vmem:[%s6569_s0 + $0xb0] ss:$88 sps:$4 sm:$0xff]   ;;  %v4581_v21 = vld [vmem:[%s6568_s1 + $0x634] ss:$8 sps:$4 sm:$0xff]   ;;  %v4584_v24 = vld [vmem:[%s6568_s1 + $0x144] ss:$8 sps:$4 sm:$0xff]  }
  0x1e   :  { %v4576_v22 = vld [vmem:[%s6568_s1 + $0x130] ss:$8 sps:$4 sm:$0xff]   ;;  %v4624_v25 = vld [vmem:[%s6569_s0 + $0x18c] ss:$88 sps:$4 sm:$0xff]   ;;  %v4582_v28 = vld [vmem:[%s6568_s1 + $0x140] ss:$8 sps:$4 sm:$0xff]  }
  0x1f   :  { %2749 = vmatpush1.bf16.msra.mxu1 %v4502_v30  ;;  %v4579_v23 = vld [vmem:[%s6568_s1 + $0x630] ss:$8 sps:$4 sm:$0xff]   ;;  %v4627_v26 = vld [vmem:[%s6569_s0 + $0x164] ss:$88 sps:$4 sm:$0xff]   ;;  %v4585_v29 = vld [vmem:[%s6568_s1 + $0x640] ss:$8 sps:$4 sm:$0xff]  }
  0x20   :  { %3154 = vmatpush1.bf16.msra.mxu0 %v4503_v31  ;;  %2750 = vmatprep.subr.bf16.mxu1 %v4504_v32  ;;  %v4587_v27 = vld [vmem:[%s6568_s1 + $0x644] ss:$8 sps:$4 sm:$0xff]   ;;  %v4626_v30 = vld [vmem:[%s6569_s0 + $0x188] ss:$88 sps:$4 sm:$0xff]   ;;  %v4590_v32 = vld [vmem:[%s6568_s1 + $0x154] ss:$8 sps:$4 sm:$0xff]  }
  0x21   :  { %3155 = vmatprep.subr.bf16.mxu0 %v4506_v33  ;;  %v4629_v31 = vld [vmem:[%s6569_s0 + $0x160] ss:$88 sps:$4 sm:$0xff]   ;;  %v4593_v33 = vld [vmem:[%s6568_s1 + $0x654] ss:$8 sps:$4 sm:$0xff]  }
  0x22   :  { %v143_v48 = vld [vmem:[%s6569_s0 + $0x2c0] sm:$0xff] }
  0x23   :  { %2751 = vmatpush1.bf16.msra.mxu1 %v4508_v34  ;;  %v4588_v34 = vld [vmem:[%s6568_s1 + $0x150] ss:$8 sps:$4 sm:$0xff]   ;;  %v3888_v51 = vcombine.high %v143_v48, %v143_v48 }
  0x24   :  { %3156 = vmatpush1.bf16.msra.mxu0 %v4509_v35  ;;  %2752 = vmatprep.subr.bf16.mxu1 %v4510_v36  ;;  %v4591_v35 = vld [vmem:[%s6568_s1 + $0x650] ss:$8 sps:$4 sm:$0xff]   ;;  %v4596_v36 = vld [vmem:[%s6568_s1 + $0x164] ss:$8 sps:$4 sm:$0xff]  }
  0x25   :  { %3157 = vmatprep.subr.bf16.mxu0 %v4512_v37  ;;  %v4642_v37 = vld [vmem:[%s6569_s0 + $0x23c] ss:$88 sps:$4 sm:$0xff]  }
  0x27   :  { %2753 = vmatpush1.bf16.msra.mxu1 %v4514_v38  ;;  %v4645_v38 = vld [vmem:[%s6569_s0 + $0x214] ss:$88 sps:$4 sm:$0xff]  }
  0x28   :  { %3158 = vmatpush1.bf16.msra.mxu0 %v4515_v39  ;;  %2754 = vmatprep.subr.bf16.mxu1 %v4516_v40  ;;  %v4599_v39 = vld [vmem:[%s6568_s1 + $0x664] ss:$8 sps:$4 sm:$0xff]   ;;  %v4594_v40 = vld [vmem:[%s6568_s1 + $0x160] ss:$8 sps:$4 sm:$0xff]  }
  0x29   :  { %3159 = vmatprep.subr.bf16.mxu0 %v4518_v41  ;;  %v4597_v41 = vld [vmem:[%s6568_s1 + $0x660] ss:$8 sps:$4 sm:$0xff]  }
  0x2b   :  { %2755 = vmatpush1.bf16.msra.mxu1 %v4520_v42  ;;  %v4644_v42 = vld [vmem:[%s6569_s0 + $0x238] ss:$88 sps:$4 sm:$0xff]  }
  0x2c   :  { %3160 = vmatpush1.bf16.msra.mxu0 %v4521_v43  ;;  %2756 = vmatprep.subr.bf16.mxu1 %v4522_v44  ;;  %v4647_v43 = vld [vmem:[%s6569_s0 + $0x210] ss:$88 sps:$4 sm:$0xff]   ;;  %v4602_v44 = vld [vmem:[%s6568_s1 + $0x174] ss:$8 sps:$4 sm:$0xff]  }
  0x2d   :  { %3161 = vmatprep.subr.bf16.mxu0 %v4524_v45  ;;  %v4605_v45 = vld [vmem:[%s6568_s1 + $0x674] ss:$8 sps:$4 sm:$0xff]  }
  0x2f   :  { %2757 = vmatpush1.bf16.msra.mxu1 %v4526_v46  ;;  %v148_v46 = vld [vmem:[%s6569_s0 + $0x2e8] sm:$0xff] }
  0x30   :  { %3162 = vmatpush1.bf16.msra.mxu0 %v4527_v47  ;;  %2758 = vmatprep.subr.bf16.mxu1 %v4528_v49  ;;  %v3898_v47 = vcombine.high %v148_v46, %v148_v46  ;;  %v4600_v49 = vld [vmem:[%s6568_s1 + $0x170] ss:$8 sps:$4 sm:$0xff]  }
  0x31   :  { %3163 = vmatprep.subr.bf16.mxu0 %v4530_v50  ;;  %v4603_v50 = vld [vmem:[%s6568_s1 + $0x670] ss:$8 sps:$4 sm:$0xff]  }
  0x33   :  { %2759 = vmatpush1.bf16.msra.mxu1 %v4532_v52  ;;  %v4614_v52 = vld [vmem:[%s6568_s1 + $0x184] ss:$8 sps:$4 sm:$0xff]  }
  0x34   :  { %3164 = vmatpush1.bf16.msra.mxu0 %v4533_v53  ;;  %2760 = vmatprep.subr.bf16.mxu1 %v4534_v54  ;;  %v4617_v53 = vld [vmem:[%s6568_s1 + $0x684] ss:$8 sps:$4 sm:$0xff]   ;;  %v3897_v54 = vcombine.low %v148_v46, %v148_v46  ;;  %v4703_v46 = vld [vmem:[%s6568_s1 + $0x230] ss:$8 sps:$4 sm:$0xff]  }
  0x35   :  { %3165 = vmatprep.subr.bf16.mxu0 %v4536_v55  ;;  %v3887_v55 = vcombine.low %v143_v48, %v143_v48  ;;  %v4714_v48 = vld [vmem:[%s6568_s1 + $0x244] ss:$8 sps:$4 sm:$0xff]  }
  0x37   :  { %2761 = vmatpush1.bf16.msra.mxu1 %v4538_v56  ;;  %v4612_v56 = vld [vmem:[%s6568_s1 + $0x180] ss:$8 sps:$4 sm:$0xff]  }
  0x38   :  { %3166 = vmatpush1.bf16.msra.mxu0 %v4539_v57  ;;  %2762 = vmatprep.subr.bf16.mxu1 %v4540_v58  ;;  %v4615_v57 = vld [vmem:[%s6568_s1 + $0x680] ss:$8 sps:$4 sm:$0xff]   ;;  %v4620_v58 = vld [vmem:[%s6568_s1 + $0x194] ss:$8 sps:$4 sm:$0xff]  }
  0x39   :  { %3167 = vmatprep.subr.bf16.mxu0 %v4542_v59  ;;  %v4623_v59 = vld [vmem:[%s6568_s1 + $0x694] ss:$8 sps:$4 sm:$0xff]  }
  0x3b   :  { %2763 = vmatpush1.bf16.msra.mxu1 %v4544_v60  ;;  %v4678_v60 = vld [vmem:[%s6569_s0 + $0xc] ss:$88 sps:$4 sm:$0xff]  }
  0x3c   :  { %3168 = vmatpush1.bf16.msra.mxu0 %v4545_v61  ;;  %2764 = vmatprep.subr.bf16.mxu1 %v4546_v62  ;;  %v4618_v61 = vld [vmem:[%s6568_s1 + $0x190] ss:$8 sps:$4 sm:$0xff]  }
  0x3d   :  { %3169 = vmatprep.subr.bf16.mxu0 %v4548_v63  ;;  %v4621_v62 = vld [vmem:[%s6568_s1 + $0x690] ss:$8 sps:$4 sm:$0xff]   ;;  %v4684_v63 = vld [vmem:[%s6569_s0 + $0x34] ss:$88 sps:$4 sm:$0xff]  }
  0x3f   :  { %2765 = vmatpush1.bf16.msra.mxu1 %v4550_v0  ;;  %v4632_v0 = vld [vmem:[%s6568_s1 + $0x1a4] ss:$8 sps:$4 sm:$0xff]  }
  0x40   :  { %3170 = vmatpush1.bf16.msra.mxu0 %v4551_v1  ;;  %2815 = vmatprep.subr.bf16.mxu1 %v4557_v2  ;;  %v4635_v1 = vld [vmem:[%s6568_s1 + $0x6a4] ss:$8 sps:$4 sm:$0xff]   ;;  %v4630_v2 = vld [vmem:[%s6568_s1 + $0x1a0] ss:$8 sps:$4 sm:$0xff]  }
  0x41   :  { %3220 = vmatprep.subr.bf16.mxu0 %v4563_v3  ;;  %v4633_v3 = vld [vmem:[%s6568_s1 + $0x6a0] ss:$8 sps:$4 sm:$0xff]  }
  0x42   :  { %2767 = vmatmul.mubr.bf16.vlgmr.msra.gmra.mrb[0].mxu1 %v4552_v4  ;;  %v4638_v4 = vld [vmem:[%s6568_s1 + $0x1b4] ss:$8 sps:$4 sm:$0xff]  }
  0x43   :  { %3172 = vmatmul.mubr.bf16.vlgmr.msra.gmra.mrb[0].mxu0 %v4558_v6  ;;  %2816 = vmatpush1.bf16.msra.mxu1 %v4555_v5  ;;  %v4641_v5 = vld [vmem:[%s6568_s1 + $0x6b4] ss:$8 sps:$4 sm:$0xff]   ;;  %v4636_v6 = vld [vmem:[%s6568_s1 + $0x1b0] ss:$8 sps:$4 sm:$0xff]  }
  0x44   :  { %3221 = vmatpush1.bf16.msra.mxu0 %v4561_v7  ;;  %2817 = vmatprep.subr.bf16.mxu1 %v4566_v8  ;;  %v4639_v7 = vld [vmem:[%s6568_s1 + $0x6b0] ss:$8 sps:$4 sm:$0xff]   ;;  %v4650_v8 = vld [vmem:[%s6568_s1 + $0x1c4] ss:$8 sps:$4 sm:$0xff]  }
  0x45   :  { %3222 = vmatprep.subr.bf16.mxu0 %v4569_v9  ;;  %3181 = vmatprep.mubr.bf16.mxu0 %v4606_v13  ;;  %v4653_v9 = vld [vmem:[%s6568_s1 + $0x6c4] ss:$8 sps:$4 sm:$0xff]   ;;  %v4659_v13 = vld [vmem:[%s6568_s1 + $0x6d4] ss:$8 sps:$4 sm:$0xff]  }
  0x46   :  { %2776 = vmatprep.mubr.bf16.mxu1 %v4609_v14  ;;  %v4654_v14 = vld [vmem:[%s6568_s1 + $0x1d0] ss:$8 sps:$4 sm:$0xff]  }
  0x47   :  { %2818 = vmatpush1.bf16.msra.mxu1 %v4564_v10  ;;  %v4648_v10 = vld [vmem:[%s6568_s1 + $0x1c0] ss:$8 sps:$4 sm:$0xff]  }
  0x48   :  { %3223 = vmatpush1.bf16.msra.mxu0 %v4567_v11  ;;  %2819 = vmatprep.subr.bf16.mxu1 %v4572_v12  ;;  %v4651_v11 = vld [vmem:[%s6568_s1 + $0x6c0] ss:$8 sps:$4 sm:$0xff]   ;;  %v4656_v12 = vld [vmem:[%s6568_s1 + $0x1d4] ss:$8 sps:$4 sm:$0xff]  }
  0x49   :  { %3224 = vmatprep.subr.bf16.mxu0 %v4575_v15  ;;  %v4657_v15 = vld [vmem:[%s6568_s1 + $0x6d0] ss:$8 sps:$4 sm:$0xff]  }
  0x4a   :  { %2777 = vmatmul.mubr.bf16.gmra.mrb[4].mxu1 %v4611_v19  ;;  %v4667_v19 = vld [vmem:[%s6568_s1 + $0x6e0] ss:$8 sps:$4 sm:$0xff]  }
  0x4b   :  { %3182 = vmatmul.mubr.bf16.gmra.mrb[4].mxu0 %v4608_v18  ;;  %2820 = vmatpush1.bf16.msra.mxu1 %v4570_v16  ;;  %v4666_v16 = vld [vmem:[%s6568_s1 + $0x1e4] ss:$8 sps:$4 sm:$0xff]   ;;  %v4664_v18 = vld [vmem:[%s6568_s1 + $0x1e0] ss:$8 sps:$4 sm:$0xff]  }
  0x4c   :  { %3225 = vmatpush1.bf16.msra.mxu0 %v4573_v17  ;;  %2821 = vmatprep.subr.bf16.mxu1 %v4578_v20  ;;  %v4669_v17 = vld [vmem:[%s6568_s1 + $0x6e4] ss:$8 sps:$4 sm:$0xff]   ;;  %v4672_v20 = vld [vmem:[%s6568_s1 + $0x1f4] ss:$8 sps:$4 sm:$0xff]  }
  0x4d   :  { %3226 = vmatprep.subr.bf16.mxu0 %v4581_v21  ;;  %3191 = vmatprep.mubr.bf16.mxu0 %v4624_v25  ;;  %v4675_v21 = vld [vmem:[%s6568_s1 + $0x6f4] ss:$8 sps:$4 sm:$0xff]   ;;  %v4681_v25 = vld [vmem:[%s6568_s1 + $0x204] ss:$8 sps:$4 sm:$0xff]  }
  0x4e   :  { %2786 = vmatprep.mubr.bf16.mxu1 %v4627_v26  ;;  %v4687_v26 = vld [vmem:[%s6568_s1 + $0x704] ss:$8 sps:$4 sm:$0xff]  }
  0x4f   :  { %2822 = vmatpush1.bf16.msra.mxu1 %v4576_v22  ;;  %v4670_v22 = vld [vmem:[%s6568_s1 + $0x1f0] ss:$8 sps:$4 sm:$0xff]  }
  0x50   :  { %3227 = vmatpush1.bf16.msra.mxu0 %v4579_v23  ;;  %2823 = vmatprep.subr.bf16.mxu1 %v4584_v24  ;;  %v4673_v23 = vld [vmem:[%s6568_s1 + $0x6f0] ss:$8 sps:$4 sm:$0xff]   ;;  %v4676_v24 = vld [vmem:[%s6569_s0 + $0x8] ss:$88 sps:$4 sm:$0xff]  }
  0x51   :  { %3228 = vmatprep.subr.bf16.mxu0 %v4587_v27  ;;  %v4679_v27 = vld [vmem:[%s6568_s1 + $0x200] ss:$8 sps:$4 sm:$0xff]  }
  0x52   :  { %2787 = vmatmul.mubr.bf16.gmra.mrb[8].mxu1 %v4629_v31  ;;  %v4693_v31 = vld [vmem:[%s6568_s1 + $0x714] ss:$8 sps:$4 sm:$0xff]  }
  0x53   :  { %3192 = vmatmul.mubr.bf16.gmra.mrb[8].mxu0 %v4626_v30  ;;  %2824 = vmatpush1.bf16.msra.mxu1 %v4582_v28  ;;  %v4682_v28 = vld [vmem:[%s6569_s0 + $0x30] ss:$88 sps:$4 sm:$0xff]   ;;  %v4690_v30 = vld [vmem:[%s6568_s1 + $0x214] ss:$8 sps:$4 sm:$0xff]  }
  0x54   :  { %3229 = vmatpush1.bf16.msra.mxu0 %v4585_v29  ;;  %2825 = vmatprep.subr.bf16.mxu1 %v4590_v32  ;;  %v4685_v29 = vld [vmem:[%s6568_s1 + $0x700] ss:$8 sps:$4 sm:$0xff]   ;;  %v4694_v32 = vld [vmem:[%s6569_s0 + $0xbc] ss:$88 sps:$4 sm:$0xff]  }
  0x55   :  { %3230 = vmatprep.subr.bf16.mxu0 %v4593_v33  ;;  %3201 = vmatprep.mubr.bf16.mxu0 %v4642_v37  ;;  %v4739_v33 = vld [vmem:[%s6569_s0 + $0xe4] ss:$88 sps:$4 sm:$0xff]   ;;  %v4696_v37 = vld [vmem:[%s6569_s0 + $0xb8] ss:$88 sps:$4 sm:$0xff]  }
  0x56   :  { %2796 = vmatprep.mubr.bf16.mxu1 %v4645_v38  ;;  %v4702_v38 = vld [vmem:[%s6568_s1 + $0x724] ss:$8 sps:$4 sm:$0xff]  }
  0x57   :  { %2826 = vmatpush1.bf16.msra.mxu1 %v4588_v34  ;;  %v4688_v34 = vld [vmem:[%s6568_s1 + $0x210] ss:$8 sps:$4 sm:$0xff]  }
  0x58   :  { %3231 = vmatpush1.bf16.msra.mxu0 %v4591_v35  ;;  %2827 = vmatprep.subr.bf16.mxu1 %v4596_v36  ;;  %v4691_v35 = vld [vmem:[%s6568_s1 + $0x710] ss:$8 sps:$4 sm:$0xff]   ;;  %v4699_v36 = vld [vmem:[%s6568_s1 + $0x224] ss:$8 sps:$4 sm:$0xff]  }
  0x59   :  { %3232 = vmatprep.subr.bf16.mxu0 %v4599_v39  ;;  %v4697_v39 = vld [vmem:[%s6568_s1 + $0x220] ss:$8 sps:$4 sm:$0xff]  }
  0x5a   :  { %2797 = vmatmul.mubr.bf16.gmra.mrb[12].mxu1 %v4647_v43  ;;  %v4708_v43 = vld [vmem:[%s6568_s1 + $0x734] ss:$8 sps:$4 sm:$0xff]  }
  0x5b   :  { %3202 = vmatmul.mubr.bf16.gmra.mrb[12].mxu0 %v4644_v42  ;;  %2828 = vmatpush1.bf16.msra.mxu1 %v4594_v40  ;;  %v4700_v40 = vld [vmem:[%s6568_s1 + $0x720] ss:$8 sps:$4 sm:$0xff]   ;;  %v4705_v42 = vld [vmem:[%s6568_s1 + $0x234] ss:$8 sps:$4 sm:$0xff]  }
  0x5c   :  { %3233 = vmatpush1.bf16.msra.mxu0 %v4597_v41  ;;  %2829 = vmatprep.subr.bf16.mxu1 %v4602_v44  ;;  %v4741_v41 = vld [vmem:[%s6569_s0 + $0xe0] ss:$88 sps:$4 sm:$0xff]   ;;  %v4709_v44 = vld [vmem:[%s6569_s0 + $0x16c] ss:$88 sps:$4 sm:$0xff]  }
  0x5d   :  { %3234 = vmatprep.subr.bf16.mxu0 %v4605_v45  ;;  %3211 = vmatprep.mubr.bf16.mxu0 %v3898_v47  ;;  %v4756_v45 = vld [vmem:[%s6569_s0 + $0x194] ss:$88 sps:$4 sm:$0xff]   ;;  %v4706_v47 = vld [vmem:[%s6568_s1 + $0x730] ss:$8 sps:$4 sm:$0xff]  }
  0x5e   :  { %2806 = vmatprep.mubr.bf16.mxu1 %v3888_v51  ;;  %v4712_v51 = vld [vmem:[%s6568_s1 + $0x240] ss:$8 sps:$4 sm:$0xff]  }
  0x5f   :  { %2830 = vmatpush1.bf16.msra.mxu1 %v4600_v49  ;;  %v4717_v49 = vld [vmem:[%s6568_s1 + $0x744] ss:$8 sps:$4 sm:$0xff]  }
  0x60   :  { %3235 = vmatpush1.bf16.msra.mxu0 %v4603_v50  ;;  %2831 = vmatprep.subr.bf16.mxu1 %v4614_v52  ;;  %v4711_v50 = vld [vmem:[%s6569_s0 + $0x168] ss:$88 sps:$4 sm:$0xff]  }
  0x61   :  { %3236 = vmatprep.subr.bf16.mxu0 %v4617_v53  ;;  %v4758_v52 = vld [vmem:[%s6569_s0 + $0x190] ss:$88 sps:$4 sm:$0xff]  }
  0x62   :  { %2807 = vmatmul.mubr.bf16.gmra.mrb[16].mxu1 %v3887_v55  ;;  %v4715_v53 = vld [vmem:[%s6568_s1 + $0x740] ss:$8 sps:$4 sm:$0xff]   ;;  %v4723_v55 = vld [vmem:[%s6568_s1 + $0x754] ss:$8 sps:$4 sm:$0xff]  }
  0x63   :  { %3212 = vmatmul.mubr.bf16.gmra.mrb[16].mxu0 %v3897_v54  ;;  %2832 = vmatpush1.bf16.msra.mxu1 %v4612_v56  ;;  %v4720_v54 = vld [vmem:[%s6568_s1 + $0x254] ss:$8 sps:$4 sm:$0xff]  }
  0x64   :  { %3237 = vmatpush1.bf16.msra.mxu0 %v4615_v57  ;;  %2833 = vmatprep.subr.bf16.mxu1 %v4620_v58  ;;  %v4724_v56 = vld [vmem:[%s6569_s0 + $0x21c] ss:$88 sps:$4 sm:$0xff]   ;;  %v4718_v58 = vld [vmem:[%s6568_s1 + $0x250] ss:$8 sps:$4 sm:$0xff]  }
  0x65   :  { %3238 = vmatprep.subr.bf16.mxu0 %v4623_v59  ;;  %2847 = vmatprep.mubr.bf16.mxu1 %v4678_v60  ;;  %v4771_v57 = vld [vmem:[%s6569_s0 + $0x244] ss:$88 sps:$4 sm:$0xff]   ;;  %v4721_v59 = vld [vmem:[%s6568_s1 + $0x750] ss:$8 sps:$4 sm:$0xff]  }
  0x66   :  { %3252 = vmatprep.mubr.bf16.mxu0 %v4684_v63  ;;  %v4729_v60 = vld [vmem:[%s6568_s1 + $0x264] ss:$8 sps:$4 sm:$0xff]   ;;  %v4727_v63 = vld [vmem:[%s6568_s1 + $0x260] ss:$8 sps:$4 sm:$0xff]  }
  0x67   :  { %2834 = vmatpush1.bf16.msra.mxu1 %v4618_v61  ;;  %v4726_v61 = vld [vmem:[%s6569_s0 + $0x218] ss:$88 sps:$4 sm:$0xff]  }
  0x68   :  { %3239 = vmatpush1.bf16.msra.mxu0 %v4621_v62  ;;  %2835 = vmatprep.subr.bf16.mxu1 %v4632_v0  ;;  %v4732_v62 = vld [vmem:[%s6568_s1 + $0x764] ss:$8 sps:$4 sm:$0xff]   ;;  %v4730_v0 = vld [vmem:[%s6568_s1 + $0x760] ss:$8 sps:$4 sm:$0xff]  }
  0x69   :  { %3240 = vmatprep.subr.bf16.mxu0 %v4635_v1  ;;  %v144_v1 = vld [vmem:[%s6569_s0 + $0x2c8] sm:$0xff] }
  0x6b   :  { %2836 = vmatpush1.bf16.msra.mxu1 %v4630_v2  ;;  %v4773_v2 = vld [vmem:[%s6569_s0 + $0x240] ss:$88 sps:$4 sm:$0xff]  }
  0x6c   :  { %3241 = vmatpush1.bf16.msra.mxu0 %v4633_v3  ;;  %2837 = vmatprep.subr.bf16.mxu1 %v4638_v4  ;;  %v149_v3 = vld [vmem:[%s6569_s0 + $0x2f0] sm:$0xff] }
  0x6d   :  { %3242 = vmatprep.subr.bf16.mxu0 %v4641_v5  ;;  %v4735_v4 = vld [vmem:[%s6568_s1 + $0x274] ss:$8 sps:$4 sm:$0xff]  }
  0x6e   :  { %v4738_v5 = vld [vmem:[%s6568_s1 + $0x774] ss:$8 sps:$4 sm:$0xff]  }
  0x6f   :  { %2838 = vmatpush1.bf16.msra.mxu1 %v4636_v6  ;;  %v3890_v6 = vcombine.high %v144_v1, %v144_v1 }
  0x70   :  { %3243 = vmatpush1.bf16.msra.mxu0 %v4639_v7  ;;  %2839 = vmatprep.subr.bf16.mxu1 %v4650_v8  ;;  %v3900_v7 = vcombine.high %v149_v3, %v149_v3  ;;  %v4733_v8 = vld [vmem:[%s6568_s1 + $0x270] ss:$8 sps:$4 sm:$0xff]  }
  0x71   :  { %3244 = vmatprep.subr.bf16.mxu0 %v4653_v9  ;;  %v4736_v9 = vld [vmem:[%s6568_s1 + $0x770] ss:$8 sps:$4 sm:$0xff]  }
  0x73   :  { %2840 = vmatpush1.bf16.msra.mxu1 %v4648_v10  ;;  %v4746_v10 = vld [vmem:[%s6568_s1 + $0x284] ss:$8 sps:$4 sm:$0xff]  }
  0x74   :  { %3245 = vmatpush1.bf16.msra.mxu0 %v4651_v11  ;;  %2841 = vmatprep.subr.bf16.mxu1 %v4656_v12  ;;  %v4749_v11 = vld [vmem:[%s6568_s1 + $0x784] ss:$8 sps:$4 sm:$0xff]   ;;  %v3889_v12 = vcombine.low %v144_v1, %v144_v1  ;;  %v4832_v1 = vld [vmem:[%s6568_s1 + $0x834] ss:$8 sps:$4 sm:$0xff]  }
  0x75   :  { %3246 = vmatprep.subr.bf16.mxu0 %v4659_v13  ;;  %v4744_v13 = vld [vmem:[%s6568_s1 + $0x280] ss:$8 sps:$4 sm:$0xff]  }
  0x77   :  { %2842 = vmatpush1.bf16.msra.mxu1 %v4654_v14  ;;  %v4747_v14 = vld [vmem:[%s6568_s1 + $0x780] ss:$8 sps:$4 sm:$0xff]  }
  0x78   :  { %3247 = vmatpush1.bf16.msra.mxu0 %v4657_v15  ;;  %2843 = vmatprep.subr.bf16.mxu1 %v4666_v16  ;;  %v3899_v15 = vcombine.low %v149_v3, %v149_v3  ;;  %v4752_v16 = vld [vmem:[%s6568_s1 + $0x294] ss:$8 sps:$4 sm:$0xff]  }
  0x79   :  { %3248 = vmatprep.subr.bf16.mxu0 %v4669_v17  ;;  %v4755_v17 = vld [vmem:[%s6568_s1 + $0x794] ss:$8 sps:$4 sm:$0xff]  }
  0x7a   :  { %v4880_v3 = vld [vmem:[%s6569_s0 + $0x19c] ss:$88 sps:$4 sm:$0xff]  }
  0x7b   :  { %2844 = vmatpush1.bf16.msra.mxu1 %v4664_v18  ;;  %v4802_v18 = vld [vmem:[%s6569_s0 + $0x14] ss:$88 sps:$4 sm:$0xff]  }
  0x7c   :  { %3249 = vmatpush1.bf16.msra.mxu0 %v4667_v19  ;;  %2845 = vmatprep.subr.bf16.mxu1 %v4672_v20  ;;  %v4808_v19 = vld [vmem:[%s6569_s0 + $0x3c] ss:$88 sps:$4 sm:$0xff]   ;;  %v4750_v20 = vld [vmem:[%s6568_s1 + $0x290] ss:$8 sps:$4 sm:$0xff]  }
  0x7d   :  { %3250 = vmatprep.subr.bf16.mxu0 %v4675_v21  ;;  %v4753_v21 = vld [vmem:[%s6568_s1 + $0x790] ss:$8 sps:$4 sm:$0xff]  }
  0x7f   :  { %2846 = vmatpush1.bf16.msra.mxu1 %v4670_v22  ;;  %v4761_v22 = vld [vmem:[%s6568_s1 + $0x2a4] ss:$8 sps:$4 sm:$0xff]  }
  0x80   :  { %3251 = vmatpush1.bf16.msra.mxu0 %v4673_v23  ;;  %2896 = vmatprep.subr.bf16.mxu1 %v4681_v25  ;;  %v4764_v23 = vld [vmem:[%s6568_s1 + $0x7a4] ss:$8 sps:$4 sm:$0xff]   ;;  %v4762_v25 = vld [vmem:[%s6568_s1 + $0x7a0] ss:$8 sps:$4 sm:$0xff]  }
  0x81   :  { %3301 = vmatprep.subr.bf16.mxu0 %v4687_v26  ;;  %v4767_v26 = vld [vmem:[%s6568_s1 + $0x2b4] ss:$8 sps:$4 sm:$0xff]  }
  0x82   :  { %2848 = vmatmul.mubr.bf16.vlgmr.msra.gmra.mrb[0].mxu1 %v4676_v24  ;;  %v4759_v24 = vld [vmem:[%s6568_s1 + $0x2a0] ss:$8 sps:$4 sm:$0xff]  }
  0x83   :  { %3253 = vmatmul.mubr.bf16.vlgmr.msra.gmra.mrb[0].mxu0 %v4682_v28  ;;  %2897 = vmatpush1.bf16.msra.mxu1 %v4679_v27  ;;  %v4770_v27 = vld [vmem:[%s6568_s1 + $0x7b4] ss:$8 sps:$4 sm:$0xff]   ;;  %v4765_v28 = vld [vmem:[%s6568_s1 + $0x2b0] ss:$8 sps:$4 sm:$0xff]  }
  0x84   :  { %3302 = vmatpush1.bf16.msra.mxu0 %v4685_v29  ;;  %2898 = vmatprep.subr.bf16.mxu1 %v4690_v30  ;;  %v4768_v29 = vld [vmem:[%s6568_s1 + $0x7b0] ss:$8 sps:$4 sm:$0xff]   ;;  %v4776_v30 = vld [vmem:[%s6568_s1 + $0x2c4] ss:$8 sps:$4 sm:$0xff]  }
  0x85   :  { %3303 = vmatprep.subr.bf16.mxu0 %v4693_v31  ;;  %2857 = vmatprep.mubr.bf16.mxu1 %v4694_v32  ;;  %v4779_v31 = vld [vmem:[%s6568_s1 + $0x7c4] ss:$8 sps:$4 sm:$0xff]   ;;  %v4774_v32 = vld [vmem:[%s6568_s1 + $0x2c0] ss:$8 sps:$4 sm:$0xff]  }
  0x86   :  { %3262 = vmatprep.mubr.bf16.mxu0 %v4739_v33  ;;  %v4777_v33 = vld [vmem:[%s6568_s1 + $0x7c0] ss:$8 sps:$4 sm:$0xff]  }
  0x87   :  { %2899 = vmatpush1.bf16.msra.mxu1 %v4688_v34  ;;  %v4782_v34 = vld [vmem:[%s6568_s1 + $0x2d4] ss:$8 sps:$4 sm:$0xff]  }
  0x88   :  { %3304 = vmatpush1.bf16.msra.mxu0 %v4691_v35  ;;  %2900 = vmatprep.subr.bf16.mxu1 %v4699_v36  ;;  %v4785_v35 = vld [vmem:[%s6568_s1 + $0x7d4] ss:$8 sps:$4 sm:$0xff]   ;;  %v4780_v36 = vld [vmem:[%s6568_s1 + $0x2d0] ss:$8 sps:$4 sm:$0xff]  }
  0x89   :  { %3305 = vmatprep.subr.bf16.mxu0 %v4702_v38  ;;  %v4790_v38 = vld [vmem:[%s6568_s1 + $0x2e4] ss:$8 sps:$4 sm:$0xff]  }
  0x8a   :  { %2858 = vmatmul.mubr.bf16.gmra.mrb[4].mxu1 %v4696_v37  ;;  %v4783_v37 = vld [vmem:[%s6568_s1 + $0x7d0] ss:$8 sps:$4 sm:$0xff]  }
  0x8b   :  { %3263 = vmatmul.mubr.bf16.gmra.mrb[4].mxu0 %v4741_v41  ;;  %2901 = vmatpush1.bf16.msra.mxu1 %v4697_v39  ;;  %v4793_v39 = vld [vmem:[%s6568_s1 + $0x7e4] ss:$8 sps:$4 sm:$0xff]   ;;  %v4791_v41 = vld [vmem:[%s6568_s1 + $0x7e0] ss:$8 sps:$4 sm:$0xff]  }
  0x8c   :  { %3306 = vmatpush1.bf16.msra.mxu0 %v4700_v40  ;;  %2902 = vmatprep.subr.bf16.mxu1 %v4705_v42  ;;  %v4788_v40 = vld [vmem:[%s6568_s1 + $0x2e0] ss:$8 sps:$4 sm:$0xff]   ;;  %v4796_v42 = vld [vmem:[%s6568_s1 + $0x2f4] ss:$8 sps:$4 sm:$0xff]  }
  0x8d   :  { %3307 = vmatprep.subr.bf16.mxu0 %v4708_v43  ;;  %2867 = vmatprep.mubr.bf16.mxu1 %v4709_v44  ;;  %v4799_v43 = vld [vmem:[%s6568_s1 + $0x7f4] ss:$8 sps:$4 sm:$0xff]   ;;  %v4794_v44 = vld [vmem:[%s6568_s1 + $0x2f0] ss:$8 sps:$4 sm:$0xff]  }
  0x8e   :  { %3272 = vmatprep.mubr.bf16.mxu0 %v4756_v45  ;;  %v4797_v45 = vld [vmem:[%s6568_s1 + $0x7f0] ss:$8 sps:$4 sm:$0xff]  }
  0x8f   :  { %2903 = vmatpush1.bf16.msra.mxu1 %v4703_v46  ;;  %v4805_v46 = vld [vmem:[%s6568_s1 + $0x304] ss:$8 sps:$4 sm:$0xff]  }
  0x90   :  { %3308 = vmatpush1.bf16.msra.mxu0 %v4706_v47  ;;  %2904 = vmatprep.subr.bf16.mxu1 %v4714_v48  ;;  %v4811_v47 = vld [vmem:[%s6568_s1 + $0x804] ss:$8 sps:$4 sm:$0xff]   ;;  %v4800_v48 = vld [vmem:[%s6569_s0 + $0x10] ss:$88 sps:$4 sm:$0xff]  }
  0x91   :  { %3309 = vmatprep.subr.bf16.mxu0 %v4717_v49  ;;  %v4803_v49 = vld [vmem:[%s6568_s1 + $0x300] ss:$8 sps:$4 sm:$0xff]  }
  0x92   :  { %2868 = vmatmul.mubr.bf16.gmra.mrb[8].mxu1 %v4711_v50  ;;  %v4806_v50 = vld [vmem:[%s6569_s0 + $0x38] ss:$88 sps:$4 sm:$0xff]  }
  0x93   :  { %3273 = vmatmul.mubr.bf16.gmra.mrb[8].mxu0 %v4758_v52  ;;  %2905 = vmatpush1.bf16.msra.mxu1 %v4712_v51  ;;  %v4809_v51 = vld [vmem:[%s6568_s1 + $0x800] ss:$8 sps:$4 sm:$0xff]   ;;  %v4814_v52 = vld [vmem:[%s6568_s1 + $0x314] ss:$8 sps:$4 sm:$0xff]  }
  0x94   :  { %3310 = vmatpush1.bf16.msra.mxu0 %v4715_v53  ;;  %2906 = vmatprep.subr.bf16.mxu1 %v4720_v54  ;;  %v4817_v53 = vld [vmem:[%s6568_s1 + $0x814] ss:$8 sps:$4 sm:$0xff]  }
  0x95   :  { %3311 = vmatprep.subr.bf16.mxu0 %v4723_v55  ;;  %2877 = vmatprep.mubr.bf16.mxu1 %v4724_v56  ;;  %v4818_v54 = vld [vmem:[%s6569_s0 + $0xc4] ss:$88 sps:$4 sm:$0xff]   ;;  %v4812_v56 = vld [vmem:[%s6568_s1 + $0x310] ss:$8 sps:$4 sm:$0xff]  }
  0x96   :  { %3282 = vmatprep.mubr.bf16.mxu0 %v4771_v57  ;;  %v4863_v55 = vld [vmem:[%s6569_s0 + $0xec] ss:$88 sps:$4 sm:$0xff]   ;;  %v4815_v57 = vld [vmem:[%s6568_s1 + $0x810] ss:$8 sps:$4 sm:$0xff]  }
  0x97   :  { %2907 = vmatpush1.bf16.msra.mxu1 %v4718_v58  ;;  %v4823_v58 = vld [vmem:[%s6568_s1 + $0x324] ss:$8 sps:$4 sm:$0xff]  }
  0x98   :  { %3312 = vmatpush1.bf16.msra.mxu0 %v4721_v59  ;;  %2908 = vmatprep.subr.bf16.mxu1 %v4729_v60  ;;  %v4826_v59 = vld [vmem:[%s6568_s1 + $0x824] ss:$8 sps:$4 sm:$0xff]   ;;  %v4820_v60 = vld [vmem:[%s6569_s0 + $0xc0] ss:$88 sps:$4 sm:$0xff]  }
  0x99   :  { %3313 = vmatprep.subr.bf16.mxu0 %v4732_v62  ;;  %v4865_v62 = vld [vmem:[%s6569_s0 + $0xe8] ss:$88 sps:$4 sm:$0xff]  }
  0x9a   :  { %2878 = vmatmul.mubr.bf16.gmra.mrb[12].mxu1 %v4726_v61  ;;  %v4821_v61 = vld [vmem:[%s6568_s1 + $0x320] ss:$8 sps:$4 sm:$0xff]  }
  0x9b   :  { %3283 = vmatmul.mubr.bf16.gmra.mrb[12].mxu0 %v4773_v2  ;;  %2909 = vmatpush1.bf16.msra.mxu1 %v4727_v63  ;;  %v4824_v63 = vld [vmem:[%s6568_s1 + $0x820] ss:$8 sps:$4 sm:$0xff]   ;;  %v4833_v2 = vld [vmem:[%s6569_s0 + $0x174] ss:$88 sps:$4 sm:$0xff]  }
  0x9c   :  { %3314 = vmatpush1.bf16.msra.mxu0 %v4730_v0  ;;  %2910 = vmatprep.subr.bf16.mxu1 %v4735_v4  ;;  %v4829_v0 = vld [vmem:[%s6568_s1 + $0x334] ss:$8 sps:$4 sm:$0xff]   ;;  %v4827_v4 = vld [vmem:[%s6568_s1 + $0x330] ss:$8 sps:$4 sm:$0xff]  }
  0x9d   :  { %3315 = vmatprep.subr.bf16.mxu0 %v4738_v5  ;;  %2887 = vmatprep.mubr.bf16.mxu1 %v3890_v6  ;;  %v4830_v5 = vld [vmem:[%s6568_s1 + $0x830] ss:$8 sps:$4 sm:$0xff]  }
  0x9e   :  { %3292 = vmatprep.mubr.bf16.mxu0 %v3900_v7  ;;  %v4835_v6 = vld [vmem:[%s6569_s0 + $0x170] ss:$88 sps:$4 sm:$0xff]   ;;  %v4838_v7 = vld [vmem:[%s6568_s1 + $0x344] ss:$8 sps:$4 sm:$0xff]  }
  0x9f   :  { %2911 = vmatpush1.bf16.msra.mxu1 %v4733_v8  ;;  %v4841_v8 = vld [vmem:[%s6568_s1 + $0x844] ss:$8 sps:$4 sm:$0xff]  }
  0xa0   :  { %3316 = vmatpush1.bf16.msra.mxu0 %v4736_v9  ;;  %2912 = vmatprep.subr.bf16.mxu1 %v4746_v10  ;;  %v4836_v9 = vld [vmem:[%s6568_s1 + $0x340] ss:$8 sps:$4 sm:$0xff]   ;;  %v4882_v10 = vld [vmem:[%s6569_s0 + $0x198] ss:$88 sps:$4 sm:$0xff]  }
  0xa1   :  { %3317 = vmatprep.subr.bf16.mxu0 %v4749_v11  ;;  %v4839_v11 = vld [vmem:[%s6568_s1 + $0x840] ss:$8 sps:$4 sm:$0xff]  }
  0xa2   :  { %2888 = vmatmul.mubr.bf16.gmra.mrb[20].mxu1 %v3889_v12  ;;  %v4844_v12 = vld [vmem:[%s6568_s1 + $0x354] ss:$8 sps:$4 sm:$0xff]  }
  0xa3   :  { %3293 = vmatmul.mubr.bf16.gmra.mrb[20].mxu0 %v3899_v15  ;;  %2913 = vmatpush1.bf16.msra.mxu1 %v4744_v13  ;;  %v4847_v13 = vld [vmem:[%s6568_s1 + $0x854] ss:$8 sps:$4 sm:$0xff]   ;;  %v4895_v15 = vld [vmem:[%s6569_s0 + $0x24c] ss:$88 sps:$4 sm:$0xff]  }
  0xa4   :  { %3318 = vmatpush1.bf16.msra.mxu0 %v4747_v14  ;;  %2914 = vmatprep.subr.bf16.mxu1 %v4752_v16  ;;  %v4848_v14 = vld [vmem:[%s6569_s0 + $0x224] ss:$88 sps:$4 sm:$0xff]   ;;  %v4842_v16 = vld [vmem:[%s6568_s1 + $0x350] ss:$8 sps:$4 sm:$0xff]  }
  0xa5   :  { %3319 = vmatprep.subr.bf16.mxu0 %v4755_v17  ;;  %2928 = vmatprep.mubr.bf16.mxu1 %v4802_v18  ;;  %v4845_v17 = vld [vmem:[%s6568_s1 + $0x850] ss:$8 sps:$4 sm:$0xff]   ;;  %v4853_v18 = vld [vmem:[%s6568_s1 + $0x364] ss:$8 sps:$4 sm:$0xff]  }
  0xa6   :  { %3333 = vmatprep.mubr.bf16.mxu0 %v4808_v19  ;;  %v4850_v19 = vld [vmem:[%s6569_s0 + $0x220] ss:$88 sps:$4 sm:$0xff]  }
  0xa7   :  { %2915 = vmatpush1.bf16.msra.mxu1 %v4750_v20  ;;  %v4856_v20 = vld [vmem:[%s6568_s1 + $0x864] ss:$8 sps:$4 sm:$0xff]  }
  0xa8   :  { %3320 = vmatpush1.bf16.msra.mxu0 %v4753_v21  ;;  %2916 = vmatprep.subr.bf16.mxu1 %v4761_v22  ;;  %v145_v21 = vld [vmem:[%s6569_s0 + $0x2d0] sm:$0xff]  ;;  %v4897_v22 = vld [vmem:[%s6569_s0 + $0x248] ss:$88 sps:$4 sm:$0xff]  }
  0xa9   :  { %3321 = vmatprep.subr.bf16.mxu0 %v4764_v23  ;;  %v150_v23 = vld [vmem:[%s6569_s0 + $0x2f8] sm:$0xff] }
  0xab   :  { %2917 = vmatpush1.bf16.msra.mxu1 %v4759_v24  ;;  %v4851_v24 = vld [vmem:[%s6568_s1 + $0x360] ss:$8 sps:$4 sm:$0xff]  }
  0xac   :  { %3322 = vmatpush1.bf16.msra.mxu0 %v4762_v25  ;;  %2918 = vmatprep.subr.bf16.mxu1 %v4767_v26  ;;  %v4854_v25 = vld [vmem:[%s6568_s1 + $0x860] ss:$8 sps:$4 sm:$0xff]   ;;  %v4859_v26 = vld [vmem:[%s6568_s1 + $0x374] ss:$8 sps:$4 sm:$0xff]  }
  0xad   :  { %3323 = vmatprep.subr.bf16.mxu0 %v4770_v27  ;;  %v4862_v27 = vld [vmem:[%s6568_s1 + $0x874] ss:$8 sps:$4 sm:$0xff]  }
  0xaf   :  { %2919 = vmatpush1.bf16.msra.mxu1 %v4765_v28  ;;  %v3892_v28 = vcombine.high %v145_v21, %v145_v21 }
  0xb0   :  { %3324 = vmatpush1.bf16.msra.mxu0 %v4768_v29  ;;  %2920 = vmatprep.subr.bf16.mxu1 %v4776_v30  ;;  %v3902_v29 = vcombine.high %v150_v23, %v150_v23  ;;  %v4857_v30 = vld [vmem:[%s6568_s1 + $0x370] ss:$8 sps:$4 sm:$0xff]  }
  0xb1   :  { %3325 = vmatprep.subr.bf16.mxu0 %v4779_v31  ;;  %v4860_v31 = vld [vmem:[%s6568_s1 + $0x870] ss:$8 sps:$4 sm:$0xff]  }
  0xb3   :  { %2921 = vmatpush1.bf16.msra.mxu1 %v4774_v32  ;;  %v4870_v32 = vld [vmem:[%s6568_s1 + $0x384] ss:$8 sps:$4 sm:$0xff]  }
  0xb4   :  { %3326 = vmatpush1.bf16.msra.mxu0 %v4777_v33  ;;  %2922 = vmatprep.subr.bf16.mxu1 %v4782_v34  ;;  %v4873_v33 = vld [vmem:[%s6568_s1 + $0x884] ss:$8 sps:$4 sm:$0xff]   ;;  %v3891_v34 = vcombine.low %v145_v21, %v145_v21  ;;  %v4989_v21 = vld [vmem:[%s6569_s0 + $0xf0] ss:$88 sps:$4 sm:$0xff]  }
  0xb5   :  { %3327 = vmatprep.subr.bf16.mxu0 %v4785_v35  ;;  %v4868_v35 = vld [vmem:[%s6568_s1 + $0x380] ss:$8 sps:$4 sm:$0xff]  }
  0xb7   :  { %2923 = vmatpush1.bf16.msra.mxu1 %v4780_v36  ;;  %v3901_v36 = vcombine.low %v150_v23, %v150_v23  ;;  %v4956_v23 = vld [vmem:[%s6568_s1 + $0x934] ss:$8 sps:$4 sm:$0xff]  }
  0xb8   :  { %3328 = vmatpush1.bf16.msra.mxu0 %v4783_v37  ;;  %2924 = vmatprep.subr.bf16.mxu1 %v4790_v38  ;;  %v4871_v37 = vld [vmem:[%s6568_s1 + $0x880] ss:$8 sps:$4 sm:$0xff]   ;;  %v4876_v38 = vld [vmem:[%s6568_s1 + $0x394] ss:$8 sps:$4 sm:$0xff]  }
  0xb9   :  { %3329 = vmatprep.subr.bf16.mxu0 %v4793_v39  ;;  %v4879_v39 = vld [vmem:[%s6568_s1 + $0x894] ss:$8 sps:$4 sm:$0xff]  }
  0xbb   :  { %2925 = vmatpush1.bf16.msra.mxu1 %v4788_v40  ;;  %v4926_v40 = vld [vmem:[%s6569_s0 + $0x1c] ss:$88 sps:$4 sm:$0xff]  }
  0xbc   :  { %3330 = vmatpush1.bf16.msra.mxu0 %v4791_v41  ;;  %2926 = vmatprep.subr.bf16.mxu1 %v4796_v42  ;;  %v4932_v41 = vld [vmem:[%s6569_s0 + $0x44] ss:$88 sps:$4 sm:$0xff]   ;;  %v4874_v42 = vld [vmem:[%s6568_s1 + $0x390] ss:$8 sps:$4 sm:$0xff]  }
  0xbd   :  { %3331 = vmatprep.subr.bf16.mxu0 %v4799_v43  ;;  %v4877_v43 = vld [vmem:[%s6568_s1 + $0x890] ss:$8 sps:$4 sm:$0xff]  }
  0xbf   :  { %2927 = vmatpush1.bf16.msra.mxu1 %v4794_v44  ;;  %v4885_v44 = vld [vmem:[%s6568_s1 + $0x3a4] ss:$8 sps:$4 sm:$0xff]  }
  0xc0   :  { %3332 = vmatpush1.bf16.msra.mxu0 %v4797_v45  ;;  %2977 = vmatprep.subr.bf16.mxu1 %v4805_v46  ;;  %v4888_v45 = vld [vmem:[%s6568_s1 + $0x8a4] ss:$8 sps:$4 sm:$0xff]   ;;  %v4883_v46 = vld [vmem:[%s6568_s1 + $0x3a0] ss:$8 sps:$4 sm:$0xff]  }
  0xc1   :  { %3382 = vmatprep.subr.bf16.mxu0 %v4811_v47  ;;  %v4886_v47 = vld [vmem:[%s6568_s1 + $0x8a0] ss:$8 sps:$4 sm:$0xff]  }
  0xc2   :  { %2929 = vmatmul.mubr.bf16.vlgmr.msra.gmra.mrb[0].mxu1 %v4800_v48  ;;  %v4891_v48 = vld [vmem:[%s6568_s1 + $0x3b4] ss:$8 sps:$4 sm:$0xff]  }
  0xc3   :  { %3334 = vmatmul.mubr.bf16.vlgmr.msra.gmra.mrb[0].mxu0 %v4806_v50  ;;  %2978 = vmatpush1.bf16.msra.mxu1 %v4803_v49  ;;  %v4894_v49 = vld [vmem:[%s6568_s1 + $0x8b4] ss:$8 sps:$4 sm:$0xff]   ;;  %v4889_v50 = vld [vmem:[%s6568_s1 + $0x3b0] ss:$8 sps:$4 sm:$0xff]  }
  0xc4   :  { %3383 = vmatpush1.bf16.msra.mxu0 %v4809_v51  ;;  %2979 = vmatprep.subr.bf16.mxu1 %v4814_v52  ;;  %v4892_v51 = vld [vmem:[%s6568_s1 + $0x8b0] ss:$8 sps:$4 sm:$0xff]   ;;  %v4900_v52 = vld [vmem:[%s6568_s1 + $0x3c4] ss:$8 sps:$4 sm:$0xff]  }
  0xc5   :  { %3384 = vmatprep.subr.bf16.mxu0 %v4817_v53  ;;  %2938 = vmatprep.mubr.bf16.mxu1 %v4818_v54  ;;  %v4903_v53 = vld [vmem:[%s6568_s1 + $0x8c4] ss:$8 sps:$4 sm:$0xff]   ;;  %v4898_v54 = vld [vmem:[%s6568_s1 + $0x3c0] ss:$8 sps:$4 sm:$0xff]  }
  0xc6   :  { %3343 = vmatprep.mubr.bf16.mxu0 %v4863_v55  ;;  %v4901_v55 = vld [vmem:[%s6568_s1 + $0x8c0] ss:$8 sps:$4 sm:$0xff]  }
  0xc7   :  { %2980 = vmatpush1.bf16.msra.mxu1 %v4812_v56  ;;  %v4906_v56 = vld [vmem:[%s6568_s1 + $0x3d4] ss:$8 sps:$4 sm:$0xff]  }
  0xc8   :  { %3385 = vmatpush1.bf16.msra.mxu0 %v4815_v57  ;;  %2981 = vmatprep.subr.bf16.mxu1 %v4823_v58  ;;  %v4909_v57 = vld [vmem:[%s6568_s1 + $0x8d4] ss:$8 sps:$4 sm:$0xff]   ;;  %v4904_v58 = vld [vmem:[%s6568_s1 + $0x3d0] ss:$8 sps:$4 sm:$0xff]  }
  0xc9   :  { %3386 = vmatprep.subr.bf16.mxu0 %v4826_v59  ;;  %v4907_v59 = vld [vmem:[%s6568_s1 + $0x8d0] ss:$8 sps:$4 sm:$0xff]  }
  0xca   :  { %2939 = vmatmul.mubr.bf16.gmra.mrb[4].mxu1 %v4820_v60  ;;  %v4914_v60 = vld [vmem:[%s6568_s1 + $0x3e4] ss:$8 sps:$4 sm:$0xff]  }
  0xcb   :  { %3344 = vmatmul.mubr.bf16.gmra.mrb[4].mxu0 %v4865_v62  ;;  %2982 = vmatpush1.bf16.msra.mxu1 %v4821_v61  ;;  %v4917_v61 = vld [vmem:[%s6568_s1 + $0x8e4] ss:$8 sps:$4 sm:$0xff]   ;;  %v4912_v62 = vld [vmem:[%s6568_s1 + $0x3e0] ss:$8 sps:$4 sm:$0xff]  }
  0xcc   :  { %3387 = vmatpush1.bf16.msra.mxu0 %v4824_v63  ;;  %2983 = vmatprep.subr.bf16.mxu1 %v4829_v0  ;;  %v4915_v63 = vld [vmem:[%s6568_s1 + $0x8e0] ss:$8 sps:$4 sm:$0xff]   ;;  %v4920_v0 = vld [vmem:[%s6568_s1 + $0x3f4] ss:$8 sps:$4 sm:$0xff]  }
  0xcd   :  { %3388 = vmatprep.subr.bf16.mxu0 %v4832_v1  ;;  %2948 = vmatprep.mubr.bf16.mxu1 %v4833_v2  ;;  %v4923_v1 = vld [vmem:[%s6568_s1 + $0x8f4] ss:$8 sps:$4 sm:$0xff]   ;;  %v4918_v2 = vld [vmem:[%s6568_s1 + $0x3f0] ss:$8 sps:$4 sm:$0xff]  }
  0xce   :  { %3353 = vmatprep.mubr.bf16.mxu0 %v4880_v3  ;;  %v4921_v3 = vld [vmem:[%s6568_s1 + $0x8f0] ss:$8 sps:$4 sm:$0xff]  }
  0xcf   :  { %2984 = vmatpush1.bf16.msra.mxu1 %v4827_v4  ;;  %v4929_v4 = vld [vmem:[%s6568_s1 + $0x404] ss:$8 sps:$4 sm:$0xff]  }
  0xd0   :  { %3389 = vmatpush1.bf16.msra.mxu0 %v4830_v5  ;;  %2985 = vmatprep.subr.bf16.mxu1 %v4838_v7  ;;  %v4935_v5 = vld [vmem:[%s6568_s1 + $0x904] ss:$8 sps:$4 sm:$0xff]   ;;  %v4927_v7 = vld [vmem:[%s6568_s1 + $0x400] ss:$8 sps:$4 sm:$0xff]  }
  0xd1   :  { %3390 = vmatprep.subr.bf16.mxu0 %v4841_v8  ;;  %v4930_v8 = vld [vmem:[%s6569_s0 + $0x40] ss:$88 sps:$4 sm:$0xff]  }
  0xd2   :  { %2949 = vmatmul.mubr.bf16.gmra.mrb[8].mxu1 %v4835_v6  ;;  %v4924_v6 = vld [vmem:[%s6569_s0 + $0x18] ss:$88 sps:$4 sm:$0xff]  }
  0xd3   :  { %3354 = vmatmul.mubr.bf16.gmra.mrb[8].mxu0 %v4882_v10  ;;  %2986 = vmatpush1.bf16.msra.mxu1 %v4836_v9  ;;  %v4933_v9 = vld [vmem:[%s6568_s1 + $0x900] ss:$8 sps:$4 sm:$0xff]   ;;  %v4938_v10 = vld [vmem:[%s6568_s1 + $0x414] ss:$8 sps:$4 sm:$0xff]  }
  0xd4   :  { %3391 = vmatpush1.bf16.msra.mxu0 %v4839_v11  ;;  %2987 = vmatprep.subr.bf16.mxu1 %v4844_v12  ;;  %v4941_v11 = vld [vmem:[%s6568_s1 + $0x914] ss:$8 sps:$4 sm:$0xff]   ;;  %v4942_v12 = vld [vmem:[%s6569_s0 + $0xcc] ss:$88 sps:$4 sm:$0xff]  }
  0xd5   :  { %3392 = vmatprep.subr.bf16.mxu0 %v4847_v13  ;;  %2958 = vmatprep.mubr.bf16.mxu1 %v4848_v14  ;;  %v4987_v13 = vld [vmem:[%s6569_s0 + $0xf4] ss:$88 sps:$4 sm:$0xff]   ;;  %v4936_v14 = vld [vmem:[%s6568_s1 + $0x410] ss:$8 sps:$4 sm:$0xff]  }
  0xd6   :  { %3363 = vmatprep.mubr.bf16.mxu0 %v4895_v15  ;;  %v4939_v15 = vld [vmem:[%s6568_s1 + $0x910] ss:$8 sps:$4 sm:$0xff]  }
  0xd7   :  { %2988 = vmatpush1.bf16.msra.mxu1 %v4842_v16  ;;  %v4947_v16 = vld [vmem:[%s6568_s1 + $0x424] ss:$8 sps:$4 sm:$0xff]  }
  0xd8   :  { %3393 = vmatpush1.bf16.msra.mxu0 %v4845_v17  ;;  %2989 = vmatprep.subr.bf16.mxu1 %v4853_v18  ;;  %v4950_v17 = vld [vmem:[%s6568_s1 + $0x924] ss:$8 sps:$4 sm:$0xff]   ;;  %v4944_v18 = vld [vmem:[%s6569_s0 + $0xc8] ss:$88 sps:$4 sm:$0xff]  }
  0xd9   :  { %3394 = vmatprep.subr.bf16.mxu0 %v4856_v20  ;;  %v4948_v20 = vld [vmem:[%s6568_s1 + $0x920] ss:$8 sps:$4 sm:$0xff]  }
  0xda   :  { %2959 = vmatmul.mubr.bf16.gmra.mrb[12].mxu1 %v4850_v19  ;;  %v4945_v19 = vld [vmem:[%s6568_s1 + $0x420] ss:$8 sps:$4 sm:$0xff]  }
  0xdb   :  { %3364 = vmatmul.mubr.bf16.gmra.mrb[12].mxu0 %v4897_v22  ;;  %2990 = vmatpush1.bf16.msra.mxu1 %v4851_v24  ;;  %v4953_v22 = vld [vmem:[%s6568_s1 + $0x434] ss:$8 sps:$4 sm:$0xff]  }
  0xdc   :  { %3395 = vmatpush1.bf16.msra.mxu0 %v4854_v25  ;;  %2991 = vmatprep.subr.bf16.mxu1 %v4859_v26  ;;  %v4957_v24 = vld [vmem:[%s6569_s0 + $0x17c] ss:$88 sps:$4 sm:$0xff]   ;;  %v4951_v26 = vld [vmem:[%s6568_s1 + $0x430] ss:$8 sps:$4 sm:$0xff]  }
  0xdd   :  { %3396 = vmatprep.subr.bf16.mxu0 %v4862_v27  ;;  %2968 = vmatprep.mubr.bf16.mxu1 %v3892_v28  ;;  %v5004_v25 = vld [vmem:[%s6569_s0 + $0x1a4] ss:$88 sps:$4 sm:$0xff]   ;;  %v4954_v27 = vld [vmem:[%s6568_s1 + $0x930] ss:$8 sps:$4 sm:$0xff]  }
  0xde   :  { %3373 = vmatprep.mubr.bf16.mxu0 %v3902_v29  ;;  %v4962_v28 = vld [vmem:[%s6568_s1 + $0x444] ss:$8 sps:$4 sm:$0xff]  }
  0xdf   :  { %2992 = vmatpush1.bf16.msra.mxu1 %v4857_v30  ;;  %v4965_v29 = vld [vmem:[%s6568_s1 + $0x944] ss:$8 sps:$4 sm:$0xff]   ;;  %v4959_v30 = vld [vmem:[%s6569_s0 + $0x178] ss:$88 sps:$4 sm:$0xff]  }
  0xe0   :  { %3397 = vmatpush1.bf16.msra.mxu0 %v4860_v31  ;;  %2993 = vmatprep.subr.bf16.mxu1 %v4870_v32  ;;  %v4960_v31 = vld [vmem:[%s6568_s1 + $0x440] ss:$8 sps:$4 sm:$0xff]  }
  0xe1   :  { %3398 = vmatprep.subr.bf16.mxu0 %v4873_v33  ;;  %v4963_v32 = vld [vmem:[%s6568_s1 + $0x940] ss:$8 sps:$4 sm:$0xff]  }
  0xe2   :  { %2969 = vmatmul.mubr.bf16.gmra.mrb[24].mxu1 %v3891_v34  ;;  %v5006_v33 = vld [vmem:[%s6569_s0 + $0x1a0] ss:$88 sps:$4 sm:$0xff]   ;;  %v4968_v34 = vld [vmem:[%s6568_s1 + $0x454] ss:$8 sps:$4 sm:$0xff]  }
  0xe3   :  { %3374 = vmatmul.mubr.bf16.gmra.mrb[24].mxu0 %v3901_v36  ;;  %2994 = vmatpush1.bf16.msra.mxu1 %v4868_v35  ;;  %v4971_v35 = vld [vmem:[%s6568_s1 + $0x954] ss:$8 sps:$4 sm:$0xff]   ;;  %v4972_v36 = vld [vmem:[%s6569_s0 + $0x22c] ss:$88 sps:$4 sm:$0xff]  }
  0xe4   :  { %3399 = vmatpush1.bf16.msra.mxu0 %v4871_v37  ;;  %2995 = vmatprep.subr.bf16.mxu1 %v4876_v38  ;;  %v5019_v37 = vld [vmem:[%s6569_s0 + $0x254] ss:$88 sps:$4 sm:$0xff]   ;;  %v4966_v38 = vld [vmem:[%s6568_s1 + $0x450] ss:$8 sps:$4 sm:$0xff]  }
  0xe5   :  { %3400 = vmatprep.subr.bf16.mxu0 %v4879_v39  ;;  %3009 = vmatprep.mubr.bf16.mxu1 %v4926_v40  ;;  %v4969_v39 = vld [vmem:[%s6568_s1 + $0x950] ss:$8 sps:$4 sm:$0xff]   ;;  %v4977_v40 = vld [vmem:[%s6568_s1 + $0x464] ss:$8 sps:$4 sm:$0xff]  }
  0xe6   :  { %3414 = vmatprep.mubr.bf16.mxu0 %v4932_v41  ;;  %v4980_v41 = vld [vmem:[%s6568_s1 + $0x964] ss:$8 sps:$4 sm:$0xff]  }
  0xe7   :  { %2996 = vmatpush1.bf16.msra.mxu1 %v4874_v42  ;;  %v4974_v42 = vld [vmem:[%s6569_s0 + $0x228] ss:$88 sps:$4 sm:$0xff]  }
  0xe8   :  { %3401 = vmatpush1.bf16.msra.mxu0 %v4877_v43  ;;  %2997 = vmatprep.subr.bf16.mxu1 %v4885_v44  ;;  %v146_v43 = vld [vmem:[%s6569_s0 + $0x2d8] sm:$0xff]  ;;  %v5021_v44 = vld [vmem:[%s6569_s0 + $0x250] ss:$88 sps:$4 sm:$0xff]  }
  0xe9   :  { %3402 = vmatprep.subr.bf16.mxu0 %v4888_v45  ;;  %v151_v45 = vld [vmem:[%s6569_s0 + $0x300] sm:$0xff] }
  0xeb   :  { %2998 = vmatpush1.bf16.msra.mxu1 %v4883_v46  ;;  %v4975_v46 = vld [vmem:[%s6568_s1 + $0x460] ss:$8 sps:$4 sm:$0xff]  }
  0xec   :  { %3403 = vmatpush1.bf16.msra.mxu0 %v4886_v47  ;;  %2999 = vmatprep.subr.bf16.mxu1 %v4891_v48  ;;  %v4978_v47 = vld [vmem:[%s6568_s1 + $0x960] ss:$8 sps:$4 sm:$0xff]   ;;  %v4983_v48 = vld [vmem:[%s6568_s1 + $0x474] ss:$8 sps:$4 sm:$0xff]  }
  0xed   :  { %3404 = vmatprep.subr.bf16.mxu0 %v4894_v49  ;;  %v4986_v49 = vld [vmem:[%s6568_s1 + $0x974] ss:$8 sps:$4 sm:$0xff]  }
  0xef   :  { %3000 = vmatpush1.bf16.msra.mxu1 %v4889_v50  ;;  %v3894_v50 = vcombine.high %v146_v43, %v146_v43 }
  0xf0   :  { %3405 = vmatpush1.bf16.msra.mxu0 %v4892_v51  ;;  %3001 = vmatprep.subr.bf16.mxu1 %v4900_v52  ;;  %v3904_v51 = vcombine.high %v151_v45, %v151_v45  ;;  %v4981_v52 = vld [vmem:[%s6568_s1 + $0x470] ss:$8 sps:$4 sm:$0xff]  }
  0xf1   :  { %3406 = vmatprep.subr.bf16.mxu0 %v4903_v53  ;;  %v4984_v53 = vld [vmem:[%s6568_s1 + $0x970] ss:$8 sps:$4 sm:$0xff]  }
  0xf3   :  { %3002 = vmatpush1.bf16.msra.mxu1 %v4898_v54  ;;  %v4994_v54 = vld [vmem:[%s6568_s1 + $0x484] ss:$8 sps:$4 sm:$0xff]  }
  0xf4   :  { %3407 = vmatpush1.bf16.msra.mxu0 %v4901_v55  ;;  %3003 = vmatprep.subr.bf16.mxu1 %v4906_v56  ;;  %v4997_v55 = vld [vmem:[%s6568_s1 + $0x984] ss:$8 sps:$4 sm:$0xff]   ;;  %v3893_v56 = vcombine.low %v146_v43, %v146_v43  ;;  %v5064_v43 = vld [vmem:[%s6569_s0 + $0xd0] ss:$88 sps:$4 sm:$0xff]  }
  0xf5   :  { %3408 = vmatprep.subr.bf16.mxu0 %v4909_v57  ;;  %v3903_v57 = vcombine.low %v151_v45, %v151_v45  ;;  %v5066_v45 = vld [vmem:[%s6568_s1 + $0xa20] ss:$8 sps:$4 sm:$0xff]  }
  0xf7   :  { %3004 = vmatpush1.bf16.msra.mxu1 %v4904_v58  ;;  %v4992_v58 = vld [vmem:[%s6568_s1 + $0x480] ss:$8 sps:$4 sm:$0xff]  }
  0xf8   :  { %3409 = vmatpush1.bf16.msra.mxu0 %v4907_v59  ;;  %3005 = vmatprep.subr.bf16.mxu1 %v4914_v60  ;;  %v4995_v59 = vld [vmem:[%s6568_s1 + $0x980] ss:$8 sps:$4 sm:$0xff]   ;;  %v5000_v60 = vld [vmem:[%s6568_s1 + $0x494] ss:$8 sps:$4 sm:$0xff]  }
  0xf9   :  { %3410 = vmatprep.subr.bf16.mxu0 %v4917_v61  ;;  %v5003_v61 = vld [vmem:[%s6568_s1 + $0x994] ss:$8 sps:$4 sm:$0xff]  }
  0xfb   :  { %3006 = vmatpush1.bf16.msra.mxu1 %v4912_v62  ;;  %v5050_v62 = vld [vmem:[%s6569_s0 + $0x24] ss:$88 sps:$4 sm:$0xff]  }
  0xfc   :  { %3411 = vmatpush1.bf16.msra.mxu0 %v4915_v63  ;;  %3007 = vmatprep.subr.bf16.mxu1 %v4920_v0  ;;  %v5053_v63 = vld [vmem:[%s6569_s0 + $0x4c] ss:$88 sps:$4 sm:$0xff]   ;;  %v4998_v0 = vld [vmem:[%s6568_s1 + $0x490] ss:$8 sps:$4 sm:$0xff]  }
  0xfd   :  { %3412 = vmatprep.subr.bf16.mxu0 %v4923_v1  ;;  %v5001_v1 = vld [vmem:[%s6568_s1 + $0x990] ss:$8 sps:$4 sm:$0xff]  }
  0xff   :  { %3008 = vmatpush1.bf16.msra.mxu1 %v4918_v2  ;;  %v5009_v2 = vld [vmem:[%s6568_s1 + $0x4a4] ss:$8 sps:$4 sm:$0xff]  }
 0x100   :  { %3413 = vmatpush1.bf16.msra.mxu0 %v4921_v3  ;;  %3058 = vmatprep.subr.bf16.mxu1 %v4929_v4  ;;  %v5012_v3 = vld [vmem:[%s6568_s1 + $0x9a4] ss:$8 sps:$4 sm:$0xff]   ;;  %v5007_v4 = vld [vmem:[%s6568_s1 + $0x4a0] ss:$8 sps:$4 sm:$0xff]  }
 0x101   :  { %3463 = vmatprep.subr.bf16.mxu0 %v4935_v5  ;;  %v5010_v5 = vld [vmem:[%s6568_s1 + $0x9a0] ss:$8 sps:$4 sm:$0xff]  }
 0x102   :  { %3010 = vmatmul.mubr.bf16.vlgmr.msra.gmra.mrb[0].mxu1 %v4924_v6  ;;  %v5015_v6 = vld [vmem:[%s6568_s1 + $0x4b4] ss:$8 sps:$4 sm:$0xff]  }
 0x103   :  { %3415 = vmatmul.mubr.bf16.vlgmr.msra.gmra.mrb[0].mxu0 %v4930_v8  ;;  %3059 = vmatpush1.bf16.msra.mxu1 %v4927_v7  ;;  %v5018_v7 = vld [vmem:[%s6568_s1 + $0x9b4] ss:$8 sps:$4 sm:$0xff]   ;;  %v5013_v8 = vld [vmem:[%s6568_s1 + $0x4b0] ss:$8 sps:$4 sm:$0xff]  }
 0x104   :  { %3464 = vmatpush1.bf16.msra.mxu0 %v4933_v9  ;;  %3060 = vmatprep.subr.bf16.mxu1 %v4938_v10  ;;  %v5016_v9 = vld [vmem:[%s6568_s1 + $0x9b0] ss:$8 sps:$4 sm:$0xff]   ;;  %v5024_v10 = vld [vmem:[%s6568_s1 + $0x4c4] ss:$8 sps:$4 sm:$0xff]  }
 0x105   :  { %3465 = vmatprep.subr.bf16.mxu0 %v4941_v11  ;;  %3019 = vmatprep.mubr.bf16.mxu1 %v4942_v12  ;;  %v5027_v11 = vld [vmem:[%s6568_s1 + $0x9c4] ss:$8 sps:$4 sm:$0xff]   ;;  %v5022_v12 = vld [vmem:[%s6568_s1 + $0x4c0] ss:$8 sps:$4 sm:$0xff]  }
 0x106   :  { %3424 = vmatprep.mubr.bf16.mxu0 %v4987_v13  ;;  %v5025_v13 = vld [vmem:[%s6568_s1 + $0x9c0] ss:$8 sps:$4 sm:$0xff]  }
 0x107   :  { %3061 = vmatpush1.bf16.msra.mxu1 %v4936_v14  ;;  %v5030_v14 = vld [vmem:[%s6568_s1 + $0x4d4] ss:$8 sps:$4 sm:$0xff]  }
 0x108   :  { %3466 = vmatpush1.bf16.msra.mxu0 %v4939_v15  ;;  %3062 = vmatprep.subr.bf16.mxu1 %v4947_v16  ;;  %v5033_v15 = vld [vmem:[%s6568_s1 + $0x9d4] ss:$8 sps:$4 sm:$0xff]   ;;  %v5028_v16 = vld [vmem:[%s6568_s1 + $0x4d0] ss:$8 sps:$4 sm:$0xff]  }
 0x109   :  { %3467 = vmatprep.subr.bf16.mxu0 %v4950_v17  ;;  %v5031_v17 = vld [vmem:[%s6568_s1 + $0x9d0] ss:$8 sps:$4 sm:$0xff]  }
 0x10a   :  { %3020 = vmatmul.mubr.bf16.gmra.mrb[4].mxu1 %v4944_v18  ;;  %v5038_v18 = vld [vmem:[%s6568_s1 + $0x4e4] ss:$8 sps:$4 sm:$0xff]  }
 0x10b   :  { %3425 = vmatmul.mubr.bf16.gmra.mrb[4].mxu0 %v4989_v21  ;;  %3063 = vmatpush1.bf16.msra.mxu1 %v4945_v19  ;;  %v5041_v19 = vld [vmem:[%s6568_s1 + $0x9e4] ss:$8 sps:$4 sm:$0xff]  }
 0x10c   :  { %3468 = vmatpush1.bf16.msra.mxu0 %v4948_v20  ;;  %3064 = vmatprep.subr.bf16.mxu1 %v4953_v22 }
 0x10d   :  { %3469 = vmatprep.subr.bf16.mxu0 %v4956_v23  ;;  %3029 = vmatprep.mubr.bf16.mxu1 %v4957_v24  ;;  %v5036_v24 = vld [vmem:[%s6568_s1 + $0x4e0] ss:$8 sps:$4 sm:$0xff]  }
 0x10e   :  { %3434 = vmatprep.mubr.bf16.mxu0 %v5004_v25  ;;  %v5039_v25 = vld [vmem:[%s6568_s1 + $0x9e0] ss:$8 sps:$4 sm:$0xff]  }
 0x10f   :  { %3065 = vmatpush1.bf16.msra.mxu1 %v4951_v26 }
 0x110   :  { %3470 = vmatpush1.bf16.msra.mxu0 %v4954_v27  ;;  %3066 = vmatprep.subr.bf16.mxu1 %v4962_v28  ;;  %v5044_v28 = vld [vmem:[%s6568_s1 + $0x4f4] ss:$8 sps:$4 sm:$0xff]  }
 0x111   :  { %3471 = vmatprep.subr.bf16.mxu0 %v4965_v29  ;;  %v5047_v29 = vld [vmem:[%s6568_s1 + $0x9f4] ss:$8 sps:$4 sm:$0xff]  }
 0x112   :  { %3030 = vmatmul.mubr.bf16.gmra.mrb[8].mxu1 %v4959_v30 }
 0x113   :  { %3435 = vmatmul.mubr.bf16.gmra.mrb[8].mxu0 %v5006_v33  ;;  %3067 = vmatpush1.bf16.msra.mxu1 %v4960_v31  ;;  %v5045_v33 = vld [vmem:[%s6568_s1 + $0x9f0] ss:$8 sps:$4 sm:$0xff]  }
 0x114   :  { %3472 = vmatpush1.bf16.msra.mxu0 %v4963_v32  ;;  %3068 = vmatprep.subr.bf16.mxu1 %v4968_v34  ;;  %v5042_v32 = vld [vmem:[%s6568_s1 + $0x4f0] ss:$8 sps:$4 sm:$0xff]   ;;  %v5056_v34 = vld [vmem:[%s6568_s1 + $0xa04] ss:$8 sps:$4 sm:$0xff]  }
 0x115   :  { %3473 = vmatprep.subr.bf16.mxu0 %v4971_v35  ;;  %3039 = vmatprep.mubr.bf16.mxu1 %v4972_v36  ;;  %v5048_v35 = vld [vmem:[%s6569_s0 + $0x20] ss:$88 sps:$4 sm:$0xff]  }
 0x116   :  { %3444 = vmatprep.mubr.bf16.mxu0 %v5019_v37  ;;  %v5051_v36 = vld [vmem:[%s6569_s0 + $0x48] ss:$88 sps:$4 sm:$0xff]  }
 0x117   :  { %3069 = vmatpush1.bf16.msra.mxu1 %v4966_v38  ;;  %v5054_v37 = vld [vmem:[%s6568_s1 + $0xa00] ss:$8 sps:$4 sm:$0xff]   ;;  %v5059_v38 = vld [vmem:[%s6568_s1 + $0xa14] ss:$8 sps:$4 sm:$0xff]  }
 0x118   :  { %3474 = vmatpush1.bf16.msra.mxu0 %v4969_v39  ;;  %3070 = vmatprep.subr.bf16.mxu1 %v4977_v40  ;;  %v5060_v39 = vld [vmem:[%s6569_s0 + $0xd4] ss:$88 sps:$4 sm:$0xff]  }
 0x119   :  { %3475 = vmatprep.subr.bf16.mxu0 %v4980_v41  ;;  %v5062_v40 = vld [vmem:[%s6569_s0 + $0xfc] ss:$88 sps:$4 sm:$0xff]   ;;  %v5057_v41 = vld [vmem:[%s6568_s1 + $0xa10] ss:$8 sps:$4 sm:$0xff]  }
 0x11a   :  { %3040 = vmatmul.mubr.bf16.gmra.mrb[12].mxu1 %v4974_v42  ;;  %v5068_v42 = vld [vmem:[%s6568_s1 + $0xa24] ss:$8 sps:$4 sm:$0xff]  }
 0x11b   :  { %3445 = vmatmul.mubr.bf16.gmra.mrb[12].mxu0 %v5021_v44  ;;  %3071 = vmatpush1.bf16.msra.mxu1 %v4975_v46  ;;  %v5065_v44 = vld [vmem:[%s6569_s0 + $0xf8] ss:$88 sps:$4 sm:$0xff]   ;;  %v5071_v46 = vld [vmem:[%s6568_s1 + $0xa34] ss:$8 sps:$4 sm:$0xff]  }
 0x11c   :  { %3476 = vmatpush1.bf16.msra.mxu0 %v4978_v47  ;;  %3072 = vmatprep.subr.bf16.mxu1 %v4983_v48  ;;  %v5072_v47 = vld [vmem:[%s6569_s0 + $0x184] ss:$88 sps:$4 sm:$0xff]  }
 0x11d   :  { %3477 = vmatprep.subr.bf16.mxu0 %v4986_v49  ;;  %3049 = vmatprep.mubr.bf16.mxu1 %v3894_v50  ;;  %v5074_v48 = vld [vmem:[%s6569_s0 + $0x1ac] ss:$88 sps:$4 sm:$0xff]   ;;  %v5069_v49 = vld [vmem:[%s6568_s1 + $0xa30] ss:$8 sps:$4 sm:$0xff]  }
 0x11e   :  { %3454 = vmatprep.mubr.bf16.mxu0 %v3904_v51  ;;  %v5080_v50 = vld [vmem:[%s6568_s1 + $0xa44] ss:$8 sps:$4 sm:$0xff]   ;;  %v5076_v51 = vld [vmem:[%s6569_s0 + $0x180] ss:$88 sps:$4 sm:$0xff]  }
 0x11f   :  { %3073 = vmatpush1.bf16.msra.mxu1 %v4981_v52  ;;  %v5077_v52 = vld [vmem:[%s6569_s0 + $0x1a8] ss:$88 sps:$4 sm:$0xff]  }
 0x120   :  { %3478 = vmatpush1.bf16.msra.mxu0 %v4984_v53  ;;  %3074 = vmatprep.subr.bf16.mxu1 %v4994_v54  ;;  %v5078_v53 = vld [vmem:[%s6568_s1 + $0xa40] ss:$8 sps:$4 sm:$0xff]   ;;  %v5083_v54 = vld [vmem:[%s6568_s1 + $0xa54] ss:$8 sps:$4 sm:$0xff]  }
 0x121   :  { %3479 = vmatprep.subr.bf16.mxu0 %v4997_v55  ;;  %v5084_v55 = vld [vmem:[%s6569_s0 + $0x234] ss:$88 sps:$4 sm:$0xff]  }
 0x122   :  { %3050 = vmatmul.mubr.bf16.gmra.mrb[28].mxu1 %v3893_v56  ;;  %v5086_v56 = vld [vmem:[%s6569_s0 + $0x25c] ss:$88 sps:$4 sm:$0xff]  }
 0x123   :  { %3455 = vmatmul.mubr.bf16.gmra.mrb[28].mxu0 %v3903_v57  ;;  %3075 = vmatpush1.bf16.msra.mxu1 %v4992_v58  ;;  %v5081_v57 = vld [vmem:[%s6568_s1 + $0xa50] ss:$8 sps:$4 sm:$0xff]   ;;  %v5092_v58 = vld [vmem:[%s6568_s1 + $0xa64] ss:$8 sps:$4 sm:$0xff]  }
 0x124   :  { %3480 = vmatpush1.bf16.msra.mxu0 %v4995_v59  ;;  %3076 = vmatprep.subr.bf16.mxu1 %v5000_v60  ;;  %v5088_v59 = vld [vmem:[%s6569_s0 + $0x230] ss:$88 sps:$4 sm:$0xff]  }
 0x125   :  { %3481 = vmatprep.subr.bf16.mxu0 %v5003_v61  ;;  %3090 = vmatprep.mubr.bf16.mxu1 %v5050_v62  ;;  %v5089_v60 = vld [vmem:[%s6569_s0 + $0x258] ss:$88 sps:$4 sm:$0xff]   ;;  %v147_v61 = vld [vmem:[%s6569_s0 + $0x2e0] sm:$0xff]  ;;  %v152_v62 = vld [vmem:[%s6569_s0 + $0x308] sm:$0xff] }
 0x126   :  { %3495 = vmatprep.mubr.bf16.mxu0 %v5053_v63  ;;  %v5090_v63 = vld [vmem:[%s6568_s1 + $0xa60] ss:$8 sps:$4 sm:$0xff]  }
 0x127   :  { %3077 = vmatpush1.bf16.msra.mxu1 %v4998_v0  ;;  %v5095_v0 = vld [vmem:[%s6568_s1 + $0xa74] ss:$8 sps:$4 sm:$0xff]  }
 0x128   :  { %3482 = vmatpush1.bf16.msra.mxu0 %v5001_v1  ;;  %3078 = vmatprep.subr.bf16.mxu1 %v5009_v2  ;;  %v3896_v1 = vcombine.high %v147_v61, %v147_v61  ;;  %v3906_v2 = vcombine.high %v152_v62, %v152_v62 }
 0x129   :  { %3483 = vmatprep.subr.bf16.mxu0 %v5012_v3  ;;  %v5093_v3 = vld [vmem:[%s6568_s1 + $0xa70] ss:$8 sps:$4 sm:$0xff]  }
 0x12b   :  { %3079 = vmatpush1.bf16.msra.mxu1 %v5007_v4  ;;  %v5101_v4 = vld [vmem:[%s6568_s1 + $0xa84] ss:$8 sps:$4 sm:$0xff]  }
 0x12c   :  { %3484 = vmatpush1.bf16.msra.mxu0 %v5010_v5  ;;  %3080 = vmatprep.subr.bf16.mxu1 %v5015_v6  ;;  %v3895_v5 = vcombine.low %v147_v61, %v147_v61  ;;  %v3905_v6 = vcombine.low %v152_v62, %v152_v62 }
 0x12d   :  { %3485 = vmatprep.subr.bf16.mxu0 %v5018_v7  ;;  %v5099_v7 = vld [vmem:[%s6568_s1 + $0xa80] ss:$8 sps:$4 sm:$0xff]  }
 0x12f   :  { %3081 = vmatpush1.bf16.msra.mxu1 %v5013_v8  ;;  %v5105_v8 = vld [vmem:[%s6568_s1 + $0xa94] ss:$8 sps:$4 sm:$0xff]  }
 0x130   :  { %3486 = vmatpush1.bf16.msra.mxu0 %v5016_v9  ;;  %3082 = vmatprep.subr.bf16.mxu1 %v5024_v10  ;;  %v5111_v9 = vld [vmem:[%s6569_s0 + $0x54] ss:$88 sps:$4 sm:$0xff]   ;;  %v5114_v10 = vld [vmem:[%s6569_s0 + $0x264] ss:$88 sps:$4 sm:$0xff]  }
 0x131   :  { %3487 = vmatprep.subr.bf16.mxu0 %v5027_v11  ;;  %v5103_v11 = vld [vmem:[%s6568_s1 + $0xa90] ss:$8 sps:$4 sm:$0xff]  }
 0x133   :  { %3083 = vmatpush1.bf16.msra.mxu1 %v5022_v12  ;;  %v5108_v12 = vld [vmem:[%s6568_s1 + $0xaa4] ss:$8 sps:$4 sm:$0xff]  }
 0x134   :  { %3488 = vmatpush1.bf16.msra.mxu0 %v5025_v13  ;;  %3084 = vmatprep.subr.bf16.mxu1 %v5030_v14  ;;  %v5106_v13 = vld [vmem:[%s6568_s1 + $0xaa0] ss:$8 sps:$4 sm:$0xff]   ;;  %v153_v14 = vld [vmem:[%s6569_s0 + $0x310] sm:$0xff] }
 0x135   :  { %3489 = vmatprep.subr.bf16.mxu0 %v5033_v15  ;;  %v6309_v21 = vpop.f32.mrb[16].mxu1  ;;  %v5109_v15 = vld [vmem:[%s6569_s0 + $0x50] ss:$88 sps:$4 sm:$0xff]  }
 0x136   :  { %v6307_v20 = vpop.f32.mrb[16].mxu0  ;;  %v6313_v23 = vpop.f32.mrb[17].mxu1 }
 0x137   :  { %v6311_v22 = vpop.f32.mrb[17].mxu0  ;;  %3085 = vmatpush1.bf16.msra.mxu1 %v5028_v16  ;;  %v2812_v27 = vpop.f32.mrb[18].mxu1  ;;  %v5112_v16 = vld [vmem:[%s6569_s0 + $0x260] ss:$88 sps:$4 sm:$0xff]  }
 0x138   :  { %3490 = vmatpush1.bf16.msra.mxu0 %v5031_v17  ;;  %v3217_v26 = vpop.f32.mrb[18].mxu0  ;;  %3086 = vmatprep.subr.bf16.mxu1 %v5038_v18  ;;  %v2813_v31 = vpop.f32.mrb[19].mxu1  ;;  %v5115_v17 = vld [vmem:[%s6569_s0 + $0x104] ss:$88 sps:$4 sm:$0xff]   ;;  %v3908_v18 = vcombine.high %v153_v14, %v153_v14 }
 0x139   :  { %3491 = vmatprep.subr.bf16.mxu0 %v5041_v19  ;;  %v3218_v30 = vpop.f32.mrb[19].mxu0  ;;  %v5118_v19 = vld [vmem:[%s6569_s0 + $0x100] ss:$88 sps:$4 sm:$0xff]  }
 0x13b   :  { %3087 = vmatpush1.bf16.msra.mxu1 %v5036_v24  ;;  %v3907_v24 = vcombine.low %v153_v14, %v153_v14 }
 0x13c   :  { %3492 = vmatpush1.bf16.msra.mxu0 %v5039_v25  ;;  %3088 = vmatprep.subr.bf16.mxu1 %v5044_v28  ;;  %v5120_v25 = vld [vmem:[%s6569_s0 + $0x1b4] ss:$88 sps:$4 sm:$0xff]  }
 0x13d   :  { %3493 = vmatprep.subr.bf16.mxu0 %v5047_v29 }
 0x13f   :  { %3089 = vmatpush1.bf16.msra.mxu1 %v5042_v32 }
 0x140   :  { %3494 = vmatpush1.bf16.msra.mxu0 %v5045_v33  ;;  %4274 = vmatprep.subr.bf16.mxu1 %v5056_v34 }
 0x141   :  { %3544 = vmatprep.subr.bf16.mxu0 %v5056_v34 }
 0x142   :  { %3091 = vmatmul.mubr.bf16.vlgmr.msra.gmra.mrb[0].mxu1 %v5048_v35 }
 0x143   :  { %3496 = vmatmul.mubr.bf16.vlgmr.msra.gmra.mrb[0].mxu0 %v5051_v36  ;;  %4285 = vmatpush1.bf16.msra.mxu1 %v5054_v37  ;;  %v5122_v36 = vld [vmem:[%s6569_s0 + $0x1b0] ss:$88 sps:$4 sm:$0xff]  }
 0x144   :  { %3545 = vmatpush1.bf16.msra.mxu0 %v5054_v37  ;;  %4275 = vmatprep.subr.bf16.mxu1 %v5059_v38 }
 0x145   :  { %3546 = vmatprep.subr.bf16.mxu0 %v5059_v38  ;;  %3100 = vmatprep.mubr.bf16.mxu1 %v5060_v39 }
 0x146   :  { %3505 = vmatprep.mubr.bf16.mxu0 %v5062_v40 }
 0x147   :  { %4286 = vmatpush1.bf16.msra.mxu1 %v5057_v41 }
 0x148   :  { %3547 = vmatpush1.bf16.msra.mxu0 %v5057_v41  ;;  %4276 = vmatprep.subr.bf16.mxu1 %v5068_v42 }
 0x149   :  { %3548 = vmatprep.subr.bf16.mxu0 %v5068_v42 }
 0x14a   :  { %3101 = vmatmul.mubr.bf16.gmra.mrb[4].mxu1 %v5064_v43 }
 0x14b   :  { %3506 = vmatmul.mubr.bf16.gmra.mrb[4].mxu0 %v5065_v44  ;;  %4287 = vmatpush1.bf16.msra.mxu1 %v5066_v45 }
 0x14c   :  { %3549 = vmatpush1.bf16.msra.mxu0 %v5066_v45  ;;  %4277 = vmatprep.subr.bf16.mxu1 %v5071_v46 }
 0x14d   :  { %3550 = vmatprep.subr.bf16.mxu0 %v5071_v46  ;;  %3110 = vmatprep.mubr.bf16.mxu1 %v5072_v47 }
 0x14e   :  { %3515 = vmatprep.mubr.bf16.mxu0 %v5074_v48 }
 0x14f   :  { %4288 = vmatpush1.bf16.msra.mxu1 %v5069_v49 }
 0x150   :  { %3551 = vmatpush1.bf16.msra.mxu0 %v5069_v49  ;;  %4278 = vmatprep.subr.bf16.mxu1 %v5080_v50 }
 0x151   :  { %3552 = vmatprep.subr.bf16.mxu0 %v5080_v50 }
 0x152   :  { %3111 = vmatmul.mubr.bf16.gmra.mrb[8].mxu1 %v5076_v51 }
 0x153   :  { %3516 = vmatmul.mubr.bf16.gmra.mrb[8].mxu0 %v5077_v52  ;;  %4289 = vmatpush1.bf16.msra.mxu1 %v5078_v53 }
 0x154   :  { %3553 = vmatpush1.bf16.msra.mxu0 %v5078_v53  ;;  %4279 = vmatprep.subr.bf16.mxu1 %v5083_v54 }
 0x155   :  { %3554 = vmatprep.subr.bf16.mxu0 %v5083_v54  ;;  %3120 = vmatprep.mubr.bf16.mxu1 %v5084_v55 }
 0x156   :  { %3525 = vmatprep.mubr.bf16.mxu0 %v5086_v56 }
 0x157   :  { %4290 = vmatpush1.bf16.msra.mxu1 %v5081_v57 }
 0x158   :  { %3555 = vmatpush1.bf16.msra.mxu0 %v5081_v57  ;;  %4280 = vmatprep.subr.bf16.mxu1 %v5092_v58 }
 0x159   :  { %3556 = vmatprep.subr.bf16.mxu0 %v5092_v58 }
 0x15a   :  { %3121 = vmatmul.mubr.bf16.gmra.mrb[12].mxu1 %v5088_v59 }
 0x15b   :  { %3526 = vmatmul.mubr.bf16.gmra.mrb[12].mxu0 %v5089_v60  ;;  %4291 = vmatpush1.bf16.msra.mxu1 %v5090_v63 }
 0x15c   :  { %3557 = vmatpush1.bf16.msra.mxu0 %v5090_v63  ;;  %4281 = vmatprep.subr.bf16.mxu1 %v5095_v0 }
 0x15d   :  { %3558 = vmatprep.subr.bf16.mxu0 %v5095_v0  ;;  %3130 = vmatprep.mubr.bf16.mxu1 %v3896_v1 }
 0x15e   :  { %3535 = vmatprep.mubr.bf16.mxu0 %v3906_v2 }
 0x15f   :  { %4292 = vmatpush1.bf16.msra.mxu1 %v5093_v3 }
 0x160   :  { %3559 = vmatpush1.bf16.msra.mxu0 %v5093_v3  ;;  %4282 = vmatprep.subr.bf16.mxu1 %v5101_v4 }
 0x161   :  { %3560 = vmatprep.subr.bf16.mxu0 %v5101_v4 }
 0x162   :  { %3131 = vmatmul.mubr.bf16.gmra.mrb[32].mxu1 %v3895_v5 }
 0x163   :  { %3536 = vmatmul.mubr.bf16.gmra.mrb[32].mxu0 %v3905_v6  ;;  %4293 = vmatpush1.bf16.msra.mxu1 %v5099_v7 }
 0x164   :  { %3561 = vmatpush1.bf16.msra.mxu0 %v5099_v7  ;;  %4283 = vmatprep.subr.bf16.mxu1 %v5105_v8 }
 0x165   :  { %3562 = vmatprep.subr.bf16.mxu0 %v5105_v8  ;;  %4251 = vmatprep.mubr.msk.bf16.mxu0 %vm2718_vm0, %v5111_v9 }
 0x166   :  { %4254 = vmatprep.mubr.msk.bf16.mxu1 %vm2718_vm0, %v5114_v10 }
 0x167   :  { %4294 = vmatpush1.bf16.msra.mxu1 %v5103_v11 }
 0x168   :  { %3563 = vmatpush1.bf16.msra.mxu0 %v5103_v11  ;;  %4284 = vmatprep.subr.bf16.mxu1 %v5108_v12 }
 0x169   :  { %3564 = vmatprep.subr.bf16.mxu0 %v5108_v12 }
 0x16b   :  { %4295 = vmatpush1.bf16.msra.mxu1 %v5106_v13 }
 0x16c   :  { %3565 = vmatpush1.bf16.msra.mxu0 %v5106_v13 }
 0x16e   :  { %3607 = vmatmul.mubr.bf16.vlgmr.msra.gmra.mrb[36].mxu1 %v5112_v16 }
 0x16f   :  { %3577 = vmatmul.mubr.bf16.vlgmr.msra.gmra.mrb[0].mxu0 %v5109_v15  ;;  %4255 = vmatprep.mubr.msk.bf16.mxu1 %vm2718_vm0, %v3908_v18  ;;  %v3684_v15 = vlaneseq }
 0x170   :  { %4252 = vmatprep.mubr.msk.bf16.mxu0 %vm2718_vm0, %v5115_v17 }
 0x175   :  { %v2889_v26 = vpop.f32.mrb[20].mxu1 }
 0x176   :  { %v6475_v27 = vpop.f32.mrb[20].mxu0  ;;  %v2890_v28 = vadd.f32 %v2889_v26, %v6309_v21  ;;  %v2891_v29 = vpop.f32.mrb[21].mxu1  ;;  %3617 = vmatmul.mubr.bf16.gmra.mrb[40].mxu1 %v3907_v24 }
 0x177   :  { %3587 = vmatmul.mubr.bf16.gmra.mrb[4].mxu0 %v5118_v19  ;;  %v6478_v30 = vpop.f32.mrb[21].mxu0  ;;  %v2892_v31 = vadd.f32 %v2891_v29, %v6313_v23  ;;  %v2893_v33 = vpop.f32.mrb[22].mxu1 }
 0x178   :  { %4253 = vmatprep.mubr.msk.bf16.mxu0 %vm2718_vm0, %v5120_v25  ;;  %v3298_v32 = vpop.f32.mrb[22].mxu0  ;;  %v2894_v35 = vpop.f32.mrb[23].mxu1  ;;  %v3685_v33 = vshrl.u32 %v3684_v15, 7 }
 0x179   :  { %v3299_v34 = vpop.f32.mrb[23].mxu0 }
 0x17f   :  { %3597 = vmatmul.mubr.bf16.gmra.mrb[8].mxu0 %v5122_v36 }
 0x1b5   :  { %v2970_v37 = vpop.f32.mrb[24].mxu1 }
 0x1b6   :  { %v3375_v21 = vpop.f32.mrb[24].mxu0  ;;  %v2971_v38 = vadd.f32 %v2970_v37, %v2890_v28  ;;  %v2972_v39 = vpop.f32.mrb[25].mxu1 }
 0x1b7   :  { %v3377_v40 = vpop.f32.mrb[25].mxu0  ;;  %v2973_v41 = vadd.f32 %v2972_v39, %v2892_v31  ;;  %v2974_v43 = vpop.f32.mrb[26].mxu1 }
 0x1b8   :  { %v3379_v42 = vpop.f32.mrb[26].mxu0  ;;  %v2975_v44 = vpop.f32.mrb[27].mxu1 }
 0x1b9   :  { %v3380_v23 = vpop.f32.mrb[27].mxu0  ;;  %v3690_v42 = vsub.s32 1, %v3685_v33 }
 0x1f5   :  { %v3051_v45 = vpop.f32.mrb[28].mxu1 }
 0x1f6   :  { %v3456_v46 = vpop.f32.mrb[28].mxu0  ;;  %v3052_v47 = vadd.f32 %v3051_v45, %v2971_v38  ;;  %v3053_v48 = vpop.f32.mrb[29].mxu1  ;;  %v3686_v38 = vsub.s32 0, %v3685_v33 }
 0x1f7   :  { %v3458_v49 = vpop.f32.mrb[29].mxu0  ;;  %v3054_v50 = vadd.f32 %v3053_v48, %v2973_v41  ;;  %v3055_v52 = vpop.f32.mrb[30].mxu1  ;;  %v3682_v41 = vld [vmem:[%s6570_s2] sm:$0x3] }
 0x1f8   :  { %v3460_v51 = vpop.f32.mrb[30].mxu0  ;;  %v3056_v54 = vpop.f32.mrb[31].mxu1  ;;  %v6510_v44 = vrot.slane %v3682_v41, %v3686_v38  ;;  %v6512_v48 = vrot.slane %v3682_v41, %v3690_v42 }
 0x1f9   :  { %v3461_v53 = vpop.f32.mrb[31].mxu0 }
 0x215   :  { %v3092_v55 = vpop.f32.mrb[0].mxu1 }
 0x216   :  { %v3094_v56 = vpop.f32.mrb[1].mxu1 }
 0x217   :  { %v3096_v57 = vpop.f32.mrb[2].mxu1 }
 0x218   :  { %v6485_v58 = vpop.f32.mrb[3].mxu1 }
 0x21d   :  { %v6487_v59 = vpop.f32.mrb[4].mxu1 }
 0x21e   :  { %v6489_v60 = vpop.f32.mrb[5].mxu1 }
 0x21f   :  { %v6491_v61 = vpop.f32.mrb[6].mxu1 }
 0x220   :  { %v6493_v62 = vpop.f32.mrb[7].mxu1 }
 0x225   :  { %v6495_v63 = vpop.f32.mrb[8].mxu1 }
 0x226   :  { %v6497_v0 = vpop.f32.mrb[9].mxu1 }
 0x227   :  { %v6499_v1 = vpop.f32.mrb[10].mxu1 }
 0x228   :  { %v6501_v2 = vpop.f32.mrb[11].mxu1 }
 0x22d   :  { %v3122_v3 = vpop.f32.mrb[12].mxu1 }
 0x22e   :  { %v3527_v4 = vpop.f32.mrb[12].mxu0  ;;  %v3124_v6 = vpop.f32.mrb[13].mxu1 }
 0x22f   :  { %v4308_v5 = vadd.f32 %v3527_v4, %v3122_v3  ;;  %v3529_v7 = vpop.f32.mrb[13].mxu0  ;;  %v3126_v9 = vpop.f32.mrb[14].mxu1 }
 0x230   :  { %v4310_v8 = vadd.f32 %v3529_v7, %v3124_v6  ;;  %v3531_v10 = vpop.f32.mrb[14].mxu0  ;;  %v3128_v12 = vpop.f32.mrb[15].mxu1 }
 0x231   :  { %v4312_v11 = vadd.f32 %v3531_v10, %v3126_v9  ;;  %v3533_v13 = vpop.f32.mrb[15].mxu0 }
 0x232   :  { %v4314_v14 = vadd.f32 %v3533_v13, %v3128_v12 }
 0x235   :  { %v3132_v16 = vpop.f32.mrb[32].mxu1 }
 0x236   :  { %v3537_v17 = vpop.f32.mrb[32].mxu0  ;;  %v3133_v18 = vadd.f32 %v3132_v16, %v3052_v47  ;;  %v3134_v19 = vpop.f32.mrb[33].mxu1 }
 0x237   :  { %v3539_v24 = vpop.f32.mrb[33].mxu0  ;;  %v3135_v25 = vadd.f32 %v3134_v19, %v3054_v50  ;;  %v3136_v28 = vpop.f32.mrb[34].mxu1 }
 0x238   :  { %v3541_v26 = vpop.f32.mrb[34].mxu0  ;;  %v3214_v29 = vadd.f32 %v6307_v20, %v3133_v18  ;;  %v3137_v32 = vpop.f32.mrb[35].mxu1 }
 0x239   :  { %v3542_v31 = vpop.f32.mrb[35].mxu0  ;;  %v3216_v34 = vadd.f32 %v6311_v22, %v3135_v25 }
 0x23a   :  { %v3295_v35 = vadd.f32 %v6475_v27, %v3214_v29 }
 0x23b   :  { %v3297_v36 = vadd.f32 %v6478_v30, %v3216_v34 }
 0x23c   :  { %v3376_v37 = vadd.f32 %v3375_v21, %v3295_v35 }
 0x23d   :  { %v3378_v39 = vadd.f32 %v3377_v40, %v3297_v36 }
 0x23e   :  { %v3457_v43 = vadd.f32 %v3456_v46, %v3376_v37 }
 0x23f   :  { %v3459_v23 = vadd.f32 %v3458_v49, %v3378_v39 }
 0x240   :  { %v3538_v20 = vadd.f32 %v3537_v17, %v3457_v43 }
 0x241   :  { %v3540_v45 = vadd.f32 %v3539_v24, %v3459_v23  ;;  %v3608_v22 = vpop.f32.mrb[36].mxu1 }
 0x242   :  { %v3578_v47 = vpop.f32.mrb[0].mxu0  ;;  %v4309_v30 = vadd.f32 %v4308_v5, %v3608_v22  ;;  %v3610_v50 = vpop.f32.mrb[37].mxu1 }
 0x243   :  { %v4296_v27 = vadd.f32 %v3578_v47, %v3092_v55  ;;  %v3580_v21 = vpop.f32.mrb[1].mxu0  ;;  %v4311_v51 = vadd.f32 %v4310_v8, %v3610_v50  ;;  %v3612_v53 = vpop.f32.mrb[38].mxu1 }
 0x244   :  { %v4297_v40 = vadd.f32 %v3580_v21, %v3094_v56  ;;  %v3582_v52 = vpop.f32.mrb[2].mxu0  ;;  %v3706_v46 = vadd.f32 %v4309_v30, %v6510_v44  ;;  %v4313_v3 = vadd.f32 %v4312_v11, %v3612_v53  ;;  %v3614_v6 = vpop.f32.mrb[39].mxu1 }
 0x245   :  { %v3694_v54 = vadd.f32 %v4296_v27, %v6510_v44  ;;  %v4298_v49 = vadd.f32 %v3582_v52, %v3096_v57  ;;  %v3584_v4 = vpop.f32.mrb[3].mxu0  ;;  %v3707_v9 = vadd.f32 %v4311_v51, %v6512_v48  ;;  %v4315_v5 = vadd.f32 %v4314_v14, %v3614_v6 }
 0x246   :  { %v3695_v7 = vadd.f32 %v4297_v40, %v6512_v48  ;;  %v4299_v55 = vadd.f32 %v3584_v4, %v6485_v58  ;;  %v3724_v56 = vmax.f32 %v3706_v46, 0.0  ;;  %v3708_v12 = vadd.f32 %v4313_v3, %v6510_v44 }
 0x247   :  { %v3712_v10 = vmax.f32 %v3694_v54, 0.0  ;;  %v3696_v8 = vadd.f32 %v4298_v49, %v6510_v44  ;;  %v3725_v15 = vmax.f32 %v3707_v9, 0.0  ;;  %v3709_v11 = vadd.f32 %v4315_v5, %v6512_v48 }
 0x248   :  { %v3713_v13 = vmax.f32 %v3695_v7, 0.0  ;;  %v3697_v57 = vadd.f32 %v4299_v55, %v6512_v48  ;;  %v3726_v17 = vmax.f32 %v3708_v12, 0.0 }
 0x249   :  { %v3714_v16 = vmax.f32 %v3696_v8, 0.0  ;;  %v4271_v19 = vpack.c.bf16 %v3725_v15, %v3724_v56  ;;  %v3727_v25 = vmax.f32 %v3709_v11, 0.0  ;;  %v3618_v14 = vpop.f32.mrb[40].mxu1 }
 0x24a   :  { %v4265_v18 = vpack.c.bf16 %v3713_v13, %v3712_v10  ;;  %v3715_v24 = vmax.f32 %v3697_v57, 0.0  ;;  %v3588_v58 = vpop.f32.mrb[4].mxu0  ;;  %v3619_v28 = vadd.f32 %v3618_v14, %v3538_v20  ;;  %v3620_v31 = vpop.f32.mrb[41].mxu1 }
 0x24b   :  { %v4300_v26 = vadd.f32 %v3588_v58, %v6487_v59  ;;  %v3590_v29 = vpop.f32.mrb[5].mxu0  ;;  %3792 = vst [vmem:[%s6571_s3 + $0x30] sm:$0xff] %v4271_v19  ;;  %v4272_v33 = vpack.c.bf16 %v3727_v25, %v3726_v17  ;;  %v3621_v35 = vadd.f32 %v3620_v31, %v3540_v45  ;;  %v3622_v37 = vpop.f32.mrb[42].mxu1 }
 0x24c   :  { %3786 = vst [vmem:[%s6571_s3] sm:$0xff] %v4265_v18  ;;  %v4266_v32 = vpack.c.bf16 %v3715_v24, %v3714_v16  ;;  %v4301_v34 = vadd.f32 %v3590_v29, %v6489_v60  ;;  %v3592_v36 = vpop.f32.mrb[6].mxu0  ;;  %v3710_v38 = vadd.f32 %v6510_v44, %v3619_v28  ;;  %v3623_v42 = vpop.f32.mrb[43].mxu1 }
 0x24d   :  { %v3698_v59 = vadd.f32 %v4300_v26, %v6510_v44  ;;  %v4302_v39 = vadd.f32 %v3592_v36, %v6491_v61  ;;  %v3594_v41 = vpop.f32.mrb[7].mxu0  ;;  %3793 = vst [vmem:[%s6571_s3 + $0x38] sm:$0xff] %v4272_v33  ;;  %v3711_v43 = vadd.f32 %v6512_v48, %v3621_v35 }
 0x24e   :  { %3787 = vst [vmem:[%s6571_s3 + $0x8] sm:$0xff] %v4266_v32  ;;  %v3699_v60 = vadd.f32 %v4301_v34, %v6512_v48  ;;  %v4303_v23 = vadd.f32 %v3594_v41, %v6493_v62  ;;  %v3728_v45 = vmax.f32 %v3710_v38, 0.0 }
 0x24f   :  { %v3716_v20 = vmax.f32 %v3698_v59, 0.0  ;;  %v3700_v61 = vadd.f32 %v4302_v39, %v6510_v44  ;;  %v3729_v22 = vmax.f32 %v3711_v43, 0.0 }
 0x250   :  { %v3717_v47 = vmax.f32 %v3699_v60, 0.0  ;;  %v3701_v27 = vadd.f32 %v4303_v23, %v6512_v48 }
 0x251   :  { %v3718_v30 = vmax.f32 %v3700_v61, 0.0  ;;  %v4273_v50 = vpack.c.bf16 %v3729_v22, %v3728_v45 }
 0x252   :  { %v4267_v21 = vpack.c.bf16 %v3717_v47, %v3716_v20  ;;  %v3719_v40 = vmax.f32 %v3701_v27, 0.0  ;;  %v3598_v51 = vpop.f32.mrb[8].mxu0 }
 0x253   :  { %v4304_v52 = vadd.f32 %v3598_v51, %v6495_v63  ;;  %v3600_v53 = vpop.f32.mrb[9].mxu0  ;;  %3794 = vst [vmem:[%s6571_s3 + $0x40] sm:$0xff] %v4273_v50 }
 0x254   :  { %3788 = vst [vmem:[%s6571_s3 + $0x10] sm:$0xff] %v4267_v21  ;;  %v4268_v62 = vpack.c.bf16 %v3719_v40, %v3718_v30  ;;  %v4305_v54 = vadd.f32 %v3600_v53, %v6497_v0  ;;  %v3602_v46 = vpop.f32.mrb[10].mxu0 }
 0x255   :  { %v3702_v49 = vadd.f32 %v4304_v52, %v6510_v44  ;;  %v4306_v3 = vadd.f32 %v3602_v46, %v6499_v1  ;;  %v3604_v4 = vpop.f32.mrb[11].mxu0 }
 0x256   :  { %3789 = vst [vmem:[%s6571_s3 + $0x18] sm:$0xff] %v4268_v62  ;;  %v3703_v63 = vadd.f32 %v4305_v54, %v6512_v48  ;;  %v4307_v6 = vadd.f32 %v3604_v4, %v6501_v2 }
 0x257   :  { %v3720_v7 = vmax.f32 %v3702_v49, 0.0  ;;  %v3704_v9 = vadd.f32 %v4306_v3, %v6510_v44 }
 0x258   :  { %v3721_v55 = vmax.f32 %v3703_v63, 0.0  ;;  %v3705_v0 = vadd.f32 %v4307_v6, %v6512_v48 }
 0x259   :  { %v3722_v5 = vmax.f32 %v3704_v9, 0.0 }
 0x25a   :  { %v4269_v10 = vpack.c.bf16 %v3721_v55, %v3720_v7  ;;  %v3723_v56 = vmax.f32 %v3705_v0, 0.0 }
 0x25c   :  { %3790 = vst [vmem:[%s6571_s3 + $0x20] sm:$0xff] %v4269_v10  ;;  %v4270_v1 = vpack.c.bf16 %v3723_v56, %v3722_v5 }
 0x25e   :  { %3791 = vst [vmem:[%s6571_s3 + $0x28] sm:$0xff] %v4270_v1 }

</bundles_post_ra>
